<compile_context>
chip_gen: v7x
topology: tpu7x:2x2x1
jax: 0.10.0
libtpu: 0.0.40
codegen_flags: <defaults>
</compile_context>

<pallas_src>
import math

import jax
import jax.numpy as jnp
import numpy as np
from jax.experimental import pallas as pl
from jax.experimental.pallas import tpu as pltpu

# ---- small "opt" configuration (synthetic, consistent with the module) ----
C, H, W = 4, 16, 16
INPUT_SIZE = C * H * W          # 1024
LATENT_DIM = 32                 # encoder output width; mu/sigma = 16 each
HALF_LATENT = LATENT_DIM // 2   # 16
BATCH = 2

WEIGHT_DTYPE = jnp.bfloat16     # weights streamed from HBM in bf16
OUT_DTYPE = jnp.bfloat16        # reconstruction stream emitted in bf16


def _resident_spec(shape):
    """Whole-array block whose block index never changes with the batch grid
    step -> DMA'd once, stays VMEM-resident. Single-buffered (no need to
    double-buffer a block that never changes)."""
    zeros = (0,) * len(shape)
    idx = lambda i, _z=zeros: _z
    try:
        return pl.BlockSpec(shape, idx, pipeline_mode=pl.Buffered(1))
    except TypeError:  # older BlockSpec signature without pipeline_mode
        return pl.BlockSpec(shape, idx)


def _row_spec(tm, ncols):
    """Per-batch-tile block (tile i covers rows [i*tm, (i+1)*tm))."""
    return pl.BlockSpec((tm, ncols), lambda i: (i, 0))


def vae_kernel(x_ref,
               w1_ref, b1_ref, w2_ref, b2_ref,
               w3mu_ref, b3mu_ref, w3sg_ref, b3sg_ref,
               dw1_ref, db1_ref, dw2_ref, db2_ref, dw3_ref, db3_ref,
               eps_ref,
               out_ref, kld_ref):
    """One batch tile of the fused VAE forward (bf16 weights, f32 accumulate)."""
    # ---------------- encoder ----------------
    x = x_ref[...].astype(WEIGHT_DTYPE)                  # in-kernel f32 -> bf16 cast
    h1 = jnp.dot(x, w1_ref[...],
                 preferred_element_type=jnp.float32) + b1_ref[...]
    h1 = jnp.maximum(h1, 0.0).astype(WEIGHT_DTYPE)
    h2 = jnp.dot(h1, w2_ref[...],
                 preferred_element_type=jnp.float32) + b2_ref[...]
    h2 = jnp.maximum(h2, 0.0).astype(WEIGHT_DTYPE)
    # lane-aligned mu / sigma heads (same math as chunk(2, dim=1) + ReLU)
    mu = jnp.maximum(
        jnp.dot(h2, w3mu_ref[...],
                preferred_element_type=jnp.float32) + b3mu_ref[...], 0.0)
    sigma = jnp.maximum(
        jnp.dot(h2, w3sg_ref[...],
                preferred_element_type=jnp.float32) + b3sg_ref[...], 0.0)

    # ---------------- reparameterization ----------------
    z = mu + sigma * eps_ref[...]                        # f32 (TM, HALF)

    # ------------- KL divergence: per-row unscaled partial -------------
    sig2 = sigma * sigma
    term = mu * mu + sig2 - jnp.log(1e-8 + sig2) - 1.0
    kld_ref[...] = jnp.sum(term, axis=1, keepdims=True)  # (TM, 1)

    # ---------------- decoder ----------------
    zb = z.astype(WEIGHT_DTYPE)
    d1 = jnp.dot(zb, dw1_ref[...],
                 preferred_element_type=jnp.float32) + db1_ref[...]
    d1 = jnp.maximum(d1, 0.0).astype(WEIGHT_DTYPE)
    d2 = jnp.dot(d1, dw2_ref[...],
                 preferred_element_type=jnp.float32) + db2_ref[...]
    d2 = jnp.maximum(d2, 0.0).astype(WEIGHT_DTYPE)
    logits = jnp.dot(d2, dw3_ref[...],
                     preferred_element_type=jnp.float32) + db3_ref[...]
    out_ref[...] = jax.nn.sigmoid(logits).astype(out_ref.dtype)


def _round_up(x, m):
    return ((x + m - 1) // m) * m


def _choose_tiling(b):
    """Return (b_pad, tm). Small batches: one 8-aligned tile. Large batches:
    pad to a multiple of 128 (or 256) so tiles are MXU-row-friendly and the
    batch grid has >= 2 tiles for v7x's second TensorCore."""
    if b <= 128:
        b_pad = _round_up(b, 8)
        return b_pad, b_pad
    tm = 256 if b >= 1024 else 128
    b_pad = _round_up(b, tm)
    return b_pad, tm


def vae_forward(x_nchw, params, eps):
    """x_nchw: (B, C, H, W) f32; eps: (B, HALF_LATENT) f32.
    Returns (x_recon (B,C,H,W) bf16, kld scalar f32)."""
    b = x_nchw.shape[0]
    x_flat = x_nchw.reshape(b, INPUT_SIZE)               # stays f32; cast in-kernel

    (w1, b1, w2, b2, w3mu, b3mu, w3sg, b3sg,
     dw1, db1, dw2, db2, dw3, db3) = params

    b_pad, tm = _choose_tiling(b)
    num_tiles = b_pad // tm
    if b_pad != b:
        x_flat = jnp.pad(x_flat, ((0, b_pad - b), (0, 0)))
        eps = jnp.pad(eps, ((0, b_pad - b), (0, 0)))

    inputs = (x_flat, w1, b1, w2, b2, w3mu, b3mu, w3sg, b3sg,
              dw1, db1, dw2, db2, dw3, db3, eps)

    in_specs = [_row_spec(tm, INPUT_SIZE)]
    in_specs += [_resident_spec(p.shape) for p in
                 (w1, b1, w2, b2, w3mu, b3mu, w3sg, b3sg,
                  dw1, db1, dw2, db2, dw3, db3)]
    in_specs += [_row_spec(tm, HALF_LATENT)]

    out_flat, kld_rows = pl.pallas_call(
        vae_kernel,
        out_shape=(
            jax.ShapeDtypeStruct((b_pad, INPUT_SIZE), OUT_DTYPE),
            jax.ShapeDtypeStruct((b_pad, 1), jnp.float32),
        ),
        grid_spec=pltpu.PrefetchScalarGridSpec(
            num_scalar_prefetch=0,
            grid=(num_tiles,),
            in_specs=in_specs,
            out_specs=(
                _row_spec(tm, INPUT_SIZE),
                _row_spec(tm, 1),
            ),
        ),
        compiler_params=pltpu.CompilerParams(
            dimension_semantics=("parallel",),      # batch tiles independent
            vmem_limit_bytes=32 * 1024 * 1024,      # valid on v7x (64 MiB phys)
        ),
    )(*inputs)

    # drop padded rows, scale KLD by the real batch size
    x_recon = out_flat[:b].reshape(b, C, H, W)
    kld = jnp.sum(kld_rows[:b]) * (0.5 / (b * INPUT_SIZE))
    return x_recon, kld


def init_linear(key, fan_in, fan_out):
    """PyTorch nn.Linear default init: U(-1/sqrt(fan_in), 1/sqrt(fan_in)).
    Weight stored transposed as (fan_in, fan_out) in bf16; bias (1, fan_out) f32."""
    kw, kb = jax.random.split(key)
    bound = 1.0 / math.sqrt(fan_in)
    w = jax.random.uniform(kw, (fan_in, fan_out), jnp.float32, -bound, bound)
    bvec = jax.random.uniform(kb, (1, fan_out), jnp.float32, -bound, bound)
    return w.astype(WEIGHT_DTYPE), bvec


def reference_forward(x_nchw, params, eps):
    """Pure-JAX reference mirroring the PyTorch module with the same bf16
    weight / activation casting as the kernel (f32 outputs)."""
    (w1, b1, w2, b2, w3mu, b3mu, w3sg, b3sg,
     dw1, db1, dw2, db2, dw3, db3) = params
    b = x_nchw.shape[0]

    def dense(a, w, bias):
        return jnp.dot(a.astype(WEIGHT_DTYPE), w,
                       preferred_element_type=jnp.float32) + bias

    x = x_nchw.reshape(b, INPUT_SIZE)
    h = jnp.maximum(dense(x, w1, b1), 0.0)
    h = jnp.maximum(dense(h, w2, b2), 0.0)
    mu = jnp.maximum(dense(h, w3mu, b3mu), 0.0)
    sigma = jnp.maximum(dense(h, w3sg, b3sg), 0.0)
    z = mu + sigma * eps
    kld = 0.5 * jnp.sum(mu ** 2 + sigma ** 2 - jnp.log(1e-8 + sigma ** 2) - 1.0) \
        / (b * INPUT_SIZE)
    d = jnp.maximum(dense(z, dw1, db1), 0.0)
    d = jnp.maximum(dense(d, dw2, db2), 0.0)
    d = jax.nn.sigmoid(dense(d, dw3, db3))
    return d.reshape(b, C, H, W), kld


if __name__ == "__main__":
    root = jax.random.PRNGKey(0)
    keys = jax.random.split(root, 8)

    # encoder: Linear(1024,512) -> Linear(512,256) -> Linear(256,32)
    w1, b1 = init_linear(keys[0], INPUT_SIZE, 512)
    w2, b2 = init_linear(keys[1], 512, 256)
    w3, b3 = init_linear(keys[2], 256, LATENT_DIM)
    # lane-aligned mu / sigma halves (same math as h_.chunk(2, dim=1))
    w3mu, w3sg = w3[:, :HALF_LATENT], w3[:, HALF_LATENT:]
    b3mu, b3sg = b3[:, :HALF_LATENT], b3[:, HALF_LATENT:]
    # decoder: Linear(16,256) -> Linear(256,512) -> Linear(512,1024)
    dw1, db1 = init_linear(keys[3], HALF_LATENT, 256)
    dw2, db2 = init_linear(keys[4], 256, 512)
    dw3, db3 = init_linear(keys[5], 512, INPUT_SIZE)
    params = (w1, b1, w2, b2, w3mu, b3mu, w3sg, b3sg,
              dw1, db1, dw2, db2, dw3, db3)

    x = jax.random.normal(keys[6], (BATCH, C, H, W), jnp.float32)
    # torch.randn_like(sigma) equivalent: deterministic host-side noise
    eps = jax.random.normal(keys[7], (BATCH, HALF_LATENT), jnp.float32)

    x_recon, kld = vae_forward(x, params, eps)
    jax.block_until_ready((x_recon, kld))

    x_ref, kld_ref = reference_forward(x, params, eps)
    np.testing.assert_allclose(np.asarray(x_recon).astype(np.float32),
                               np.asarray(x_ref), rtol=2e-2, atol=5e-3)
    np.testing.assert_allclose(np.asarray(kld), np.asarray(kld_ref),
                               rtol=2e-3, atol=1e-4)

    print("KERNEL_OK")
</pallas_src>

<mosaic_0001>
module attributes {stable_mosaic.version = 11 : i64} {
  func.func @vae_kernel(%arg0: i32, %arg1: memref<8x1024xf32, #tpu.memory_space<vmem>>, %arg2: memref<1024x512xbf16, #tpu.memory_space<vmem>>, %arg3: memref<1x512xf32, #tpu.memory_space<vmem>>, %arg4: memref<512x256xbf16, #tpu.memory_space<vmem>>, %arg5: memref<1x256xf32, #tpu.memory_space<vmem>>, %arg6: memref<256x16xbf16, #tpu.memory_space<vmem>>, %arg7: memref<1x16xf32, #tpu.memory_space<vmem>>, %arg8: memref<256x16xbf16, #tpu.memory_space<vmem>>, %arg9: memref<1x16xf32, #tpu.memory_space<vmem>>, %arg10: memref<16x256xbf16, #tpu.memory_space<vmem>>, %arg11: memref<1x256xf32, #tpu.memory_space<vmem>>, %arg12: memref<256x512xbf16, #tpu.memory_space<vmem>>, %arg13: memref<1x512xf32, #tpu.memory_space<vmem>>, %arg14: memref<512x1024xbf16, #tpu.memory_space<vmem>>, %arg15: memref<1x1024xf32, #tpu.memory_space<vmem>>, %arg16: memref<8x16xf32, #tpu.memory_space<vmem>>, %arg17: memref<8x1024xbf16, #tpu.memory_space<vmem>>, %arg18: memref<8x1xf32, #tpu.memory_space<vmem>>) attributes {dimension_semantics = [#tpu.dimension_semantics<parallel>], iteration_bounds = array<i64: 1>, scalar_prefetch = 0 : i64, scratch_operands = 0 : i64, tpu.core_type = #tpu.core_type<tc>, window_params = [{transform_indices = @transform_0, window_bounds = array<i64: 8, 1024>}, {pipeline_mode = #tpu.pipeline_mode<synchronous>, transform_indices = @transform_1, window_bounds = array<i64: 1024, 512>}, {pipeline_mode = #tpu.pipeline_mode<synchronous>, transform_indices = @transform_2, window_bounds = array<i64: 1, 512>}, {pipeline_mode = #tpu.pipeline_mode<synchronous>, transform_indices = @transform_3, window_bounds = array<i64: 512, 256>}, {pipeline_mode = #tpu.pipeline_mode<synchronous>, transform_indices = @transform_4, window_bounds = array<i64: 1, 256>}, {pipeline_mode = #tpu.pipeline_mode<synchronous>, transform_indices = @transform_5, window_bounds = array<i64: 256, 16>}, {pipeline_mode = #tpu.pipeline_mode<synchronous>, transform_indices = @transform_6, window_bounds = array<i64: 1, 16>}, {pipeline_mode = #tpu.pipeline_mode<synchronous>, transform_indices = @transform_7, window_bounds = array<i64: 256, 16>}, {pipeline_mode = #tpu.pipeline_mode<synchronous>, transform_indices = @transform_8, window_bounds = array<i64: 1, 16>}, {pipeline_mode = #tpu.pipeline_mode<synchronous>, transform_indices = @transform_9, window_bounds = array<i64: 16, 256>}, {pipeline_mode = #tpu.pipeline_mode<synchronous>, transform_indices = @transform_10, window_bounds = array<i64: 1, 256>}, {pipeline_mode = #tpu.pipeline_mode<synchronous>, transform_indices = @transform_11, window_bounds = array<i64: 256, 512>}, {pipeline_mode = #tpu.pipeline_mode<synchronous>, transform_indices = @transform_12, window_bounds = array<i64: 1, 512>}, {pipeline_mode = #tpu.pipeline_mode<synchronous>, transform_indices = @transform_13, window_bounds = array<i64: 512, 1024>}, {pipeline_mode = #tpu.pipeline_mode<synchronous>, transform_indices = @transform_14, window_bounds = array<i64: 1, 1024>}, {transform_indices = @transform_15, window_bounds = array<i64: 8, 16>}, {transform_indices = @transform_16, window_bounds = array<i64: 8, 1024>}, {transform_indices = @transform_17, window_bounds = array<i64: 8, 1>}]} {
    %c0 = arith.constant 0 : index
    %c0_0 = arith.constant 0 : index
    %0 = vector.load %arg1[%c0, %c0_0] : memref<8x1024xf32, #tpu.memory_space<vmem>>, vector<8x1024xf32>
    %1 = arith.truncf %0 : vector<8x1024xf32> to vector<8x1024xbf16>
    %c0_1 = arith.constant 0 : index
    %c0_2 = arith.constant 0 : index
    %2 = vector.load %arg2[%c0_1, %c0_2] : memref<1024x512xbf16, #tpu.memory_space<vmem>>, vector<1024x512xbf16>
    %cst = arith.constant dense<0.000000e+00> : vector<8x512xf32>
    %3 = tpu.matmul %1, %2, %cst {dimension_numbers = #tpu.dot_dimension_numbers<[1], [0], [0], [1], [0, 0, 1, 1], [], []>} : vector<8x1024xbf16>, vector<1024x512xbf16>, vector<8x512xf32> -> vector<8x512xf32>
    %c0_3 = arith.constant 0 : index
    %c0_4 = arith.constant 0 : index
    %4 = vector.load %arg3[%c0_3, %c0_4] : memref<1x512xf32, #tpu.memory_space<vmem>>, vector<1x512xf32>
    %5 = vector.broadcast %4 : vector<1x512xf32> to vector<8x512xf32>
    %6 = arith.addf %3, %5 : vector<8x512xf32>
    %cst_5 = arith.constant 0.000000e+00 : f32
    %7 = vector.broadcast %cst_5 : f32 to vector<8x512xf32>
    %8 = arith.maximumf %6, %7 : vector<8x512xf32>
    %9 = arith.truncf %8 : vector<8x512xf32> to vector<8x512xbf16>
    %c0_6 = arith.constant 0 : index
    %c0_7 = arith.constant 0 : index
    %10 = vector.load %arg4[%c0_6, %c0_7] : memref<512x256xbf16, #tpu.memory_space<vmem>>, vector<512x256xbf16>
    %cst_8 = arith.constant dense<0.000000e+00> : vector<8x256xf32>
    %11 = tpu.matmul %9, %10, %cst_8 {dimension_numbers = #tpu.dot_dimension_numbers<[1], [0], [0], [1], [0, 0, 1, 1], [], []>} : vector<8x512xbf16>, vector<512x256xbf16>, vector<8x256xf32> -> vector<8x256xf32>
    %c0_9 = arith.constant 0 : index
    %c0_10 = arith.constant 0 : index
    %12 = vector.load %arg5[%c0_9, %c0_10] : memref<1x256xf32, #tpu.memory_space<vmem>>, vector<1x256xf32>
    %13 = vector.broadcast %12 : vector<1x256xf32> to vector<8x256xf32>
    %14 = arith.addf %11, %13 : vector<8x256xf32>
    %cst_11 = arith.constant 0.000000e+00 : f32
    %15 = vector.broadcast %cst_11 : f32 to vector<8x256xf32>
    %16 = arith.maximumf %14, %15 : vector<8x256xf32>
    %17 = arith.truncf %16 : vector<8x256xf32> to vector<8x256xbf16>
    %c0_12 = arith.constant 0 : index
    %c0_13 = arith.constant 0 : index
    %18 = vector.load %arg6[%c0_12, %c0_13] : memref<256x16xbf16, #tpu.memory_space<vmem>>, vector<256x16xbf16>
    %cst_14 = arith.constant dense<0.000000e+00> : vector<8x16xf32>
    %19 = tpu.matmul %17, %18, %cst_14 {dimension_numbers = #tpu.dot_dimension_numbers<[1], [0], [0], [1], [0, 0, 1, 1], [], []>} : vector<8x256xbf16>, vector<256x16xbf16>, vector<8x16xf32> -> vector<8x16xf32>
    %c0_15 = arith.constant 0 : index
    %c0_16 = arith.constant 0 : index
    %20 = vector.load %arg7[%c0_15, %c0_16] : memref<1x16xf32, #tpu.memory_space<vmem>>, vector<1x16xf32>
    %21 = vector.broadcast %20 : vector<1x16xf32> to vector<8x16xf32>
    %22 = arith.addf %19, %21 : vector<8x16xf32>
    %cst_17 = arith.constant 0.000000e+00 : f32
    %23 = vector.broadcast %cst_17 : f32 to vector<8x16xf32>
    %24 = arith.maximumf %22, %23 : vector<8x16xf32>
    %c0_18 = arith.constant 0 : index
    %c0_19 = arith.constant 0 : index
    %25 = vector.load %arg8[%c0_18, %c0_19] : memref<256x16xbf16, #tpu.memory_space<vmem>>, vector<256x16xbf16>
    %cst_20 = arith.constant dense<0.000000e+00> : vector<8x16xf32>
    %26 = tpu.matmul %17, %25, %cst_20 {dimension_numbers = #tpu.dot_dimension_numbers<[1], [0], [0], [1], [0, 0, 1, 1], [], []>} : vector<8x256xbf16>, vector<256x16xbf16>, vector<8x16xf32> -> vector<8x16xf32>
    %c0_21 = arith.constant 0 : index
    %c0_22 = arith.constant 0 : index
    %27 = vector.load %arg9[%c0_21, %c0_22] : memref<1x16xf32, #tpu.memory_space<vmem>>, vector<1x16xf32>
    %28 = vector.broadcast %27 : vector<1x16xf32> to vector<8x16xf32>
    %29 = arith.addf %26, %28 : vector<8x16xf32>
    %cst_23 = arith.constant 0.000000e+00 : f32
    %30 = vector.broadcast %cst_23 : f32 to vector<8x16xf32>
    %31 = arith.maximumf %29, %30 : vector<8x16xf32>
    %c0_24 = arith.constant 0 : index
    %c0_25 = arith.constant 0 : index
    %32 = vector.load %arg16[%c0_24, %c0_25] : memref<8x16xf32, #tpu.memory_space<vmem>>, vector<8x16xf32>
    %33 = arith.mulf %31, %32 : vector<8x16xf32>
    %34 = arith.addf %24, %33 : vector<8x16xf32>
    %35 = arith.mulf %31, %31 : vector<8x16xf32>
    %36 = arith.mulf %24, %24 : vector<8x16xf32>
    %37 = arith.addf %36, %35 : vector<8x16xf32>
    %cst_26 = arith.constant 9.99999993E-9 : f32
    %38 = vector.broadcast %cst_26 : f32 to vector<8x16xf32>
    %39 = arith.addf %38, %35 : vector<8x16xf32>
    %40 = math.log %39 : vector<8x16xf32>
    %41 = arith.subf %37, %40 : vector<8x16xf32>
    %cst_27 = arith.constant 1.000000e+00 : f32
    %42 = vector.broadcast %cst_27 : f32 to vector<8x16xf32>
    %43 = arith.subf %41, %42 : vector<8x16xf32>
    %cst_28 = arith.constant dense<0.000000e+00> : vector<8xf32>
    %44 = vector.multi_reduction <add>, %43, %cst_28 [1] : vector<8x16xf32> to vector<8xf32>
    %45 = vector.shape_cast %44 : vector<8xf32> to vector<8x1xf32>
    %c0_29 = arith.constant 0 : index
    %c0_30 = arith.constant 0 : index
    %46 = vector.load %arg18[%c0_29, %c0_30] : memref<8x1xf32, #tpu.memory_space<vmem>>, vector<8x1xf32>
    tpu.vector_store %arg18[%c0_29, %c0_30], %45 {strides = array<i32>} : memref<8x1xf32, #tpu.memory_space<vmem>>, vector<8x1xf32>,
    %47 = arith.truncf %34 : vector<8x16xf32> to vector<8x16xbf16>
    %c0_31 = arith.constant 0 : index
    %c0_32 = arith.constant 0 : index
    %48 = vector.load %arg10[%c0_31, %c0_32] : memref<16x256xbf16, #tpu.memory_space<vmem>>, vector<16x256xbf16>
    %cst_33 = arith.constant dense<0.000000e+00> : vector<8x256xf32>
    %49 = tpu.matmul %47, %48, %cst_33 {dimension_numbers = #tpu.dot_dimension_numbers<[1], [0], [0], [1], [0, 0, 1, 1], [], []>} : vector<8x16xbf16>, vector<16x256xbf16>, vector<8x256xf32> -> vector<8x256xf32>
    %c0_34 = arith.constant 0 : index
    %c0_35 = arith.constant 0 : index
    %50 = vector.load %arg11[%c0_34, %c0_35] : memref<1x256xf32, #tpu.memory_space<vmem>>, vector<1x256xf32>
    %51 = vector.broadcast %50 : vector<1x256xf32> to vector<8x256xf32>
    %52 = arith.addf %49, %51 : vector<8x256xf32>
    %cst_36 = arith.constant 0.000000e+00 : f32
    %53 = vector.broadcast %cst_36 : f32 to vector<8x256xf32>
    %54 = arith.maximumf %52, %53 : vector<8x256xf32>
    %55 = arith.truncf %54 : vector<8x256xf32> to vector<8x256xbf16>
    %c0_37 = arith.constant 0 : index
    %c0_38 = arith.constant 0 : index
    %56 = vector.load %arg12[%c0_37, %c0_38] : memref<256x512xbf16, #tpu.memory_space<vmem>>, vector<256x512xbf16>
    %cst_39 = arith.constant dense<0.000000e+00> : vector<8x512xf32>
    %57 = tpu.matmul %55, %56, %cst_39 {dimension_numbers = #tpu.dot_dimension_numbers<[1], [0], [0], [1], [0, 0, 1, 1], [], []>} : vector<8x256xbf16>, vector<256x512xbf16>, vector<8x512xf32> -> vector<8x512xf32>
    %c0_40 = arith.constant 0 : index
    %c0_41 = arith.constant 0 : index
    %58 = vector.load %arg13[%c0_40, %c0_41] : memref<1x512xf32, #tpu.memory_space<vmem>>, vector<1x512xf32>
    %59 = vector.broadcast %58 : vector<1x512xf32> to vector<8x512xf32>
    %60 = arith.addf %57, %59 : vector<8x512xf32>
    %cst_42 = arith.constant 0.000000e+00 : f32
    %61 = vector.broadcast %cst_42 : f32 to vector<8x512xf32>
    %62 = arith.maximumf %60, %61 : vector<8x512xf32>
    %63 = arith.truncf %62 : vector<8x512xf32> to vector<8x512xbf16>
    %c0_43 = arith.constant 0 : index
    %c0_44 = arith.constant 0 : index
    %64 = vector.load %arg14[%c0_43, %c0_44] : memref<512x1024xbf16, #tpu.memory_space<vmem>>, vector<512x1024xbf16>
    %cst_45 = arith.constant dense<0.000000e+00> : vector<8x1024xf32>
    %65 = tpu.matmul %63, %64, %cst_45 {dimension_numbers = #tpu.dot_dimension_numbers<[1], [0], [0], [1], [0, 0, 1, 1], [], []>} : vector<8x512xbf16>, vector<512x1024xbf16>, vector<8x1024xf32> -> vector<8x1024xf32>
    %c0_46 = arith.constant 0 : index
    %c0_47 = arith.constant 0 : index
    %66 = vector.load %arg15[%c0_46, %c0_47] : memref<1x1024xf32, #tpu.memory_space<vmem>>, vector<1x1024xf32>
    %67 = vector.broadcast %66 : vector<1x1024xf32> to vector<8x1024xf32>
    %68 = arith.addf %65, %67 : vector<8x1024xf32>
    %69 = arith.negf %68 : vector<8x1024xf32>
    %70 = math.exp %69 : vector<8x1024xf32>
    %cst_48 = arith.constant 1.000000e+00 : f32
    %71 = vector.broadcast %cst_48 : f32 to vector<8x1024xf32>
    %72 = arith.addf %71, %70 : vector<8x1024xf32>
    %73 = arith.divf %71, %72 : vector<8x1024xf32>
    %74 = arith.truncf %73 : vector<8x1024xf32> to vector<8x1024xbf16>
    %c0_49 = arith.constant 0 : index
    %c0_50 = arith.constant 0 : index
    %75 = vector.load %arg17[%c0_49, %c0_50] : memref<8x1024xbf16, #tpu.memory_space<vmem>>, vector<8x1024xbf16>
    tpu.vector_store %arg17[%c0_49, %c0_50], %74 {strides = array<i32>} : memref<8x1024xbf16, #tpu.memory_space<vmem>>, vector<8x1024xbf16>,
    return
  }
  func.func @transform_0(%arg0: i32) -> (i32, i32) {
    %c0_i32 = arith.constant 0 : i32
    %c0_i32_0 = arith.constant 0 : i32
    return %arg0, %c0_i32 : i32, i32
  }
  func.func @transform_1(%arg0: i32) -> (i32, i32) {
    %c0_i32 = arith.constant 0 : i32
    %c0_i32_0 = arith.constant 0 : i32
    %c0_i32_1 = arith.constant 0 : i32
    return %c0_i32, %c0_i32_0 : i32, i32
  }
  func.func @transform_2(%arg0: i32) -> (i32, i32) {
    %c0_i32 = arith.constant 0 : i32
    %c0_i32_0 = arith.constant 0 : i32
    %c0_i32_1 = arith.constant 0 : i32
    return %c0_i32, %c0_i32_0 : i32, i32
  }
  func.func @transform_3(%arg0: i32) -> (i32, i32) {
    %c0_i32 = arith.constant 0 : i32
    %c0_i32_0 = arith.constant 0 : i32
    %c0_i32_1 = arith.constant 0 : i32
    return %c0_i32, %c0_i32_0 : i32, i32
  }
  func.func @transform_4(%arg0: i32) -> (i32, i32) {
    %c0_i32 = arith.constant 0 : i32
    %c0_i32_0 = arith.constant 0 : i32
    %c0_i32_1 = arith.constant 0 : i32
    return %c0_i32, %c0_i32_0 : i32, i32
  }
  func.func @transform_5(%arg0: i32) -> (i32, i32) {
    %c0_i32 = arith.constant 0 : i32
    %c0_i32_0 = arith.constant 0 : i32
    %c0_i32_1 = arith.constant 0 : i32
    return %c0_i32, %c0_i32_0 : i32, i32
  }
  func.func @transform_6(%arg0: i32) -> (i32, i32) {
    %c0_i32 = arith.constant 0 : i32
    %c0_i32_0 = arith.constant 0 : i32
    %c0_i32_1 = arith.constant 0 : i32
    return %c0_i32, %c0_i32_0 : i32, i32
  }
  func.func @transform_7(%arg0: i32) -> (i32, i32) {
    %c0_i32 = arith.constant 0 : i32
    %c0_i32_0 = arith.constant 0 : i32
    %c0_i32_1 = arith.constant 0 : i32
    return %c0_i32, %c0_i32_0 : i32, i32
  }
  func.func @transform_8(%arg0: i32) -> (i32, i32) {
    %c0_i32 = arith.constant 0 : i32
    %c0_i32_0 = arith.constant 0 : i32
    %c0_i32_1 = arith.constant 0 : i32
    return %c0_i32, %c0_i32_0 : i32, i32
  }
  func.func @transform_9(%arg0: i32) -> (i32, i32) {
    %c0_i32 = arith.constant 0 : i32
    %c0_i32_0 = arith.constant 0 : i32
    %c0_i32_1 = arith.constant 0 : i32
    return %c0_i32, %c0_i32_0 : i32, i32
  }
  func.func @transform_10(%arg0: i32) -> (i32, i32) {
    %c0_i32 = arith.constant 0 : i32
    %c0_i32_0 = arith.constant 0 : i32
    %c0_i32_1 = arith.constant 0 : i32
    return %c0_i32, %c0_i32_0 : i32, i32
  }
  func.func @transform_11(%arg0: i32) -> (i32, i32) {
    %c0_i32 = arith.constant 0 : i32
    %c0_i32_0 = arith.constant 0 : i32
    %c0_i32_1 = arith.constant 0 : i32
    return %c0_i32, %c0_i32_0 : i32, i32
  }
  func.func @transform_12(%arg0: i32) -> (i32, i32) {
    %c0_i32 = arith.constant 0 : i32
    %c0_i32_0 = arith.constant 0 : i32
    %c0_i32_1 = arith.constant 0 : i32
    return %c0_i32, %c0_i32_0 : i32, i32
  }
  func.func @transform_13(%arg0: i32) -> (i32, i32) {
    %c0_i32 = arith.constant 0 : i32
    %c0_i32_0 = arith.constant 0 : i32
    %c0_i32_1 = arith.constant 0 : i32
    return %c0_i32, %c0_i32_0 : i32, i32
  }
  func.func @transform_14(%arg0: i32) -> (i32, i32) {
    %c0_i32 = arith.constant 0 : i32
    %c0_i32_0 = arith.constant 0 : i32
    %c0_i32_1 = arith.constant 0 : i32
    return %c0_i32, %c0_i32_0 : i32, i32
  }
  func.func @transform_15(%arg0: i32) -> (i32, i32) {
    %c0_i32 = arith.constant 0 : i32
    %c0_i32_0 = arith.constant 0 : i32
    return %arg0, %c0_i32 : i32, i32
  }
  func.func @transform_16(%arg0: i32) -> (i32, i32) {
    %c0_i32 = arith.constant 0 : i32
    %c0_i32_0 = arith.constant 0 : i32
    return %arg0, %c0_i32 : i32, i32
  }
  func.func @transform_17(%arg0: i32) -> (i32, i32) {
    %c0_i32 = arith.constant 0 : i32
    %c0_i32_0 = arith.constant 0 : i32
    return %arg0, %c0_i32 : i32, i32
  }
}

</mosaic_0001>

<bundles_post_ra>
// kernel: tpu_custom_call.1
= control target key start
LH: loop header
LB: loop body
LE: loop exit
PB: predicated region body
PF: predicated region fallthrough
CT: control target
= control target key end

     0   :  { %s7422_s0 = inlined_call_operand.vmem [shape: f32[8,1024], index: 0, kind: input, shape index: {}]   ;;  %s7423_s1 = inlined_call_operand.hbm [shape: bf16[1024,512], index: 1, kind: input, shape index: {}]   ;;  %s7424_s2 = inlined_call_operand.vmem [shape: f32[1,512], index: 2, kind: input, shape index: {}]   ;;  %s7425_s3 = inlined_call_operand.hbm [shape: bf16[512,256], index: 3, kind: input, shape index: {}]   ;;  %s7426_s4 = inlined_call_operand.vmem [shape: f32[1,256], index: 4, kind: input, shape index: {}]   ;;  %s7427_s5 = inlined_call_operand.vmem [shape: bf16[256,16], index: 5, kind: input, shape index: {}]   ;;  %s7428_s6 = inlined_call_operand.vmem [shape: f32[1,16], index: 6, kind: input, shape index: {}]   ;;  %s7429_s7 = inlined_call_operand.vmem [shape: bf16[256,16], index: 7, kind: input, shape index: {}]   ;;  %s7430_s8 = inlined_call_operand.vmem [shape: f32[1,16], index: 8, kind: input, shape index: {}]   ;;  %s7431_s9 = inlined_call_operand.vmem [shape: bf16[16,256], index: 9, kind: input, shape index: {}]   ;;  %s7432_s10 = inlined_call_operand.vmem [shape: f32[1,256], index: 10, kind: input, shape index: {}]   ;;  %s7433_s11 = inlined_call_operand.hbm [shape: bf16[256,512], index: 11, kind: input, shape index: {}]   ;;  %s7434_s12 = inlined_call_operand.vmem [shape: f32[1,512], index: 12, kind: input, shape index: {}]   ;;  %s7435_s13 = inlined_call_operand.hbm [shape: bf16[512,1024], index: 13, kind: input, shape index: {}]   ;;  %s7436_s14 = inlined_call_operand.vmem [shape: f32[1,1024], index: 14, kind: input, shape index: {}]   ;;  %s7437_s15 = inlined_call_operand.vmem [shape: f32[8,16], index: 15, kind: input, shape index: {}]   ;;  %s7438_s16 = inlined_call_operand.hbm [shape: bf16[8,1024], index: 16, kind: output, shape index: {0}]   ;;  %s7439_s17 = inlined_call_operand.vmem [shape: f32[8,1], index: 17, kind: output, shape index: {1}]  }
   0x1   :  { %7443 = sst [smem:[#allocation15_spill]] %s7422_s0 }
   0x2   :  { %7444 = sst [smem:[#allocation16_spill]] %s7423_s1 }
   0x3   :  { %7445 = sst [smem:[#allocation17_spill]] %s7438_s16 }
   0x4   :  { %23 = vsyncpa [#allocation3], 0 }
   0x5   :  { %24 = vsyncpa [#allocation6], 0 }
   0x6   :  { %25 = vsyncpa [#allocation9], 0 }
   0x7   :  { %26 = vsyncpa [#allocation4], 0  ;;  %s7024_s24 = smov [#allocation5]   ;;  %s6906_s28 = scalar_lea.hbm %s7425_s3, 8192 }
   0x8   :  { %s48_s25 = sshll.u32 %s7024_s24, 4  ;;  %p6907_p0 = scmp.ne.s32.totalorder %s7425_s3, %s6906_s28  ;;  %s49_s25 = int_to_ptr.vmem [resolvable:$true] %s48_s25 }
   0x9   :  { %p6910_p1 = scmp.lt.u32.totalorder %s6906_s28, %s7425_s3 }
   0xb   :  { %p6912_p2 = pnand %p6910_p1, %p6907_p0 }
   0xd   :  { %6915 = shalt.err (!%p6912_p2)
}
   0xe   :  { %s6916_s19 = scalar_lea.vmem %s49_s25, 8192  ;;  %p6921_p4 = scmp.lt.s32.totalorder %s49_s25, %s49_s25 }
   0xf   :  { %p6917_p3 = scmp.ne.s32.totalorder %s49_s25, %s6916_s19  ;;  %p6922_p5 = scmp.lt.s32.totalorder %s6916_s19, %s6916_s19 }
  0x11   :  { %p6923_p6 = por %p6922_p5, %p6921_p4 }
  0x13   :  { %p6924_p7 = pnand %p6923_p6, %p6917_p3 }
  0x15   :  { %6927 = shalt.err (!%p6924_p7)
}
  0x16   :  { %s7025_s1 = smov 128   ;;  %s7026_s20 = smov 8  }
  0x17   :  { %54 = dma.hbm_to_vmem [thread:$0]  %s7425_s3, 8192, %s49_s25, [#allocation6], %s7025_s1, %s7025_s1, %s7026_s20  }
  0x18   :  { %s7027_s23 = smov [#allocation2]   ;;  %s7446_s28 = sld [smem:[#allocation16_spill]] }
  0x19   :  { %s34_s24 = sshll.u32 %s7027_s23, 4  ;;  %s35_s24 = int_to_ptr.vmem [resolvable:$true] %s34_s24 }
  0x1e   :  { %s6928_s29 = scalar_lea.hbm %s7446_s28, 32768 }
  0x1f   :  { %p6929_p8 = scmp.ne.s32.totalorder %s7446_s28, %s6928_s29  ;;  %p6932_p9 = scmp.lt.u32.totalorder %s6928_s29, %s7446_s28 }
  0x21   :  { %p6934_p10 = pnand %p6932_p9, %p6929_p8 }
  0x23   :  { %6937 = shalt.err (!%p6934_p10)
}
  0x24   :  { %s6938_s16 = scalar_lea.vmem %s35_s24, 32768  ;;  %p6943_p12 = scmp.lt.s32.totalorder %s35_s24, %s35_s24 }
  0x25   :  { %p6939_p11 = scmp.ne.s32.totalorder %s35_s24, %s6938_s16  ;;  %p6944_p13 = scmp.lt.s32.totalorder %s6938_s16, %s6938_s16 }
  0x27   :  { %p6945_p0 = por %p6944_p13, %p6943_p12 }
  0x29   :  { %p6946_p1 = pnand %p6945_p0, %p6939_p11 }
  0x2b   :  { %6949 = shalt.err (!%p6946_p1)
}
  0x2c   :  { %s7028_s3 = smov 256   ;;  %s7029_s25 = smov 16  }
  0x2d   :  { %40 = dma.hbm_to_vmem [thread:$0]  %s7446_s28, 32768, %s35_s24, [#allocation3], %s7028_s3, %s7028_s3, %s7029_s25  }
  0x2e   :  { %s7030_s21 = smov [#allocation7]   ;;  %s7031_s23 = smov [#allocation8]  }
  0x2f   :  { %s74_s22 = sshll.u32 %s7030_s21, 4  ;;  %s88_s26 = sshll.u32 %s7031_s23, 4  ;;  %s75_s22 = int_to_ptr.vmem [resolvable:$true] %s74_s22  ;;  %s7150_s26 = int_to_ptr.vmem [resolvable:$true] %s88_s26 }
  0x30   :  { %s6950_s16 = scalar_lea.hbm %s7433_s11, 8192 }
  0x31   :  { %p6951_p2 = scmp.ne.s32.totalorder %s7433_s11, %s6950_s16  ;;  %p6954_p3 = scmp.lt.u32.totalorder %s6950_s16, %s7433_s11 }
  0x33   :  { %p6956_p4 = pnand %p6954_p3, %p6951_p2 }
  0x35   :  { %6959 = shalt.err (!%p6956_p4)
}
  0x36   :  { %s6960_s24 = scalar_lea.vmem %s75_s22, 8192  ;;  %p6965_p6 = scmp.lt.s32.totalorder %s75_s22, %s75_s22 }
  0x37   :  { %p6961_p5 = scmp.ne.s32.totalorder %s75_s22, %s6960_s24  ;;  %p6966_p7 = scmp.lt.s32.totalorder %s6960_s24, %s6960_s24 }
  0x39   :  { %p6967_p8 = por %p6966_p7, %p6965_p6 }
  0x3b   :  { %p6968_p9 = pnand %p6967_p8, %p6961_p5 }
  0x3d   :  { %6971 = shalt.err (!%p6968_p9)
}
  0x3e   :  { %80 = dma.hbm_to_vmem [thread:$0]  %s7433_s11, 8192, %s75_s22, [#allocation6], %s7028_s3, %s7028_s3, %s7029_s25  }
  0x3f   :  { %s6972_s23 = scalar_lea.hbm %s7435_s13, 32768 }
  0x40   :  { %p6973_p10 = scmp.ne.s32.totalorder %s7435_s13, %s6972_s23  ;;  %p6976_p11 = scmp.lt.u32.totalorder %s6972_s23, %s7435_s13 }
  0x42   :  { %p6978_p12 = pnand %p6976_p11, %p6973_p10 }
  0x44   :  { %6981 = shalt.err (!%p6978_p12)
}
  0x45   :  { %s6982_s30 = scalar_lea.vmem %s7150_s26, 32768  ;;  %p6987_p0 = scmp.lt.s32.totalorder %s7150_s26, %s7150_s26 }
  0x46   :  { %p6983_p13 = scmp.ne.s32.totalorder %s7150_s26, %s6982_s30  ;;  %p6988_p1 = scmp.lt.s32.totalorder %s6982_s30, %s6982_s30 }
  0x48   :  { %p6989_p2 = por %p6988_p1, %p6987_p0 }
  0x4a   :  { %p6990_p3 = pnand %p6989_p2, %p6983_p13 }
  0x4c   :  { %6993 = shalt.err (!%p6990_p3)
}
  0x4d   :  { %s7032_s11 = smov 512   ;;  %s7033_s3 = smov 32  }
  0x4e   :  { %94 = dma.hbm_to_vmem [thread:$0]  %s7435_s13, 32768, %s7150_s26, [#allocation9], %s7032_s11, %s7032_s11, %s7033_s3  }
  0x4f   :  { %7016 = dma.done.wait [#allocation3], 32768  }
  0x50   :  { %7017 = vsyncadd [#allocation3], 4294934528 }
  0x51   :  { %7018 = dma.done.wait [#allocation6], 16384  }
  0x52   :  { %7019 = vsyncadd [#allocation6], 4294950912 }
  0x53   :  { %7020 = dma.done.wait [#allocation9], 32768  }
  0x54   :  { %7021 = vsyncadd [#allocation9], 4294934528  ;;  %v6261_v0 = vld [vmem:[#allocation2 + $0x4] ss:$16 sps:$4 sm:$0xff]   ;;  %v6263_v1 = vld [vmem:[#allocation2 + $0xc] ss:$16 sps:$4 sm:$0xff]  }
  0x55   :  { %1686 = vmatprep.subr.bf16.mxu0 %v6261_v0  ;;  %v6265_v2 = vld [vmem:[#allocation2] ss:$16 sps:$4 sm:$0xff]   ;;  %v6266_v3 = vld [vmem:[#allocation2 + $0x8] ss:$16 sps:$4 sm:$0xff]   ;;  %1850 = vmatprep.subr.bf16.mxu1 %v6263_v1  ;;  %v6267_v4 = vld [vmem:[#allocation2 + $0x24] ss:$16 sps:$4 sm:$0xff]  }
  0x56   :  { %1687 = vmatpush1.bf16.msra.mxu0 %v6265_v2  ;;  %1851 = vmatpush1.bf16.msra.mxu1 %v6266_v3  ;;  %v6269_v5 = vld [vmem:[#allocation2 + $0x2c] ss:$16 sps:$4 sm:$0xff]   ;;  %v6271_v6 = vld [vmem:[#allocation2 + $0x20] ss:$16 sps:$4 sm:$0xff]   ;;  %v6272_v7 = vld [vmem:[#allocation2 + $0x28] ss:$16 sps:$4 sm:$0xff]  }
  0x57   :  { %1688 = vmatprep.subr.bf16.mxu0 %v6267_v4  ;;  %1852 = vmatprep.subr.bf16.mxu1 %v6269_v5  ;;  %v6273_v8 = vld [vmem:[#allocation2 + $0x44] ss:$16 sps:$4 sm:$0xff]   ;;  %v6275_v9 = vld [vmem:[#allocation2 + $0x4c] ss:$16 sps:$4 sm:$0xff]   ;;  %v6277_v10 = vld [vmem:[#allocation2 + $0x40] ss:$16 sps:$4 sm:$0xff]  }
  0x58   :  { %v6278_v11 = vld [vmem:[#allocation2 + $0x48] ss:$16 sps:$4 sm:$0xff]   ;;  %v6279_v12 = vld [vmem:[#allocation2 + $0x64] ss:$16 sps:$4 sm:$0xff]   ;;  %v6281_v13 = vld [vmem:[#allocation2 + $0x6c] ss:$16 sps:$4 sm:$0xff]  }
  0x59   :  { %v6283_v14 = vld [vmem:[#allocation2 + $0x60] ss:$16 sps:$4 sm:$0xff]   ;;  %v6284_v15 = vld [vmem:[#allocation2 + $0x68] ss:$16 sps:$4 sm:$0xff]   ;;  %v6285_v16 = vld [vmem:[#allocation2 + $0x84] ss:$16 sps:$4 sm:$0xff]  }
  0x5a   :  { %1689 = vmatpush1.bf16.msra.mxu0 %v6271_v6  ;;  %1853 = vmatpush1.bf16.msra.mxu1 %v6272_v7  ;;  %v6287_v17 = vld [vmem:[#allocation2 + $0x8c] ss:$16 sps:$4 sm:$0xff]   ;;  %v6289_v18 = vld [vmem:[#allocation2 + $0x80] ss:$16 sps:$4 sm:$0xff]   ;;  %v6290_v19 = vld [vmem:[#allocation2 + $0x88] ss:$16 sps:$4 sm:$0xff]  }
  0x5b   :  { %1690 = vmatprep.subr.bf16.mxu0 %v6273_v8  ;;  %1854 = vmatprep.subr.bf16.mxu1 %v6275_v9  ;;  %v6291_v20 = vld [vmem:[#allocation2 + $0xa4] ss:$16 sps:$4 sm:$0xff]   ;;  %v6293_v21 = vld [vmem:[#allocation2 + $0xac] ss:$16 sps:$4 sm:$0xff]   ;;  %v6295_v22 = vld [vmem:[#allocation2 + $0xa0] ss:$16 sps:$4 sm:$0xff]  }
  0x5c   :  { %v6296_v23 = vld [vmem:[#allocation2 + $0xa8] ss:$16 sps:$4 sm:$0xff]   ;;  %v6297_v24 = vld [vmem:[#allocation2 + $0xc4] ss:$16 sps:$4 sm:$0xff]   ;;  %v6299_v25 = vld [vmem:[#allocation2 + $0xcc] ss:$16 sps:$4 sm:$0xff]  }
  0x5d   :  { %v6301_v26 = vld [vmem:[#allocation2 + $0xc0] ss:$16 sps:$4 sm:$0xff]   ;;  %v6302_v27 = vld [vmem:[#allocation2 + $0xc8] ss:$16 sps:$4 sm:$0xff]   ;;  %v6303_v28 = vld [vmem:[#allocation2 + $0xe4] ss:$16 sps:$4 sm:$0xff]  }
  0x5e   :  { %1691 = vmatpush1.bf16.msra.mxu0 %v6277_v10  ;;  %1855 = vmatpush1.bf16.msra.mxu1 %v6278_v11  ;;  %v6305_v29 = vld [vmem:[#allocation2 + $0xec] ss:$16 sps:$4 sm:$0xff]   ;;  %v6307_v30 = vld [vmem:[#allocation2 + $0xe0] ss:$16 sps:$4 sm:$0xff]   ;;  %v6308_v31 = vld [vmem:[#allocation2 + $0xe8] ss:$16 sps:$4 sm:$0xff]  }
  0x5f   :  { %1692 = vmatprep.subr.bf16.mxu0 %v6279_v12  ;;  %1856 = vmatprep.subr.bf16.mxu1 %v6281_v13  ;;  %v6309_v32 = vld [vmem:[#allocation2 + $0x104] ss:$16 sps:$4 sm:$0xff]   ;;  %v6311_v33 = vld [vmem:[#allocation2 + $0x10c] ss:$16 sps:$4 sm:$0xff]   ;;  %v6313_v34 = vld [vmem:[#allocation2 + $0x100] ss:$16 sps:$4 sm:$0xff]  }
  0x60   :  { %v6314_v35 = vld [vmem:[#allocation2 + $0x108] ss:$16 sps:$4 sm:$0xff]   ;;  %v6315_v36 = vld [vmem:[#allocation2 + $0x124] ss:$16 sps:$4 sm:$0xff]   ;;  %v6317_v37 = vld [vmem:[#allocation2 + $0x12c] ss:$16 sps:$4 sm:$0xff]  }
  0x61   :  { %v6319_v38 = vld [vmem:[#allocation2 + $0x120] ss:$16 sps:$4 sm:$0xff]   ;;  %v6320_v39 = vld [vmem:[#allocation2 + $0x128] ss:$16 sps:$4 sm:$0xff]   ;;  %v6321_v40 = vld [vmem:[#allocation2 + $0x144] ss:$16 sps:$4 sm:$0xff]  }
  0x62   :  { %1693 = vmatpush1.bf16.msra.mxu0 %v6283_v14  ;;  %1857 = vmatpush1.bf16.msra.mxu1 %v6284_v15  ;;  %v6323_v41 = vld [vmem:[#allocation2 + $0x14c] ss:$16 sps:$4 sm:$0xff]   ;;  %v6325_v42 = vld [vmem:[#allocation2 + $0x140] ss:$16 sps:$4 sm:$0xff]   ;;  %v6326_v43 = vld [vmem:[#allocation2 + $0x148] ss:$16 sps:$4 sm:$0xff]  }
  0x63   :  { %1694 = vmatprep.subr.bf16.mxu0 %v6285_v16  ;;  %1858 = vmatprep.subr.bf16.mxu1 %v6287_v17  ;;  %v6327_v44 = vld [vmem:[#allocation2 + $0x164] ss:$16 sps:$4 sm:$0xff]   ;;  %v6329_v45 = vld [vmem:[#allocation2 + $0x16c] ss:$16 sps:$4 sm:$0xff]   ;;  %s7447_s18 = sld [smem:[#allocation15_spill]]  ;;  %vm2867_vm0 = vcmask 130048  }
  0x64   :  { %v6331_v47 = vld [vmem:[#allocation2 + $0x160] ss:$16 sps:$4 sm:$0xff]   ;;  %v6332_v49 = vld [vmem:[#allocation2 + $0x168] ss:$16 sps:$4 sm:$0xff]   ;;  %v6333_v50 = vld [vmem:[#allocation2 + $0x184] ss:$16 sps:$4 sm:$0xff]  }
  0x65   :  { %v6335_v51 = vld [vmem:[#allocation2 + $0x18c] ss:$16 sps:$4 sm:$0xff]   ;;  %v6337_v52 = vld [vmem:[#allocation2 + $0x180] ss:$16 sps:$4 sm:$0xff]   ;;  %v6338_v53 = vld [vmem:[#allocation2 + $0x188] ss:$16 sps:$4 sm:$0xff]  }
  0x66   :  { %1695 = vmatpush1.bf16.msra.mxu0 %v6289_v18  ;;  %1859 = vmatpush1.bf16.msra.mxu1 %v6290_v19  ;;  %v6339_v54 = vld [vmem:[#allocation2 + $0x1a4] ss:$16 sps:$4 sm:$0xff]   ;;  %v6341_v55 = vld [vmem:[#allocation2 + $0x1ac] ss:$16 sps:$4 sm:$0xff]   ;;  %v6343_v56 = vld [vmem:[#allocation2 + $0x1a0] ss:$16 sps:$4 sm:$0xff]  }
  0x67   :  { %1696 = vmatprep.subr.bf16.mxu0 %v6291_v20  ;;  %1860 = vmatprep.subr.bf16.mxu1 %v6293_v21  ;;  %v6344_v57 = vld [vmem:[#allocation2 + $0x1a8] ss:$16 sps:$4 sm:$0xff]   ;;  %v6345_v58 = vld [vmem:[#allocation2 + $0x1c4] ss:$16 sps:$4 sm:$0xff]   ;;  %v6347_v59 = vld [vmem:[#allocation2 + $0x1cc] ss:$16 sps:$4 sm:$0xff]  }
  0x68   :  { %v6349_v60 = vld [vmem:[#allocation2 + $0x1c0] ss:$16 sps:$4 sm:$0xff]   ;;  %v6350_v61 = vld [vmem:[#allocation2 + $0x1c8] ss:$16 sps:$4 sm:$0xff]   ;;  %v6351_v62 = vld [vmem:[#allocation2 + $0x1e4] ss:$16 sps:$4 sm:$0xff]  }
  0x69   :  { %v113_v46 = vld [vmem:[%s7447_s18 + $0x8] sm:$0xff]  ;;  %v6355_v0 = vld [vmem:[#allocation2 + $0x1e0] ss:$16 sps:$4 sm:$0xff]   ;;  %v6359_v3 = vld [vmem:[#allocation2 + $0x204] ss:$16 sps:$4 sm:$0xff]   ;;  %vm2871_vm1 = vcmask 7168  }
  0x6a   :  { %1697 = vmatpush1.bf16.msra.mxu0 %v6295_v22  ;;  %1861 = vmatpush1.bf16.msra.mxu1 %v6296_v23  ;;  %v121_v48 = vpack.c.bf16 %v113_v46, %v113_v46  ;;  %v6353_v63 = vld [vmem:[#allocation2 + $0x1ec] ss:$16 sps:$4 sm:$0xff]   ;;  %v6356_v1 = vld [vmem:[#allocation2 + $0x1e8] ss:$16 sps:$4 sm:$0xff]   ;;  %v112_v2 = vld [vmem:[%s7447_s18] sm:$0xff] }
  0x6b   :  { %1698 = vmatprep.subr.bf16.mxu0 %v6297_v24  ;;  %1862 = vmatprep.subr.bf16.mxu1 %v6299_v25  ;;  %v6362_v4 = vld [vmem:[#allocation2 + $0x20c] ss:$16 sps:$4 sm:$0xff]   ;;  %v120_v5 = vpack.c.bf16 %v112_v2, %v112_v2  ;;  %v6357_v6 = vld [vmem:[#allocation2 + $0x200] ss:$16 sps:$4 sm:$0xff]   ;;  %v6360_v7 = vld [vmem:[#allocation2 + $0x208] ss:$16 sps:$4 sm:$0xff]  }
  0x6c   :  { %1718 = vmatprep.mubr.bf16.mxu0 %v121_v48  ;;  %1882 = vmatprep.mubr.bf16.mxu1 %v121_v48  ;;  %v6365_v8 = vld [vmem:[#allocation2 + $0x224] ss:$16 sps:$4 sm:$0xff]   ;;  %v6368_v9 = vld [vmem:[#allocation2 + $0x22c] ss:$16 sps:$4 sm:$0xff]   ;;  %v6363_v10 = vld [vmem:[#allocation2 + $0x220] ss:$16 sps:$4 sm:$0xff]  }
  0x6d   :  { %v6366_v11 = vld [vmem:[#allocation2 + $0x228] ss:$16 sps:$4 sm:$0xff]   ;;  %v6371_v12 = vld [vmem:[#allocation2 + $0x244] ss:$16 sps:$4 sm:$0xff]   ;;  %v6374_v13 = vld [vmem:[#allocation2 + $0x24c] ss:$16 sps:$4 sm:$0xff]  }
  0x6e   :  { %1699 = vmatpush1.bf16.msra.mxu0 %v6301_v26  ;;  %1863 = vmatpush1.bf16.msra.mxu1 %v6302_v27  ;;  %v6369_v14 = vld [vmem:[#allocation2 + $0x240] ss:$16 sps:$4 sm:$0xff]   ;;  %v6372_v15 = vld [vmem:[#allocation2 + $0x248] ss:$16 sps:$4 sm:$0xff]   ;;  %v6377_v16 = vld [vmem:[#allocation2 + $0x264] ss:$16 sps:$4 sm:$0xff]  }
  0x6f   :  { %1700 = vmatprep.subr.bf16.mxu0 %v6303_v28  ;;  %1864 = vmatprep.subr.bf16.mxu1 %v6305_v29  ;;  %v6380_v17 = vld [vmem:[#allocation2 + $0x26c] ss:$16 sps:$4 sm:$0xff]   ;;  %v6375_v18 = vld [vmem:[#allocation2 + $0x260] ss:$16 sps:$4 sm:$0xff]   ;;  %v6378_v19 = vld [vmem:[#allocation2 + $0x268] ss:$16 sps:$4 sm:$0xff]  }
  0x70   :  { %v6383_v20 = vld [vmem:[#allocation2 + $0x284] ss:$16 sps:$4 sm:$0xff]   ;;  %v6386_v21 = vld [vmem:[#allocation2 + $0x28c] ss:$16 sps:$4 sm:$0xff]   ;;  %v6381_v22 = vld [vmem:[#allocation2 + $0x280] ss:$16 sps:$4 sm:$0xff]  }
  0x71   :  { %v6384_v23 = vld [vmem:[#allocation2 + $0x288] ss:$16 sps:$4 sm:$0xff]   ;;  %v6389_v24 = vld [vmem:[#allocation2 + $0x2a4] ss:$16 sps:$4 sm:$0xff]   ;;  %v6392_v25 = vld [vmem:[#allocation2 + $0x2ac] ss:$16 sps:$4 sm:$0xff]  }
  0x72   :  { %1701 = vmatpush1.bf16.msra.mxu0 %v6307_v30  ;;  %1865 = vmatpush1.bf16.msra.mxu1 %v6308_v31  ;;  %v6387_v26 = vld [vmem:[#allocation2 + $0x2a0] ss:$16 sps:$4 sm:$0xff]   ;;  %v6390_v27 = vld [vmem:[#allocation2 + $0x2a8] ss:$16 sps:$4 sm:$0xff]   ;;  %v6395_v28 = vld [vmem:[#allocation2 + $0x2c4] ss:$16 sps:$4 sm:$0xff]  }
  0x73   :  { %1702 = vmatprep.subr.bf16.mxu0 %v6309_v32  ;;  %1866 = vmatprep.subr.bf16.mxu1 %v6311_v33  ;;  %v6398_v29 = vld [vmem:[#allocation2 + $0x2cc] ss:$16 sps:$4 sm:$0xff]   ;;  %v6393_v31 = vld [vmem:[#allocation2 + $0x2c0] ss:$16 sps:$4 sm:$0xff]   ;;  %v6396_v33 = vld [vmem:[#allocation2 + $0x2c8] ss:$16 sps:$4 sm:$0xff]  }
  0x74   :  { %v115_v30 = vld [vmem:[%s7447_s18 + $0x18] sm:$0xff]  ;;  %v6419_v46 = vld [vmem:[#allocation2 + $0x344] ss:$16 sps:$4 sm:$0xff]   ;;  %v6417_v48 = vld [vmem:[#allocation2 + $0x340] ss:$16 sps:$4 sm:$0xff]  }
  0x75   :  { %v123_v32 = vpack.c.bf16 %v115_v30, %v115_v30  ;;  %v6449_v2 = vld [vmem:[#allocation2 + $0x3e4] ss:$16 sps:$4 sm:$0xff]  }
  0x76   :  { %1703 = vmatpush1.bf16.msra.mxu0 %v6313_v34  ;;  %1867 = vmatpush1.bf16.msra.mxu1 %v6314_v35  ;;  %v6401_v34 = vld [vmem:[#allocation2 + $0x2e4] ss:$16 sps:$4 sm:$0xff]   ;;  %v6404_v35 = vld [vmem:[#allocation2 + $0x2ec] ss:$16 sps:$4 sm:$0xff]  }
  0x77   :  { %1704 = vmatprep.subr.bf16.mxu0 %v6315_v36  ;;  %1868 = vmatprep.subr.bf16.mxu1 %v6317_v37  ;;  %v6399_v36 = vld [vmem:[#allocation2 + $0x2e0] ss:$16 sps:$4 sm:$0xff]   ;;  %v6402_v37 = vld [vmem:[#allocation2 + $0x2e8] ss:$16 sps:$4 sm:$0xff]   ;;  %v6485_v30 = vld [vmem:[#allocation2 + $0x4a4] ss:$16 sps:$4 sm:$0xff]  }
  0x7a   :  { %1705 = vmatpush1.bf16.msra.mxu0 %v6319_v38  ;;  %1869 = vmatpush1.bf16.msra.mxu1 %v6320_v39  ;;  %v6407_v38 = vld [vmem:[#allocation2 + $0x304] ss:$16 sps:$4 sm:$0xff]   ;;  %v6410_v39 = vld [vmem:[#allocation2 + $0x30c] ss:$16 sps:$4 sm:$0xff]  }
  0x7b   :  { %1706 = vmatprep.subr.bf16.mxu0 %v6321_v40  ;;  %1870 = vmatprep.subr.bf16.mxu1 %v6323_v41  ;;  %v6405_v40 = vld [vmem:[#allocation2 + $0x300] ss:$16 sps:$4 sm:$0xff]   ;;  %v6408_v41 = vld [vmem:[#allocation2 + $0x308] ss:$16 sps:$4 sm:$0xff]  }
  0x7e   :  { %1707 = vmatpush1.bf16.msra.mxu0 %v6325_v42  ;;  %1871 = vmatpush1.bf16.msra.mxu1 %v6326_v43  ;;  %v6413_v42 = vld [vmem:[#allocation2 + $0x324] ss:$16 sps:$4 sm:$0xff]   ;;  %v6416_v43 = vld [vmem:[#allocation2 + $0x32c] ss:$16 sps:$4 sm:$0xff]  }
  0x7f   :  { %1708 = vmatprep.subr.bf16.mxu0 %v6327_v44  ;;  %1872 = vmatprep.subr.bf16.mxu1 %v6329_v45  ;;  %v6411_v44 = vld [vmem:[#allocation2 + $0x320] ss:$16 sps:$4 sm:$0xff]   ;;  %v6414_v45 = vld [vmem:[#allocation2 + $0x328] ss:$16 sps:$4 sm:$0xff]  }
  0x82   :  { %1709 = vmatpush1.bf16.msra.mxu0 %v6331_v47  ;;  %1873 = vmatpush1.bf16.msra.mxu1 %v6332_v49  ;;  %v6422_v47 = vld [vmem:[#allocation2 + $0x34c] ss:$16 sps:$4 sm:$0xff]   ;;  %v6420_v49 = vld [vmem:[#allocation2 + $0x348] ss:$16 sps:$4 sm:$0xff]  }
  0x83   :  { %1710 = vmatprep.subr.bf16.mxu0 %v6333_v50  ;;  %1874 = vmatprep.subr.bf16.mxu1 %v6335_v51  ;;  %v6425_v50 = vld [vmem:[#allocation2 + $0x364] ss:$16 sps:$4 sm:$0xff]   ;;  %v6428_v51 = vld [vmem:[#allocation2 + $0x36c] ss:$16 sps:$4 sm:$0xff]  }
  0x86   :  { %1711 = vmatpush1.bf16.msra.mxu0 %v6337_v52  ;;  %1875 = vmatpush1.bf16.msra.mxu1 %v6338_v53  ;;  %v6423_v52 = vld [vmem:[#allocation2 + $0x360] ss:$16 sps:$4 sm:$0xff]   ;;  %v6426_v53 = vld [vmem:[#allocation2 + $0x368] ss:$16 sps:$4 sm:$0xff]  }
  0x87   :  { %1712 = vmatprep.subr.bf16.mxu0 %v6339_v54  ;;  %1876 = vmatprep.subr.bf16.mxu1 %v6341_v55  ;;  %v6431_v54 = vld [vmem:[#allocation2 + $0x384] ss:$16 sps:$4 sm:$0xff]   ;;  %v6434_v55 = vld [vmem:[#allocation2 + $0x38c] ss:$16 sps:$4 sm:$0xff]  }
  0x8a   :  { %1713 = vmatpush1.bf16.msra.mxu0 %v6343_v56  ;;  %1877 = vmatpush1.bf16.msra.mxu1 %v6344_v57  ;;  %v6429_v56 = vld [vmem:[#allocation2 + $0x380] ss:$16 sps:$4 sm:$0xff]   ;;  %v6432_v57 = vld [vmem:[#allocation2 + $0x388] ss:$16 sps:$4 sm:$0xff]  }
  0x8b   :  { %1714 = vmatprep.subr.bf16.mxu0 %v6345_v58  ;;  %1878 = vmatprep.subr.bf16.mxu1 %v6347_v59  ;;  %v6437_v58 = vld [vmem:[#allocation2 + $0x3a4] ss:$16 sps:$4 sm:$0xff]   ;;  %v6440_v59 = vld [vmem:[#allocation2 + $0x3ac] ss:$16 sps:$4 sm:$0xff]  }
  0x8e   :  { %1715 = vmatpush1.bf16.msra.mxu0 %v6349_v60  ;;  %1879 = vmatpush1.bf16.msra.mxu1 %v6350_v61  ;;  %v6435_v60 = vld [vmem:[#allocation2 + $0x3a0] ss:$16 sps:$4 sm:$0xff]   ;;  %v6438_v61 = vld [vmem:[#allocation2 + $0x3a8] ss:$16 sps:$4 sm:$0xff]  }
  0x8f   :  { %1716 = vmatprep.subr.bf16.mxu0 %v6351_v62  ;;  %1880 = vmatprep.subr.bf16.mxu1 %v6353_v63  ;;  %v6443_v62 = vld [vmem:[#allocation2 + $0x3c4] ss:$16 sps:$4 sm:$0xff]   ;;  %v6446_v63 = vld [vmem:[#allocation2 + $0x3cc] ss:$16 sps:$4 sm:$0xff]  }
  0x92   :  { %1717 = vmatpush1.bf16.msra.mxu0 %v6355_v0  ;;  %1881 = vmatpush1.bf16.msra.mxu1 %v6356_v1  ;;  %v6441_v0 = vld [vmem:[#allocation2 + $0x3c0] ss:$16 sps:$4 sm:$0xff]   ;;  %v6444_v1 = vld [vmem:[#allocation2 + $0x3c8] ss:$16 sps:$4 sm:$0xff]  }
  0x93   :  { %1727 = vmatprep.subr.bf16.mxu0 %v6359_v3  ;;  %1891 = vmatprep.subr.bf16.mxu1 %v6362_v4  ;;  %v6452_v3 = vld [vmem:[#allocation2 + $0x3ec] ss:$16 sps:$4 sm:$0xff]   ;;  %v6447_v4 = vld [vmem:[#allocation2 + $0x3e0] ss:$16 sps:$4 sm:$0xff]  }
  0x95   :  { %1719 = vmatmul.mubr.bf16.vlgmr.msra.gmra.mrb[0].mxu0 %v120_v5  ;;  %1883 = vmatmul.mubr.bf16.vlgmr.msra.gmra.mrb[0].mxu1 %v120_v5  ;;  %v6450_v5 = vld [vmem:[#allocation2 + $0x3e8] ss:$16 sps:$4 sm:$0xff]  }
  0x96   :  { %1728 = vmatpush1.bf16.msra.mxu0 %v6357_v6  ;;  %1892 = vmatpush1.bf16.msra.mxu1 %v6360_v7  ;;  %v6455_v6 = vld [vmem:[#allocation2 + $0x404] ss:$16 sps:$4 sm:$0xff]  }
  0x97   :  { %1729 = vmatprep.subr.bf16.mxu0 %v6365_v8  ;;  %1893 = vmatprep.subr.bf16.mxu1 %v6368_v9  ;;  %v114_v7 = vld [vmem:[%s7447_s18 + $0x10] sm:$0xff]  ;;  %v6458_v8 = vld [vmem:[#allocation2 + $0x40c] ss:$16 sps:$4 sm:$0xff]  }
  0x98   :  { %1759 = vmatprep.mubr.bf16.mxu0 %v123_v32  ;;  %1923 = vmatprep.mubr.bf16.mxu1 %v123_v32  ;;  %v6453_v9 = vld [vmem:[#allocation2 + $0x400] ss:$16 sps:$4 sm:$0xff]  }
  0x99   :  { %v6483_v32 = vld [vmem:[#allocation2 + $0x4a0] ss:$16 sps:$4 sm:$0xff]  }
  0x9a   :  { %1730 = vmatpush1.bf16.msra.mxu0 %v6363_v10  ;;  %1894 = vmatpush1.bf16.msra.mxu1 %v6366_v11  ;;  %v6456_v10 = vld [vmem:[#allocation2 + $0x408] ss:$16 sps:$4 sm:$0xff]   ;;  %v122_v11 = vpack.c.bf16 %v114_v7, %v114_v7  ;;  %v6548_v7 = vld [vmem:[#allocation2 + $0x5ec] ss:$16 sps:$4 sm:$0xff]  }
  0x9b   :  { %1731 = vmatprep.subr.bf16.mxu0 %v6371_v12  ;;  %1895 = vmatprep.subr.bf16.mxu1 %v6374_v13  ;;  %v6461_v12 = vld [vmem:[#allocation2 + $0x424] ss:$16 sps:$4 sm:$0xff]   ;;  %v6464_v13 = vld [vmem:[#allocation2 + $0x42c] ss:$16 sps:$4 sm:$0xff]  }
  0x9e   :  { %1732 = vmatpush1.bf16.msra.mxu0 %v6369_v14  ;;  %1896 = vmatpush1.bf16.msra.mxu1 %v6372_v15  ;;  %v117_v14 = vld [vmem:[%s7447_s18 + $0x28] sm:$0xff] }
  0x9f   :  { %1733 = vmatprep.subr.bf16.mxu0 %v6377_v16  ;;  %1897 = vmatprep.subr.bf16.mxu1 %v6380_v17  ;;  %v125_v15 = vpack.c.bf16 %v117_v14, %v117_v14  ;;  %v6459_v16 = vld [vmem:[#allocation2 + $0x420] ss:$16 sps:$4 sm:$0xff]   ;;  %v6462_v17 = vld [vmem:[#allocation2 + $0x428] ss:$16 sps:$4 sm:$0xff]  }
  0xa0   :  { %v6552_v14 = vld [vmem:[#allocation2 + $0x608] ss:$16 sps:$4 sm:$0xff]  }
  0xa2   :  { %1734 = vmatpush1.bf16.msra.mxu0 %v6375_v18  ;;  %1898 = vmatpush1.bf16.msra.mxu1 %v6378_v19  ;;  %v6467_v18 = vld [vmem:[#allocation2 + $0x444] ss:$16 sps:$4 sm:$0xff]   ;;  %v6470_v19 = vld [vmem:[#allocation2 + $0x44c] ss:$16 sps:$4 sm:$0xff]  }
  0xa3   :  { %1735 = vmatprep.subr.bf16.mxu0 %v6383_v20  ;;  %1899 = vmatprep.subr.bf16.mxu1 %v6386_v21  ;;  %v6465_v20 = vld [vmem:[#allocation2 + $0x440] ss:$16 sps:$4 sm:$0xff]   ;;  %v6468_v21 = vld [vmem:[#allocation2 + $0x448] ss:$16 sps:$4 sm:$0xff]  }
  0xa6   :  { %1736 = vmatpush1.bf16.msra.mxu0 %v6381_v22  ;;  %1900 = vmatpush1.bf16.msra.mxu1 %v6384_v23  ;;  %v6473_v22 = vld [vmem:[#allocation2 + $0x464] ss:$16 sps:$4 sm:$0xff]   ;;  %v6476_v23 = vld [vmem:[#allocation2 + $0x46c] ss:$16 sps:$4 sm:$0xff]  }
  0xa7   :  { %1737 = vmatprep.subr.bf16.mxu0 %v6389_v24  ;;  %1901 = vmatprep.subr.bf16.mxu1 %v6392_v25  ;;  %v6471_v24 = vld [vmem:[#allocation2 + $0x460] ss:$16 sps:$4 sm:$0xff]   ;;  %v6474_v25 = vld [vmem:[#allocation2 + $0x468] ss:$16 sps:$4 sm:$0xff]  }
  0xaa   :  { %1738 = vmatpush1.bf16.msra.mxu0 %v6387_v26  ;;  %1902 = vmatpush1.bf16.msra.mxu1 %v6390_v27  ;;  %v6479_v26 = vld [vmem:[#allocation2 + $0x484] ss:$16 sps:$4 sm:$0xff]   ;;  %v6482_v27 = vld [vmem:[#allocation2 + $0x48c] ss:$16 sps:$4 sm:$0xff]  }
  0xab   :  { %1739 = vmatprep.subr.bf16.mxu0 %v6395_v28  ;;  %1903 = vmatprep.subr.bf16.mxu1 %v6398_v29  ;;  %v6477_v28 = vld [vmem:[#allocation2 + $0x480] ss:$16 sps:$4 sm:$0xff]   ;;  %v6480_v29 = vld [vmem:[#allocation2 + $0x488] ss:$16 sps:$4 sm:$0xff]  }
  0xae   :  { %1740 = vmatpush1.bf16.msra.mxu0 %v6393_v31  ;;  %1904 = vmatpush1.bf16.msra.mxu1 %v6396_v33  ;;  %v6488_v31 = vld [vmem:[#allocation2 + $0x4ac] ss:$16 sps:$4 sm:$0xff]   ;;  %v6486_v33 = vld [vmem:[#allocation2 + $0x4a8] ss:$16 sps:$4 sm:$0xff]  }
  0xaf   :  { %1741 = vmatprep.subr.bf16.mxu0 %v6401_v34  ;;  %1905 = vmatprep.subr.bf16.mxu1 %v6404_v35  ;;  %v6491_v34 = vld [vmem:[#allocation2 + $0x4c4] ss:$16 sps:$4 sm:$0xff]   ;;  %v6494_v35 = vld [vmem:[#allocation2 + $0x4cc] ss:$16 sps:$4 sm:$0xff]  }
  0xb2   :  { %1742 = vmatpush1.bf16.msra.mxu0 %v6399_v36  ;;  %1906 = vmatpush1.bf16.msra.mxu1 %v6402_v37  ;;  %v6489_v36 = vld [vmem:[#allocation2 + $0x4c0] ss:$16 sps:$4 sm:$0xff]   ;;  %v6492_v37 = vld [vmem:[#allocation2 + $0x4c8] ss:$16 sps:$4 sm:$0xff]  }
  0xb3   :  { %1743 = vmatprep.subr.bf16.mxu0 %v6407_v38  ;;  %1907 = vmatprep.subr.bf16.mxu1 %v6410_v39  ;;  %v6497_v38 = vld [vmem:[#allocation2 + $0x4e4] ss:$16 sps:$4 sm:$0xff]   ;;  %v6500_v39 = vld [vmem:[#allocation2 + $0x4ec] ss:$16 sps:$4 sm:$0xff]  }
  0xb6   :  { %1744 = vmatpush1.bf16.msra.mxu0 %v6405_v40  ;;  %1908 = vmatpush1.bf16.msra.mxu1 %v6408_v41  ;;  %v6495_v40 = vld [vmem:[#allocation2 + $0x4e0] ss:$16 sps:$4 sm:$0xff]   ;;  %v6498_v41 = vld [vmem:[#allocation2 + $0x4e8] ss:$16 sps:$4 sm:$0xff]  }
  0xb7   :  { %1745 = vmatprep.subr.bf16.mxu0 %v6413_v42  ;;  %1909 = vmatprep.subr.bf16.mxu1 %v6416_v43  ;;  %v6503_v42 = vld [vmem:[#allocation2 + $0x504] ss:$16 sps:$4 sm:$0xff]   ;;  %v6506_v43 = vld [vmem:[#allocation2 + $0x50c] ss:$16 sps:$4 sm:$0xff]  }
  0xba   :  { %1746 = vmatpush1.bf16.msra.mxu0 %v6411_v44  ;;  %1910 = vmatpush1.bf16.msra.mxu1 %v6414_v45  ;;  %v6501_v44 = vld [vmem:[#allocation2 + $0x500] ss:$16 sps:$4 sm:$0xff]   ;;  %v6504_v45 = vld [vmem:[#allocation2 + $0x508] ss:$16 sps:$4 sm:$0xff]  }
  0xbb   :  { %1747 = vmatprep.subr.bf16.mxu0 %v6419_v46  ;;  %1911 = vmatprep.subr.bf16.mxu1 %v6422_v47  ;;  %v6509_v46 = vld [vmem:[#allocation2 + $0x524] ss:$16 sps:$4 sm:$0xff]   ;;  %v6512_v47 = vld [vmem:[#allocation2 + $0x52c] ss:$16 sps:$4 sm:$0xff]  }
  0xbe   :  { %1748 = vmatpush1.bf16.msra.mxu0 %v6417_v48  ;;  %1912 = vmatpush1.bf16.msra.mxu1 %v6420_v49  ;;  %v6507_v48 = vld [vmem:[#allocation2 + $0x520] ss:$16 sps:$4 sm:$0xff]   ;;  %v6510_v49 = vld [vmem:[#allocation2 + $0x528] ss:$16 sps:$4 sm:$0xff]  }
  0xbf   :  { %1749 = vmatprep.subr.bf16.mxu0 %v6425_v50  ;;  %1913 = vmatprep.subr.bf16.mxu1 %v6428_v51  ;;  %v6515_v50 = vld [vmem:[#allocation2 + $0x544] ss:$16 sps:$4 sm:$0xff]   ;;  %v6518_v51 = vld [vmem:[#allocation2 + $0x54c] ss:$16 sps:$4 sm:$0xff]  }
  0xc2   :  { %1750 = vmatpush1.bf16.msra.mxu0 %v6423_v52  ;;  %1914 = vmatpush1.bf16.msra.mxu1 %v6426_v53  ;;  %v6513_v52 = vld [vmem:[#allocation2 + $0x540] ss:$16 sps:$4 sm:$0xff]   ;;  %v6516_v53 = vld [vmem:[#allocation2 + $0x548] ss:$16 sps:$4 sm:$0xff]  }
  0xc3   :  { %1751 = vmatprep.subr.bf16.mxu0 %v6431_v54  ;;  %1915 = vmatprep.subr.bf16.mxu1 %v6434_v55  ;;  %v6521_v54 = vld [vmem:[#allocation2 + $0x564] ss:$16 sps:$4 sm:$0xff]   ;;  %v6524_v55 = vld [vmem:[#allocation2 + $0x56c] ss:$16 sps:$4 sm:$0xff]  }
  0xc6   :  { %1752 = vmatpush1.bf16.msra.mxu0 %v6429_v56  ;;  %1916 = vmatpush1.bf16.msra.mxu1 %v6432_v57  ;;  %v6519_v56 = vld [vmem:[#allocation2 + $0x560] ss:$16 sps:$4 sm:$0xff]   ;;  %v6522_v57 = vld [vmem:[#allocation2 + $0x568] ss:$16 sps:$4 sm:$0xff]  }
  0xc7   :  { %1753 = vmatprep.subr.bf16.mxu0 %v6437_v58  ;;  %1917 = vmatprep.subr.bf16.mxu1 %v6440_v59  ;;  %v6527_v58 = vld [vmem:[#allocation2 + $0x584] ss:$16 sps:$4 sm:$0xff]   ;;  %v6530_v59 = vld [vmem:[#allocation2 + $0x58c] ss:$16 sps:$4 sm:$0xff]  }
  0xca   :  { %1754 = vmatpush1.bf16.msra.mxu0 %v6435_v60  ;;  %1918 = vmatpush1.bf16.msra.mxu1 %v6438_v61  ;;  %v6525_v60 = vld [vmem:[#allocation2 + $0x580] ss:$16 sps:$4 sm:$0xff]   ;;  %v6528_v61 = vld [vmem:[#allocation2 + $0x588] ss:$16 sps:$4 sm:$0xff]  }
  0xcb   :  { %1755 = vmatprep.subr.bf16.mxu0 %v6443_v62  ;;  %1919 = vmatprep.subr.bf16.mxu1 %v6446_v63  ;;  %v6533_v62 = vld [vmem:[#allocation2 + $0x5a4] ss:$16 sps:$4 sm:$0xff]   ;;  %v6536_v63 = vld [vmem:[#allocation2 + $0x5ac] ss:$16 sps:$4 sm:$0xff]  }
  0xce   :  { %1756 = vmatpush1.bf16.msra.mxu0 %v6441_v0  ;;  %1920 = vmatpush1.bf16.msra.mxu1 %v6444_v1  ;;  %v6531_v0 = vld [vmem:[#allocation2 + $0x5a0] ss:$16 sps:$4 sm:$0xff]   ;;  %v6534_v1 = vld [vmem:[#allocation2 + $0x5a8] ss:$16 sps:$4 sm:$0xff]  }
  0xcf   :  { %1757 = vmatprep.subr.bf16.mxu0 %v6449_v2  ;;  %1921 = vmatprep.subr.bf16.mxu1 %v6452_v3  ;;  %v6539_v2 = vld [vmem:[#allocation2 + $0x5c4] ss:$16 sps:$4 sm:$0xff]   ;;  %v6542_v3 = vld [vmem:[#allocation2 + $0x5cc] ss:$16 sps:$4 sm:$0xff]  }
  0xd2   :  { %1758 = vmatpush1.bf16.msra.mxu0 %v6447_v4  ;;  %1922 = vmatpush1.bf16.msra.mxu1 %v6450_v5  ;;  %v6537_v4 = vld [vmem:[#allocation2 + $0x5c0] ss:$16 sps:$4 sm:$0xff]   ;;  %v6540_v5 = vld [vmem:[#allocation2 + $0x5c8] ss:$16 sps:$4 sm:$0xff]  }
  0xd3   :  { %1768 = vmatprep.subr.bf16.mxu0 %v6455_v6  ;;  %1932 = vmatprep.subr.bf16.mxu1 %v6458_v8  ;;  %v6545_v6 = vld [vmem:[#allocation2 + $0x5e4] ss:$16 sps:$4 sm:$0xff]   ;;  %v6543_v8 = vld [vmem:[#allocation2 + $0x5e0] ss:$16 sps:$4 sm:$0xff]  }
  0xd5   :  { %1760 = vmatmul.mubr.bf16.vlgmr.msra.gmra.mrb[0].mxu0 %v122_v11  ;;  %1924 = vmatmul.mubr.bf16.vlgmr.msra.gmra.mrb[0].mxu1 %v122_v11  ;;  %v116_v11 = vld [vmem:[%s7447_s18 + $0x20] sm:$0xff] }
  0xd6   :  { %1769 = vmatpush1.bf16.msra.mxu0 %v6453_v9  ;;  %1933 = vmatpush1.bf16.msra.mxu1 %v6456_v10  ;;  %v6546_v9 = vld [vmem:[#allocation2 + $0x5e8] ss:$16 sps:$4 sm:$0xff]   ;;  %v6551_v10 = vld [vmem:[#allocation2 + $0x604] ss:$16 sps:$4 sm:$0xff]  }
  0xd7   :  { %1770 = vmatprep.subr.bf16.mxu0 %v6461_v12  ;;  %1934 = vmatprep.subr.bf16.mxu1 %v6464_v13  ;;  %v6554_v12 = vld [vmem:[#allocation2 + $0x60c] ss:$16 sps:$4 sm:$0xff]   ;;  %v6549_v13 = vld [vmem:[#allocation2 + $0x600] ss:$16 sps:$4 sm:$0xff]  }
  0xd8   :  { %1800 = vmatprep.mubr.bf16.mxu0 %v125_v15  ;;  %1964 = vmatprep.mubr.bf16.mxu1 %v125_v15  ;;  %v124_v15 = vpack.c.bf16 %v116_v11, %v116_v11  ;;  %v6644_v11 = vld [vmem:[#allocation2 + $0x7ec] ss:$16 sps:$4 sm:$0xff]  }
  0xda   :  { %1771 = vmatpush1.bf16.msra.mxu0 %v6459_v16  ;;  %1935 = vmatpush1.bf16.msra.mxu1 %v6462_v17  ;;  %v6557_v16 = vld [vmem:[#allocation2 + $0x624] ss:$16 sps:$4 sm:$0xff]   ;;  %v119_v17 = vld [vmem:[%s7447_s18 + $0x38] sm:$0xff] }
  0xdb   :  { %1772 = vmatprep.subr.bf16.mxu0 %v6467_v18  ;;  %1936 = vmatprep.subr.bf16.mxu1 %v6470_v19  ;;  %v6560_v18 = vld [vmem:[#allocation2 + $0x62c] ss:$16 sps:$4 sm:$0xff]   ;;  %v6555_v19 = vld [vmem:[#allocation2 + $0x620] ss:$16 sps:$4 sm:$0xff]  }
  0xde   :  { %1773 = vmatpush1.bf16.msra.mxu0 %v6465_v20  ;;  %1937 = vmatpush1.bf16.msra.mxu1 %v6468_v21  ;;  %v6558_v20 = vld [vmem:[#allocation2 + $0x628] ss:$16 sps:$4 sm:$0xff]   ;;  %v127_v21 = vpack.c.bf16 %v119_v17, %v119_v17 }
  0xdf   :  { %1774 = vmatprep.subr.bf16.mxu0 %v6473_v22  ;;  %1938 = vmatprep.subr.bf16.mxu1 %v6476_v23  ;;  %v6563_v22 = vld [vmem:[#allocation2 + $0x644] ss:$16 sps:$4 sm:$0xff]   ;;  %v6566_v23 = vld [vmem:[#allocation2 + $0x64c] ss:$16 sps:$4 sm:$0xff]   ;;  %v6645_v17 = vld [vmem:[#allocation5] ss:$8 sps:$4 sm:$0xff]  }
  0xe2   :  { %1775 = vmatpush1.bf16.msra.mxu0 %v6471_v24  ;;  %1939 = vmatpush1.bf16.msra.mxu1 %v6474_v25  ;;  %v6561_v24 = vld [vmem:[#allocation2 + $0x640] ss:$16 sps:$4 sm:$0xff]   ;;  %v6564_v25 = vld [vmem:[#allocation2 + $0x648] ss:$16 sps:$4 sm:$0xff]  }
  0xe3   :  { %1776 = vmatprep.subr.bf16.mxu0 %v6479_v26  ;;  %1940 = vmatprep.subr.bf16.mxu1 %v6482_v27  ;;  %v6569_v26 = vld [vmem:[#allocation2 + $0x664] ss:$16 sps:$4 sm:$0xff]   ;;  %v6572_v27 = vld [vmem:[#allocation2 + $0x66c] ss:$16 sps:$4 sm:$0xff]  }
  0xe6   :  { %1777 = vmatpush1.bf16.msra.mxu0 %v6477_v28  ;;  %1941 = vmatpush1.bf16.msra.mxu1 %v6480_v29  ;;  %v6567_v28 = vld [vmem:[#allocation2 + $0x660] ss:$16 sps:$4 sm:$0xff]   ;;  %v6570_v29 = vld [vmem:[#allocation2 + $0x668] ss:$16 sps:$4 sm:$0xff]  }
  0xe7   :  { %1778 = vmatprep.subr.bf16.mxu0 %v6485_v30  ;;  %1942 = vmatprep.subr.bf16.mxu1 %v6488_v31  ;;  %v6575_v30 = vld [vmem:[#allocation2 + $0x684] ss:$16 sps:$4 sm:$0xff]   ;;  %v6578_v31 = vld [vmem:[#allocation2 + $0x68c] ss:$16 sps:$4 sm:$0xff]  }
  0xea   :  { %1779 = vmatpush1.bf16.msra.mxu0 %v6483_v32  ;;  %1943 = vmatpush1.bf16.msra.mxu1 %v6486_v33  ;;  %v6573_v32 = vld [vmem:[#allocation2 + $0x680] ss:$16 sps:$4 sm:$0xff]   ;;  %v6576_v33 = vld [vmem:[#allocation2 + $0x688] ss:$16 sps:$4 sm:$0xff]  }
  0xeb   :  { %1780 = vmatprep.subr.bf16.mxu0 %v6491_v34  ;;  %1944 = vmatprep.subr.bf16.mxu1 %v6494_v35  ;;  %v6581_v34 = vld [vmem:[#allocation2 + $0x6a4] ss:$16 sps:$4 sm:$0xff]   ;;  %v6584_v35 = vld [vmem:[#allocation2 + $0x6ac] ss:$16 sps:$4 sm:$0xff]  }
  0xee   :  { %1781 = vmatpush1.bf16.msra.mxu0 %v6489_v36  ;;  %1945 = vmatpush1.bf16.msra.mxu1 %v6492_v37  ;;  %v6579_v36 = vld [vmem:[#allocation2 + $0x6a0] ss:$16 sps:$4 sm:$0xff]   ;;  %v6582_v37 = vld [vmem:[#allocation2 + $0x6a8] ss:$16 sps:$4 sm:$0xff]  }
  0xef   :  { %1782 = vmatprep.subr.bf16.mxu0 %v6497_v38  ;;  %1946 = vmatprep.subr.bf16.mxu1 %v6500_v39  ;;  %v6587_v38 = vld [vmem:[#allocation2 + $0x6c4] ss:$16 sps:$4 sm:$0xff]   ;;  %v6590_v39 = vld [vmem:[#allocation2 + $0x6cc] ss:$16 sps:$4 sm:$0xff]  }
  0xf2   :  { %1783 = vmatpush1.bf16.msra.mxu0 %v6495_v40  ;;  %1947 = vmatpush1.bf16.msra.mxu1 %v6498_v41  ;;  %v6585_v40 = vld [vmem:[#allocation2 + $0x6c0] ss:$16 sps:$4 sm:$0xff]   ;;  %v6588_v41 = vld [vmem:[#allocation2 + $0x6c8] ss:$16 sps:$4 sm:$0xff]  }
  0xf3   :  { %1784 = vmatprep.subr.bf16.mxu0 %v6503_v42  ;;  %1948 = vmatprep.subr.bf16.mxu1 %v6506_v43  ;;  %v6593_v42 = vld [vmem:[#allocation2 + $0x6e4] ss:$16 sps:$4 sm:$0xff]   ;;  %v6596_v43 = vld [vmem:[#allocation2 + $0x6ec] ss:$16 sps:$4 sm:$0xff]  }
  0xf6   :  { %1785 = vmatpush1.bf16.msra.mxu0 %v6501_v44  ;;  %1949 = vmatpush1.bf16.msra.mxu1 %v6504_v45  ;;  %v6591_v44 = vld [vmem:[#allocation2 + $0x6e0] ss:$16 sps:$4 sm:$0xff]   ;;  %v6594_v45 = vld [vmem:[#allocation2 + $0x6e8] ss:$16 sps:$4 sm:$0xff]  }
  0xf7   :  { %1786 = vmatprep.subr.bf16.mxu0 %v6509_v46  ;;  %1950 = vmatprep.subr.bf16.mxu1 %v6512_v47  ;;  %v6599_v46 = vld [vmem:[#allocation2 + $0x704] ss:$16 sps:$4 sm:$0xff]   ;;  %v6602_v47 = vld [vmem:[#allocation2 + $0x70c] ss:$16 sps:$4 sm:$0xff]  }
  0xfa   :  { %1787 = vmatpush1.bf16.msra.mxu0 %v6507_v48  ;;  %1951 = vmatpush1.bf16.msra.mxu1 %v6510_v49  ;;  %v6597_v48 = vld [vmem:[#allocation2 + $0x700] ss:$16 sps:$4 sm:$0xff]   ;;  %v6600_v49 = vld [vmem:[#allocation2 + $0x708] ss:$16 sps:$4 sm:$0xff]  }
  0xfb   :  { %1788 = vmatprep.subr.bf16.mxu0 %v6515_v50  ;;  %1952 = vmatprep.subr.bf16.mxu1 %v6518_v51  ;;  %v6605_v50 = vld [vmem:[#allocation2 + $0x724] ss:$16 sps:$4 sm:$0xff]   ;;  %v6608_v51 = vld [vmem:[#allocation2 + $0x72c] ss:$16 sps:$4 sm:$0xff]  }
  0xfe   :  { %1789 = vmatpush1.bf16.msra.mxu0 %v6513_v52  ;;  %1953 = vmatpush1.bf16.msra.mxu1 %v6516_v53  ;;  %v6603_v52 = vld [vmem:[#allocation2 + $0x720] ss:$16 sps:$4 sm:$0xff]   ;;  %v6606_v53 = vld [vmem:[#allocation2 + $0x728] ss:$16 sps:$4 sm:$0xff]  }
  0xff   :  { %1790 = vmatprep.subr.bf16.mxu0 %v6521_v54  ;;  %1954 = vmatprep.subr.bf16.mxu1 %v6524_v55  ;;  %v6611_v54 = vld [vmem:[#allocation2 + $0x744] ss:$16 sps:$4 sm:$0xff]   ;;  %v6614_v55 = vld [vmem:[#allocation2 + $0x74c] ss:$16 sps:$4 sm:$0xff]  }
 0x102   :  { %1791 = vmatpush1.bf16.msra.mxu0 %v6519_v56  ;;  %1955 = vmatpush1.bf16.msra.mxu1 %v6522_v57  ;;  %v6609_v56 = vld [vmem:[#allocation2 + $0x740] ss:$16 sps:$4 sm:$0xff]   ;;  %v6612_v57 = vld [vmem:[#allocation2 + $0x748] ss:$16 sps:$4 sm:$0xff]  }
 0x103   :  { %1792 = vmatprep.subr.bf16.mxu0 %v6527_v58  ;;  %1956 = vmatprep.subr.bf16.mxu1 %v6530_v59  ;;  %v6617_v58 = vld [vmem:[#allocation2 + $0x764] ss:$16 sps:$4 sm:$0xff]   ;;  %v6620_v59 = vld [vmem:[#allocation2 + $0x76c] ss:$16 sps:$4 sm:$0xff]  }
 0x106   :  { %1793 = vmatpush1.bf16.msra.mxu0 %v6525_v60  ;;  %1957 = vmatpush1.bf16.msra.mxu1 %v6528_v61  ;;  %v6615_v60 = vld [vmem:[#allocation2 + $0x760] ss:$16 sps:$4 sm:$0xff]   ;;  %v6618_v61 = vld [vmem:[#allocation2 + $0x768] ss:$16 sps:$4 sm:$0xff]  }
 0x107   :  { %1794 = vmatprep.subr.bf16.mxu0 %v6533_v62  ;;  %1958 = vmatprep.subr.bf16.mxu1 %v6536_v63  ;;  %v6623_v62 = vld [vmem:[#allocation2 + $0x784] ss:$16 sps:$4 sm:$0xff]   ;;  %v6626_v63 = vld [vmem:[#allocation2 + $0x78c] ss:$16 sps:$4 sm:$0xff]  }
 0x10a   :  { %1795 = vmatpush1.bf16.msra.mxu0 %v6531_v0  ;;  %1959 = vmatpush1.bf16.msra.mxu1 %v6534_v1  ;;  %v6621_v0 = vld [vmem:[#allocation2 + $0x780] ss:$16 sps:$4 sm:$0xff]   ;;  %v6624_v1 = vld [vmem:[#allocation2 + $0x788] ss:$16 sps:$4 sm:$0xff]  }
 0x10b   :  { %1796 = vmatprep.subr.bf16.mxu0 %v6539_v2  ;;  %1960 = vmatprep.subr.bf16.mxu1 %v6542_v3  ;;  %v6629_v2 = vld [vmem:[#allocation2 + $0x7a4] ss:$16 sps:$4 sm:$0xff]   ;;  %v6632_v3 = vld [vmem:[#allocation2 + $0x7ac] ss:$16 sps:$4 sm:$0xff]  }
 0x10e   :  { %1797 = vmatpush1.bf16.msra.mxu0 %v6537_v4  ;;  %1961 = vmatpush1.bf16.msra.mxu1 %v6540_v5  ;;  %v6627_v4 = vld [vmem:[#allocation2 + $0x7a0] ss:$16 sps:$4 sm:$0xff]   ;;  %v6630_v5 = vld [vmem:[#allocation2 + $0x7a8] ss:$16 sps:$4 sm:$0xff]  }
 0x10f   :  { %1798 = vmatprep.subr.bf16.mxu0 %v6545_v6  ;;  %1962 = vmatprep.subr.bf16.mxu1 %v6548_v7  ;;  %v6635_v6 = vld [vmem:[#allocation2 + $0x7c4] ss:$16 sps:$4 sm:$0xff]   ;;  %v6638_v7 = vld [vmem:[#allocation2 + $0x7cc] ss:$16 sps:$4 sm:$0xff]  }
 0x112   :  { %1799 = vmatpush1.bf16.msra.mxu0 %v6543_v8  ;;  %1963 = vmatpush1.bf16.msra.mxu1 %v6546_v9  ;;  %v6633_v8 = vld [vmem:[#allocation2 + $0x7c0] ss:$16 sps:$4 sm:$0xff]   ;;  %v6636_v9 = vld [vmem:[#allocation2 + $0x7c8] ss:$16 sps:$4 sm:$0xff]  }
 0x113   :  { %1809 = vmatprep.subr.bf16.mxu0 %v6551_v10  ;;  %1973 = vmatprep.subr.bf16.mxu1 %v6554_v12  ;;  %v6641_v10 = vld [vmem:[#allocation2 + $0x7e4] ss:$16 sps:$4 sm:$0xff]   ;;  %v6639_v12 = vld [vmem:[#allocation2 + $0x7e0] ss:$16 sps:$4 sm:$0xff]  }
 0x115   :  { %1801 = vmatmul.mubr.bf16.vlgmr.msra.gmra.mrb[0].mxu0 %v124_v15  ;;  %1965 = vmatmul.mubr.bf16.vlgmr.msra.gmra.mrb[0].mxu1 %v124_v15  ;;  %v6647_v15 = vld [vmem:[#allocation5 + $0x4] ss:$8 sps:$4 sm:$0xff]  }
 0x116   :  { %1810 = vmatpush1.bf16.msra.mxu0 %v6549_v13  ;;  %1974 = vmatpush1.bf16.msra.mxu1 %v6552_v14  ;;  %v6642_v13 = vld [vmem:[#allocation2 + $0x7e8] ss:$16 sps:$4 sm:$0xff]   ;;  %v118_v14 = vld [vmem:[%s7447_s18 + $0x30] sm:$0xff] }
 0x117   :  { %1811 = vmatprep.subr.bf16.mxu0 %v6557_v16  ;;  %1975 = vmatprep.subr.bf16.mxu1 %v6560_v18  ;;  %v126_v16 = vpack.c.bf16 %v118_v14, %v118_v14  ;;  %v6650_v18 = vld [vmem:[#allocation5 + $0x14] ss:$8 sps:$4 sm:$0xff]  }
 0x118   :  { %1841 = vmatprep.mubr.bf16.mxu0 %v127_v21  ;;  %2005 = vmatprep.mubr.bf16.mxu1 %v127_v21  ;;  %v6651_v21 = vld [vmem:[#allocation5 + $0x20] ss:$8 sps:$4 sm:$0xff]  }
 0x11a   :  { %1812 = vmatpush1.bf16.msra.mxu0 %v6555_v19  ;;  %1976 = vmatpush1.bf16.msra.mxu1 %v6558_v20  ;;  %v6648_v19 = vld [vmem:[#allocation5 + $0x10] ss:$8 sps:$4 sm:$0xff]   ;;  %v6653_v20 = vld [vmem:[#allocation5 + $0x24] ss:$8 sps:$4 sm:$0xff]  }
 0x11b   :  { %1813 = vmatprep.subr.bf16.mxu0 %v6563_v22  ;;  %1977 = vmatprep.subr.bf16.mxu1 %v6566_v23  ;;  %v6656_v22 = vld [vmem:[#allocation5 + $0x34] ss:$8 sps:$4 sm:$0xff]   ;;  %v6654_v23 = vld [vmem:[#allocation5 + $0x30] ss:$8 sps:$4 sm:$0xff]  }
 0x11e   :  { %1814 = vmatpush1.bf16.msra.mxu0 %v6561_v24  ;;  %1978 = vmatpush1.bf16.msra.mxu1 %v6564_v25  ;;  %v6659_v24 = vld [vmem:[#allocation5 + $0x44] ss:$8 sps:$4 sm:$0xff]   ;;  %v6657_v25 = vld [vmem:[#allocation5 + $0x40] ss:$8 sps:$4 sm:$0xff]  }
 0x11f   :  { %1815 = vmatprep.subr.bf16.mxu0 %v6569_v26  ;;  %1979 = vmatprep.subr.bf16.mxu1 %v6572_v27  ;;  %v6662_v26 = vld [vmem:[#allocation5 + $0x54] ss:$8 sps:$4 sm:$0xff]   ;;  %v6660_v27 = vld [vmem:[#allocation5 + $0x50] ss:$8 sps:$4 sm:$0xff]  }
 0x122   :  { %1816 = vmatpush1.bf16.msra.mxu0 %v6567_v28  ;;  %1980 = vmatpush1.bf16.msra.mxu1 %v6570_v29  ;;  %v6665_v28 = vld [vmem:[#allocation5 + $0x64] ss:$8 sps:$4 sm:$0xff]   ;;  %v6663_v29 = vld [vmem:[#allocation5 + $0x60] ss:$8 sps:$4 sm:$0xff]  }
 0x123   :  { %1817 = vmatprep.subr.bf16.mxu0 %v6575_v30  ;;  %1981 = vmatprep.subr.bf16.mxu1 %v6578_v31  ;;  %v6668_v30 = vld [vmem:[#allocation5 + $0x74] ss:$8 sps:$4 sm:$0xff]   ;;  %v6666_v31 = vld [vmem:[#allocation5 + $0x70] ss:$8 sps:$4 sm:$0xff]  }
 0x126   :  { %1818 = vmatpush1.bf16.msra.mxu0 %v6573_v32  ;;  %1982 = vmatpush1.bf16.msra.mxu1 %v6576_v33  ;;  %v6671_v32 = vld [vmem:[#allocation5 + $0x84] ss:$8 sps:$4 sm:$0xff]   ;;  %v6669_v33 = vld [vmem:[#allocation5 + $0x80] ss:$8 sps:$4 sm:$0xff]  }
 0x127   :  { %1819 = vmatprep.subr.bf16.mxu0 %v6581_v34  ;;  %1983 = vmatprep.subr.bf16.mxu1 %v6584_v35  ;;  %v6674_v34 = vld [vmem:[#allocation5 + $0x94] ss:$8 sps:$4 sm:$0xff]   ;;  %v6672_v35 = vld [vmem:[#allocation5 + $0x90] ss:$8 sps:$4 sm:$0xff]  }
 0x12a   :  { %1820 = vmatpush1.bf16.msra.mxu0 %v6579_v36  ;;  %1984 = vmatpush1.bf16.msra.mxu1 %v6582_v37  ;;  %v6677_v36 = vld [vmem:[#allocation5 + $0xa4] ss:$8 sps:$4 sm:$0xff]   ;;  %v6675_v37 = vld [vmem:[#allocation5 + $0xa0] ss:$8 sps:$4 sm:$0xff]  }
 0x12b   :  { %1821 = vmatprep.subr.bf16.mxu0 %v6587_v38  ;;  %1985 = vmatprep.subr.bf16.mxu1 %v6590_v39  ;;  %v6680_v38 = vld [vmem:[#allocation5 + $0xb4] ss:$8 sps:$4 sm:$0xff]   ;;  %v6678_v39 = vld [vmem:[#allocation5 + $0xb0] ss:$8 sps:$4 sm:$0xff]  }
 0x12e   :  { %1822 = vmatpush1.bf16.msra.mxu0 %v6585_v40  ;;  %1986 = vmatpush1.bf16.msra.mxu1 %v6588_v41  ;;  %v6683_v40 = vld [vmem:[#allocation5 + $0xc4] ss:$8 sps:$4 sm:$0xff]   ;;  %v6681_v41 = vld [vmem:[#allocation5 + $0xc0] ss:$8 sps:$4 sm:$0xff]  }
 0x12f   :  { %1823 = vmatprep.subr.bf16.mxu0 %v6593_v42  ;;  %1987 = vmatprep.subr.bf16.mxu1 %v6596_v43  ;;  %v6686_v42 = vld [vmem:[#allocation5 + $0xd4] ss:$8 sps:$4 sm:$0xff]   ;;  %v6684_v43 = vld [vmem:[#allocation5 + $0xd0] ss:$8 sps:$4 sm:$0xff]  }
 0x132   :  { %1824 = vmatpush1.bf16.msra.mxu0 %v6591_v44  ;;  %1988 = vmatpush1.bf16.msra.mxu1 %v6594_v45  ;;  %v6689_v44 = vld [vmem:[#allocation5 + $0xe4] ss:$8 sps:$4 sm:$0xff]   ;;  %v6687_v45 = vld [vmem:[#allocation5 + $0xe0] ss:$8 sps:$4 sm:$0xff]  }
 0x133   :  { %1825 = vmatprep.subr.bf16.mxu0 %v6599_v46  ;;  %1989 = vmatprep.subr.bf16.mxu1 %v6602_v47  ;;  %v6692_v46 = vld [vmem:[#allocation5 + $0xf4] ss:$8 sps:$4 sm:$0xff]   ;;  %v6690_v47 = vld [vmem:[#allocation5 + $0xf0] ss:$8 sps:$4 sm:$0xff]  }
 0x136   :  { %1826 = vmatpush1.bf16.msra.mxu0 %v6597_v48  ;;  %1990 = vmatpush1.bf16.msra.mxu1 %v6600_v49  ;;  %v6695_v48 = vld [vmem:[#allocation5 + $0x104] ss:$8 sps:$4 sm:$0xff]  }
 0x137   :  { %1827 = vmatprep.subr.bf16.mxu0 %v6605_v50  ;;  %1991 = vmatprep.subr.bf16.mxu1 %v6608_v51  ;;  %v6741_v49 = vld [vmem:[%s7427_s5 + $0x40] sm:$0xff]   ;;  %v6743_v51 = vld [vmem:[%s7427_s5 + $0x48] sm:$0xff]  }
 0x138   :  { %v6742_v50 = vld [vmem:[%s7427_s5] sm:$0xff]  }
 0x13a   :  { %1828 = vmatpush1.bf16.msra.mxu0 %v6603_v52  ;;  %1992 = vmatpush1.bf16.msra.mxu1 %v6606_v53  ;;  %v6744_v52 = vld [vmem:[%s7427_s5 + $0x8] sm:$0xff]   ;;  %v6745_v53 = vld [vmem:[%s7427_s5 + $0x50] sm:$0xff]  }
 0x13b   :  { %1829 = vmatprep.subr.bf16.mxu0 %v6611_v54  ;;  %1993 = vmatprep.subr.bf16.mxu1 %v6614_v55  ;;  %v6746_v54 = vld [vmem:[%s7427_s5 + $0x10] sm:$0xff]   ;;  %v6747_v55 = vld [vmem:[%s7427_s5 + $0x58] sm:$0xff]  }
 0x13e   :  { %1830 = vmatpush1.bf16.msra.mxu0 %v6609_v56  ;;  %1994 = vmatpush1.bf16.msra.mxu1 %v6612_v57  ;;  %v6748_v56 = vld [vmem:[%s7427_s5 + $0x18] sm:$0xff]   ;;  %v6749_v57 = vld [vmem:[%s7427_s5 + $0x60] sm:$0xff]  }
 0x13f   :  { %1831 = vmatprep.subr.bf16.mxu0 %v6617_v58  ;;  %1995 = vmatprep.subr.bf16.mxu1 %v6620_v59  ;;  %v6750_v58 = vld [vmem:[%s7427_s5 + $0x20] sm:$0xff]   ;;  %v6751_v59 = vld [vmem:[%s7427_s5 + $0x68] sm:$0xff]  }
 0x142   :  { %1832 = vmatpush1.bf16.msra.mxu0 %v6615_v60  ;;  %1996 = vmatpush1.bf16.msra.mxu1 %v6618_v61  ;;  %v6752_v60 = vld [vmem:[%s7427_s5 + $0x28] sm:$0xff]   ;;  %v386_v61 = vlaneseq }
 0x143   :  { %1833 = vmatprep.subr.bf16.mxu0 %v6623_v62  ;;  %1997 = vmatprep.subr.bf16.mxu1 %v6626_v63 }
 0x144   :  { %v7241_v62 = vshrl.u32 %v386_v61, 7  ;;  %v6755_v61 = vld [vmem:[%s7427_s5 + $0x78] sm:$0xff]  }
 0x146   :  { %1834 = vmatpush1.bf16.msra.mxu0 %v6621_v0  ;;  %1998 = vmatpush1.bf16.msra.mxu1 %v6624_v1  ;;  %v7244_v63 = vsub.s32 0, %v7241_v62  ;;  %v7249_v0 = vld [vmem:[%s7424_s2] sm:$0xf]  ;;  %v7252_v1 = vsub.s32 1, %v7241_v62 }
 0x147   :  { %1835 = vmatprep.subr.bf16.mxu0 %v6629_v2  ;;  %1999 = vmatprep.subr.bf16.mxu1 %v6632_v3  ;;  %v7255_v2 = vsub.s32 3, %v7241_v62 }
 0x148   :  { %v389_v3 = vrot.slane %v7249_v0, %v7244_v63 }
 0x14a   :  { %1836 = vmatpush1.bf16.msra.mxu0 %v6627_v4  ;;  %2000 = vmatpush1.bf16.msra.mxu1 %v6630_v5  ;;  %v393_v4 = vrot.slane %v7249_v0, %v7252_v1  ;;  %v401_v5 = vrot.slane %v7249_v0, %v7255_v2 }
 0x14b   :  { %1837 = vmatprep.subr.bf16.mxu0 %v6635_v6  ;;  %2001 = vmatprep.subr.bf16.mxu1 %v6638_v7 }
 0x14e   :  { %1838 = vmatpush1.bf16.msra.mxu0 %v6633_v8  ;;  %2002 = vmatpush1.bf16.msra.mxu1 %v6636_v9 }
 0x14f   :  { %1839 = vmatprep.subr.bf16.mxu0 %v6641_v10  ;;  %2003 = vmatprep.subr.bf16.mxu1 %v6644_v11 }
 0x152   :  { %1840 = vmatpush1.bf16.msra.mxu0 %v6639_v12  ;;  %2004 = vmatpush1.bf16.msra.mxu1 %v6642_v13 }
 0x153   :  { %2418 = vmatprep.subr.bf16.mxu0 %v6647_v15  ;;  %6147 = vmatprep.subr.bf16.mxu1 %v6741_v49  ;;  %v6734_v49 = vld [vmem:[#allocation5 + $0x1d4] ss:$8 sps:$4 sm:$0xff]  }
 0x155   :  { %1842 = vmatmul.mubr.bf16.vlgmr.msra.gmra.mrb[0].mxu0 %v126_v16  ;;  %2006 = vmatmul.mubr.bf16.vlgmr.msra.gmra.mrb[0].mxu1 %v126_v16 }
 0x156   :  { %2419 = vmatpush1.bf16.msra.mxu0 %v6645_v17  ;;  %6148 = vmatpush3.bf16.msra.mxu1 %v6742_v50  ;;  %v6732_v50 = vld [vmem:[#allocation5 + $0x1d0] ss:$8 sps:$4 sm:$0xff]  }
 0x157   :  { %2420 = vmatprep.subr.bf16.mxu0 %v6650_v18  ;;  %6149 = vmatprep.subr.bf16.mxu1 %v6743_v51 }
 0x15a   :  { %2421 = vmatpush1.bf16.msra.mxu0 %v6648_v19  ;;  %6150 = vmatpush3.bf16.msra.mxu1 %v6744_v52  ;;  %v6737_v52 = vld [vmem:[#allocation5 + $0x1e4] ss:$8 sps:$4 sm:$0xff]  }
 0x15b   :  { %2422 = vmatprep.subr.bf16.mxu0 %v6653_v20  ;;  %6151 = vmatprep.subr.bf16.mxu1 %v6745_v53  ;;  %v6735_v53 = vld [vmem:[#allocation5 + $0x1e0] ss:$8 sps:$4 sm:$0xff]  }
 0x15e   :  { %2423 = vmatpush1.bf16.msra.mxu0 %v6651_v21  ;;  %6152 = vmatpush3.bf16.msra.mxu1 %v6746_v54  ;;  %v6693_v21 = vld [vmem:[#allocation5 + $0x100] ss:$8 sps:$4 sm:$0xff]  }
 0x15f   :  { %2424 = vmatprep.subr.bf16.mxu0 %v6656_v22  ;;  %6153 = vmatprep.subr.bf16.mxu1 %v6747_v55  ;;  %v6740_v55 = vld [vmem:[#allocation5 + $0x1f4] ss:$8 sps:$4 sm:$0xff]  }
 0x162   :  { %2425 = vmatpush1.bf16.msra.mxu0 %v6654_v23  ;;  %6154 = vmatpush3.bf16.msra.mxu1 %v6748_v56  ;;  %v6698_v23 = vld [vmem:[#allocation5 + $0x114] ss:$8 sps:$4 sm:$0xff]   ;;  %v6738_v56 = vld [vmem:[#allocation5 + $0x1f0] ss:$8 sps:$4 sm:$0xff]  }
 0x163   :  { %2426 = vmatprep.subr.bf16.mxu0 %v6659_v24  ;;  %6155 = vmatprep.subr.bf16.mxu1 %v6749_v57 }
 0x166   :  { %2427 = vmatpush1.bf16.msra.mxu0 %v6657_v25  ;;  %6156 = vmatpush3.bf16.msra.mxu1 %v6750_v58  ;;  %v6696_v25 = vld [vmem:[#allocation5 + $0x110] ss:$8 sps:$4 sm:$0xff]  }
 0x167   :  { %2428 = vmatprep.subr.bf16.mxu0 %v6662_v26  ;;  %6157 = vmatprep.subr.bf16.mxu1 %v6751_v59  ;;  %v6701_v26 = vld [vmem:[#allocation5 + $0x124] ss:$8 sps:$4 sm:$0xff]   ;;  %v6753_v59 = vld [vmem:[%s7427_s5 + $0x70] sm:$0xff]  }
 0x16a   :  { %2429 = vmatpush1.bf16.msra.mxu0 %v6660_v27  ;;  %6158 = vmatpush3.bf16.msra.mxu1 %v6752_v60  ;;  %v6699_v27 = vld [vmem:[#allocation5 + $0x120] ss:$8 sps:$4 sm:$0xff]   ;;  %v6754_v60 = vld [vmem:[%s7427_s5 + $0x30] sm:$0xff]  }
 0x16b   :  { %2430 = vmatprep.subr.bf16.mxu0 %v6665_v28  ;;  %v6704_v28 = vld [vmem:[#allocation5 + $0x134] ss:$8 sps:$4 sm:$0xff]   ;;  %6159 = vmatprep.subr.bf16.mxu1 %v6753_v59 }
 0x16e   :  { %2431 = vmatpush1.bf16.msra.mxu0 %v6663_v29  ;;  %v6702_v29 = vld [vmem:[#allocation5 + $0x130] ss:$8 sps:$4 sm:$0xff]   ;;  %6160 = vmatpush3.bf16.msra.mxu1 %v6754_v60 }
 0x16f   :  { %2432 = vmatprep.subr.bf16.mxu0 %v6668_v30  ;;  %v6707_v30 = vld [vmem:[#allocation5 + $0x144] ss:$8 sps:$4 sm:$0xff]   ;;  %6161 = vmatprep.subr.bf16.mxu1 %v6755_v61 }
 0x172   :  { %2433 = vmatpush1.bf16.msra.mxu0 %v6666_v31  ;;  %v6705_v31 = vld [vmem:[#allocation5 + $0x140] ss:$8 sps:$4 sm:$0xff]  }
 0x173   :  { %2434 = vmatprep.subr.bf16.mxu0 %v6671_v32  ;;  %v6710_v32 = vld [vmem:[#allocation5 + $0x154] ss:$8 sps:$4 sm:$0xff]  }
 0x176   :  { %2435 = vmatpush1.bf16.msra.mxu0 %v6669_v33  ;;  %v6708_v33 = vld [vmem:[#allocation5 + $0x150] ss:$8 sps:$4 sm:$0xff]  }
 0x177   :  { %2436 = vmatprep.subr.bf16.mxu0 %v6674_v34  ;;  %v6713_v34 = vld [vmem:[#allocation5 + $0x164] ss:$8 sps:$4 sm:$0xff]  }
 0x17a   :  { %2437 = vmatpush1.bf16.msra.mxu0 %v6672_v35  ;;  %v6711_v35 = vld [vmem:[#allocation5 + $0x160] ss:$8 sps:$4 sm:$0xff]  }
 0x17b   :  { %2438 = vmatprep.subr.bf16.mxu0 %v6677_v36  ;;  %v6716_v36 = vld [vmem:[#allocation5 + $0x174] ss:$8 sps:$4 sm:$0xff]  }
 0x17e   :  { %2439 = vmatpush1.bf16.msra.mxu0 %v6675_v37  ;;  %v6714_v37 = vld [vmem:[#allocation5 + $0x170] ss:$8 sps:$4 sm:$0xff]  }
 0x17f   :  { %2440 = vmatprep.subr.bf16.mxu0 %v6680_v38  ;;  %v6719_v38 = vld [vmem:[#allocation5 + $0x184] ss:$8 sps:$4 sm:$0xff]  }
 0x182   :  { %2441 = vmatpush1.bf16.msra.mxu0 %v6678_v39  ;;  %v6717_v39 = vld [vmem:[#allocation5 + $0x180] ss:$8 sps:$4 sm:$0xff]  }
 0x183   :  { %2442 = vmatprep.subr.bf16.mxu0 %v6683_v40  ;;  %v6722_v40 = vld [vmem:[#allocation5 + $0x194] ss:$8 sps:$4 sm:$0xff]  }
 0x186   :  { %2443 = vmatpush1.bf16.msra.mxu0 %v6681_v41  ;;  %v6720_v41 = vld [vmem:[#allocation5 + $0x190] ss:$8 sps:$4 sm:$0xff]  }
 0x187   :  { %2444 = vmatprep.subr.bf16.mxu0 %v6686_v42  ;;  %v6725_v42 = vld [vmem:[#allocation5 + $0x1a4] ss:$8 sps:$4 sm:$0xff]  }
 0x18a   :  { %2445 = vmatpush1.bf16.msra.mxu0 %v6684_v43  ;;  %v6723_v43 = vld [vmem:[#allocation5 + $0x1a0] ss:$8 sps:$4 sm:$0xff]  }
 0x18b   :  { %2446 = vmatprep.subr.bf16.mxu0 %v6689_v44  ;;  %v6728_v44 = vld [vmem:[#allocation5 + $0x1b4] ss:$8 sps:$4 sm:$0xff]  }
 0x18e   :  { %2447 = vmatpush1.bf16.msra.mxu0 %v6687_v45  ;;  %v6726_v45 = vld [vmem:[#allocation5 + $0x1b0] ss:$8 sps:$4 sm:$0xff]  }
 0x18f   :  { %2448 = vmatprep.subr.bf16.mxu0 %v6692_v46  ;;  %v6731_v46 = vld [vmem:[#allocation5 + $0x1c4] ss:$8 sps:$4 sm:$0xff]  }
 0x192   :  { %2449 = vmatpush1.bf16.msra.mxu0 %v6690_v47  ;;  %v6729_v47 = vld [vmem:[#allocation5 + $0x1c0] ss:$8 sps:$4 sm:$0xff]  }
 0x193   :  { %2459 = vmatprep.subr.bf16.mxu0 %v6695_v48  ;;  %v7266_v48 = vsub.s32 2, %v7241_v62 }
 0x195   :  { %v397_v51 = vrot.slane %v7249_v0, %v7266_v48  ;;  %v6756_v0 = vld [vmem:[%s7427_s5 + $0x38] sm:$0xff]  }
 0x196   :  { %6162 = vmatpush3.bf16.msra.mxu1 %v6756_v0  ;;  %v6776_v0 = vld [vmem:[#allocation7] ss:$16 sps:$4 sm:$0xff]  }
 0x228   :  { %v1843_v6 = vpop.f32.mrb[0].mxu0  ;;  %v7263_v7 = vpop.f32.mrb[0].mxu1 }
 0x229   :  { %v6191_v8 = vadd.f32 %v1843_v6, %v389_v3  ;;  %v1845_v9 = vpop.f32.mrb[1].mxu0  ;;  %v2009_v10 = vpop.f32.mrb[1].mxu1  ;;  %v6193_v54 = vadd.f32 %v7263_v7, %v397_v51  ;;  %v6757_v3 = vld [vmem:[%s7429_s7 + $0x40] sm:$0xff]  }
 0x22a   :  { %v6192_v11 = vadd.f32 %v1845_v9, %v393_v4  ;;  %v6194_v12 = vadd.f32 %v2009_v10, %v401_v5  ;;  %v1847_v13 = vpop.f32.mrb[2].mxu0  ;;  %v2011_v14 = vpop.f32.mrb[2].mxu1  ;;  %6169 = vmatprep.subr.bf16.mxu1 %v6757_v3  ;;  %v2086_v4 = vld [vmem:[%s7426_s4] sm:$0x3] }
 0x22b   :  { %v2014_v15 = vmax.f32 %v6191_v8, 0.0  ;;  %v1848_v16 = vpop.f32.mrb[3].mxu0  ;;  %v2012_v17 = vpop.f32.mrb[3].mxu1  ;;  %v2016_v57 = vmax.f32 %v6193_v54, 0.0  ;;  %v2091_v5 = vrot.slane %v2086_v4, %v7244_v63  ;;  %v2095_v6 = vrot.slane %v2086_v4, %v7252_v1  ;;  %v2856_v54 = vld [vmem:[%s7437_s15] sm:$0xff] }
 0x22c   :  { %v2015_v18 = vmax.f32 %v6192_v11, 0.0  ;;  %v2017_v19 = vmax.f32 %v6194_v12, 0.0  ;;  %v6758_v16 = vld [vmem:[%s7429_s7] sm:$0xff]  }
 0x22d   :  { %v2018_v22 = vpack.c.bf16 %v2014_v15, %v2014_v15  ;;  %v2020_v58 = vpack.c.bf16 %v2016_v57, %v2016_v57 }
 0x22e   :  { %v2019_v20 = vpack.c.bf16 %v2015_v18, %v2015_v18  ;;  %v2021_v24 = vpack.c.bf16 %v2017_v19, %v2017_v19  ;;  %v6759_v18 = vld [vmem:[%s7429_s7 + $0x48] sm:$0xff]  }
 0x22f   :  { %v6760_v19 = vld [vmem:[%s7429_s7 + $0x8] sm:$0xff]  }
 0x230   :  { %2450 = vmatprep.mubr.bf16.mxu0 %v2019_v20  ;;  %v6761_v20 = vld [vmem:[%s7429_s7 + $0x50] sm:$0xff]  }
 0x231   :  { %2451 = vmatmul.mubr.bf16.vlgmr.msra.gmra.mrb[4].mxu0 %v2018_v22  ;;  %v6763_v22 = vld [vmem:[%s7429_s7 + $0x58] sm:$0xff]  }
 0x232   :  { %2460 = vmatpush1.bf16.msra.mxu0 %v6693_v21  ;;  %2491 = vmatprep.mubr.bf16.mxu0 %v2021_v24  ;;  %v6762_v21 = vld [vmem:[%s7429_s7 + $0x10] sm:$0xff]   ;;  %v6765_v24 = vld [vmem:[%s7429_s7 + $0x60] sm:$0xff]  }
 0x233   :  { %2461 = vmatprep.subr.bf16.mxu0 %v6698_v23  ;;  %v6764_v23 = vld [vmem:[%s7429_s7 + $0x18] sm:$0xff]  }
 0x236   :  { %2462 = vmatpush1.bf16.msra.mxu0 %v6696_v25  ;;  %v6766_v25 = vld [vmem:[%s7429_s7 + $0x20] sm:$0xff]  }
 0x237   :  { %2463 = vmatprep.subr.bf16.mxu0 %v6701_v26  ;;  %v6767_v26 = vld [vmem:[%s7429_s7 + $0x68] sm:$0xff]  }
 0x23a   :  { %2464 = vmatpush1.bf16.msra.mxu0 %v6699_v27  ;;  %v6768_v27 = vld [vmem:[%s7429_s7 + $0x28] sm:$0xff]  }
 0x23b   :  { %2465 = vmatprep.subr.bf16.mxu0 %v6704_v28  ;;  %v6769_v28 = vld [vmem:[%s7429_s7 + $0x70] sm:$0xff]  }
 0x23e   :  { %2466 = vmatpush1.bf16.msra.mxu0 %v6702_v29  ;;  %v6770_v29 = vld [vmem:[%s7429_s7 + $0x30] sm:$0xff]  }
 0x23f   :  { %2467 = vmatprep.subr.bf16.mxu0 %v6707_v30  ;;  %v6771_v30 = vld [vmem:[%s7429_s7 + $0x78] sm:$0xff]  }
 0x242   :  { %2468 = vmatpush1.bf16.msra.mxu0 %v6705_v31  ;;  %v6772_v31 = vld [vmem:[%s7429_s7 + $0x38] sm:$0xff]  }
 0x243   :  { %2469 = vmatprep.subr.bf16.mxu0 %v6710_v32  ;;  %v6775_v32 = vld [vmem:[%s7431_s9 + $0x4] ss:$8 sps:$4 sm:$0xff]  }
 0x246   :  { %2470 = vmatpush1.bf16.msra.mxu0 %v6708_v33  ;;  %v6773_v33 = vld [vmem:[%s7431_s9] ss:$8 sps:$4 sm:$0xff]  }
 0x247   :  { %2471 = vmatprep.subr.bf16.mxu0 %v6713_v34  ;;  %v7034_v34 = vmov 0  }
 0x24a   :  { %2472 = vmatpush1.bf16.msra.mxu0 %v6711_v35  ;;  %v6778_v35 = vld [vmem:[#allocation7 + $0x4] ss:$16 sps:$4 sm:$0xff]  }
 0x24b   :  { %2473 = vmatprep.subr.bf16.mxu0 %v6716_v36  ;;  %v6779_v36 = vld [vmem:[#allocation7 + $0x8] ss:$16 sps:$4 sm:$0xff]  }
 0x24e   :  { %2474 = vmatpush1.bf16.msra.mxu0 %v6714_v37  ;;  %v6781_v37 = vld [vmem:[#allocation7 + $0xc] ss:$16 sps:$4 sm:$0xff]  }
 0x24f   :  { %2475 = vmatprep.subr.bf16.mxu0 %v6719_v38 }
 0x252   :  { %2476 = vmatpush1.bf16.msra.mxu0 %v6717_v39 }
 0x253   :  { %2477 = vmatprep.subr.bf16.mxu0 %v6722_v40 }
 0x256   :  { %2478 = vmatpush1.bf16.msra.mxu0 %v6720_v41 }
 0x257   :  { %2479 = vmatprep.subr.bf16.mxu0 %v6725_v42 }
 0x25a   :  { %2480 = vmatpush1.bf16.msra.mxu0 %v6723_v43  ;;  %v5773_v43 = vld [vmem:[%s7428_s6] ss:$0 sm:$0xff] }
 0x25b   :  { %2481 = vmatprep.subr.bf16.mxu0 %v6728_v44 }
 0x25e   :  { %2482 = vmatpush1.bf16.msra.mxu0 %v6726_v45 }
 0x25f   :  { %2483 = vmatprep.subr.bf16.mxu0 %v6731_v46  ;;  %v5790_v46 = vld [vmem:[%s7430_s8] ss:$0 sm:$0xff] }
 0x262   :  { %2484 = vmatpush1.bf16.msra.mxu0 %v6729_v47 }
 0x263   :  { %2485 = vmatprep.subr.bf16.mxu0 %v6734_v49 }
 0x266   :  { %2486 = vmatpush1.bf16.msra.mxu0 %v6732_v50 }
 0x267   :  { %2487 = vmatprep.subr.bf16.mxu0 %v6737_v52 }
 0x26a   :  { %2488 = vmatpush1.bf16.msra.mxu0 %v6735_v53 }
 0x26b   :  { %2489 = vmatprep.subr.bf16.mxu0 %v6740_v55 }
 0x26e   :  { %2490 = vmatpush1.bf16.msra.mxu0 %v6738_v56 }
 0x26f   :  { %3393 = vmatprep.subr.bf16.mxu0 %v6781_v37  ;;  %v6826_v37 = vld [vmem:[#allocation7 + $0x104] ss:$16 sps:$4 sm:$0xff]  }
 0x271   :  { %2492 = vmatmul.mubr.bf16.vlgmr.msra.gmra.mrb[4].mxu0 %v2020_v58 }
 0x272   :  { %3394 = vmatpush1.bf16.msra.mxu0 %v6779_v36  ;;  %v6821_v36 = vld [vmem:[#allocation7 + $0xe8] ss:$16 sps:$4 sm:$0xff]  }
 0x344   :  { %v2493_v7 = vpop.f32.mrb[4].mxu0 }
 0x345   :  { %v6195_v8 = vadd.f32 %v2493_v7, %v2091_v5  ;;  %v2495_v9 = vpop.f32.mrb[5].mxu0 }
 0x346   :  { %v6196_v10 = vadd.f32 %v2495_v9, %v2095_v6  ;;  %v2497_v11 = vpop.f32.mrb[6].mxu0  ;;  %v6782_v9 = vld [vmem:[#allocation7 + $0x20] ss:$16 sps:$4 sm:$0xff]  }
 0x347   :  { %v2500_v12 = vmax.f32 %v6195_v8, 0.0  ;;  %v2498_v13 = vpop.f32.mrb[7].mxu0  ;;  %v6785_v11 = vld [vmem:[#allocation7 + $0x28] ss:$16 sps:$4 sm:$0xff]  }
 0x348   :  { %v2501_v14 = vmax.f32 %v6196_v10, 0.0  ;;  %v6784_v10 = vld [vmem:[#allocation7 + $0x24] ss:$16 sps:$4 sm:$0xff]  }
 0x349   :  { %v2502_v17 = vpack.c.bf16 %v2500_v12, %v2500_v12  ;;  %v6787_v12 = vld [vmem:[#allocation7 + $0x2c] ss:$16 sps:$4 sm:$0xff]   ;;  %v6790_v13 = vld [vmem:[#allocation7 + $0x44] ss:$16 sps:$4 sm:$0xff]  }
 0x34a   :  { %v2503_v15 = vpack.c.bf16 %v2501_v14, %v2501_v14  ;;  %v6793_v14 = vld [vmem:[#allocation7 + $0x4c] ss:$16 sps:$4 sm:$0xff]   ;;  %3395 = vmatprep.subr.bf16.mxu0 %v6787_v12 }
 0x34b   :  { %3396 = vmatpush1.bf16.msra.mxu0 %v6785_v11  ;;  %v3446_v11 = vld [vmem:[#allocation8 + $0x20] sm:$0xff]  ;;  %v3443_v12 = vld [vmem:[#allocation8 + $0x8] sm:$0xff] }
 0x34c   :  { %2671 = vmatprep.mubr.bf16.mxu1 %v2503_v15  ;;  %3397 = vmatprep.subr.bf16.mxu0 %v6793_v14 }
 0x34d   :  { %2672 = vmatmul.mubr.bf16.vlgmr.msra.gmra.mrb[4].mxu1 %v2502_v17 }
 0x34e   :  { %6170 = vmatpush3.bf16.msra.mxu1 %v6758_v16  ;;  %2847 = vmatprep.mubr.bf16.mxu1 %v2503_v15  ;;  %v6788_v15 = vld [vmem:[#allocation7 + $0x40] ss:$16 sps:$4 sm:$0xff]   ;;  %v6791_v16 = vld [vmem:[#allocation7 + $0x48] ss:$16 sps:$4 sm:$0xff]  }
 0x34f   :  { %6171 = vmatprep.subr.bf16.mxu1 %v6759_v18  ;;  %v6799_v18 = vld [vmem:[#allocation7 + $0x6c] ss:$16 sps:$4 sm:$0xff]   ;;  %3398 = vmatpush1.bf16.msra.mxu0 %v6791_v16 }
 0x350   :  { %3399 = vmatprep.subr.bf16.mxu0 %v6799_v18 }
 0x352   :  { %6172 = vmatpush3.bf16.msra.mxu1 %v6760_v19  ;;  %v6794_v19 = vld [vmem:[#allocation7 + $0x60] ss:$16 sps:$4 sm:$0xff]  }
 0x353   :  { %6173 = vmatprep.subr.bf16.mxu1 %v6761_v20  ;;  %v6797_v20 = vld [vmem:[#allocation7 + $0x68] ss:$16 sps:$4 sm:$0xff]  }
 0x354   :  { %3400 = vmatpush1.bf16.msra.mxu0 %v6797_v20 }
 0x356   :  { %6174 = vmatpush3.bf16.msra.mxu1 %v6762_v21  ;;  %v6802_v21 = vld [vmem:[#allocation7 + $0x84] ss:$16 sps:$4 sm:$0xff]  }
 0x357   :  { %6175 = vmatprep.subr.bf16.mxu1 %v6763_v22  ;;  %v6805_v22 = vld [vmem:[#allocation7 + $0x8c] ss:$16 sps:$4 sm:$0xff]  }
 0x358   :  { %3401 = vmatprep.subr.bf16.mxu0 %v6805_v22 }
 0x35a   :  { %6176 = vmatpush3.bf16.msra.mxu1 %v6764_v23  ;;  %v6800_v23 = vld [vmem:[#allocation7 + $0x80] ss:$16 sps:$4 sm:$0xff]  }
 0x35b   :  { %6177 = vmatprep.subr.bf16.mxu1 %v6765_v24  ;;  %v6803_v24 = vld [vmem:[#allocation7 + $0x88] ss:$16 sps:$4 sm:$0xff]  }
 0x35c   :  { %3402 = vmatpush1.bf16.msra.mxu0 %v6803_v24 }
 0x35e   :  { %6178 = vmatpush3.bf16.msra.mxu1 %v6766_v25  ;;  %v6808_v25 = vld [vmem:[#allocation7 + $0xa4] ss:$16 sps:$4 sm:$0xff]  }
 0x35f   :  { %6179 = vmatprep.subr.bf16.mxu1 %v6767_v26  ;;  %v6811_v26 = vld [vmem:[#allocation7 + $0xac] ss:$16 sps:$4 sm:$0xff]  }
 0x360   :  { %3403 = vmatprep.subr.bf16.mxu0 %v6811_v26 }
 0x362   :  { %6180 = vmatpush3.bf16.msra.mxu1 %v6768_v27  ;;  %v6806_v27 = vld [vmem:[#allocation7 + $0xa0] ss:$16 sps:$4 sm:$0xff]  }
 0x363   :  { %6181 = vmatprep.subr.bf16.mxu1 %v6769_v28  ;;  %v6809_v28 = vld [vmem:[#allocation7 + $0xa8] ss:$16 sps:$4 sm:$0xff]  }
 0x364   :  { %3404 = vmatpush1.bf16.msra.mxu0 %v6809_v28 }
 0x366   :  { %6182 = vmatpush3.bf16.msra.mxu1 %v6770_v29  ;;  %v6814_v29 = vld [vmem:[#allocation7 + $0xc4] ss:$16 sps:$4 sm:$0xff]  }
 0x367   :  { %6183 = vmatprep.subr.bf16.mxu1 %v6771_v30  ;;  %v6817_v30 = vld [vmem:[#allocation7 + $0xcc] ss:$16 sps:$4 sm:$0xff]  }
 0x368   :  { %3405 = vmatprep.subr.bf16.mxu0 %v6817_v30 }
 0x36a   :  { %6184 = vmatpush3.bf16.msra.mxu1 %v6772_v31  ;;  %v6812_v31 = vld [vmem:[#allocation7 + $0xc0] ss:$16 sps:$4 sm:$0xff]  }
 0x36b   :  { %2901 = vmatprep.subr.bf16.mxu1 %v6775_v32  ;;  %v6815_v32 = vld [vmem:[#allocation7 + $0xc8] ss:$16 sps:$4 sm:$0xff]  }
 0x36c   :  { %3406 = vmatpush1.bf16.msra.mxu0 %v6815_v32  ;;  %v3451_v32 = vld [vmem:[#allocation8 + $0x48] sm:$0xff] }
 0x36d   :  { %2848 = vmatmul.mubr.bf16.vlgmr.msra.gmra.mrb[8].mxu1 %v2502_v17  ;;  %v6796_v17 = vld [vmem:[#allocation7 + $0x64] ss:$16 sps:$4 sm:$0xff]  }
 0x36e   :  { %2902 = vmatpush1.bf16.msra.mxu1 %v6773_v33  ;;  %2933 = vmatprep.mubr.bf16.mxu1 %v7034_v34  ;;  %v6820_v33 = vld [vmem:[#allocation7 + $0xe4] ss:$16 sps:$4 sm:$0xff]   ;;  %v6823_v34 = vld [vmem:[#allocation7 + $0xec] ss:$16 sps:$4 sm:$0xff]  }
 0x36f   :  { %3352 = vmatprep.subr.bf16.mxu1 %v6778_v35  ;;  %v6818_v35 = vld [vmem:[#allocation7 + $0xe0] ss:$16 sps:$4 sm:$0xff]   ;;  %3407 = vmatprep.subr.bf16.mxu0 %v6823_v34 }
 0x370   :  { %3408 = vmatpush1.bf16.msra.mxu0 %v6821_v36 }
 0x420   :  { %v6163_v38 = vpop.f32.mrb[4].mxu1 }
 0x421   :  { %v6164_v39 = vpop.f32.mrb[5].mxu1 }
 0x422   :  { %v6165_v40 = vadd.f32 %v6164_v39, %v6163_v38  ;;  %v6166_v41 = vpop.f32.mrb[6].mxu1  ;;  %v6829_v38 = vld [vmem:[#allocation7 + $0x10c] ss:$16 sps:$4 sm:$0xff]   ;;  %v6824_v39 = vld [vmem:[#allocation7 + $0x100] ss:$16 sps:$4 sm:$0xff]  }
 0x423   :  { %v6167_v42 = vpop.f32.mrb[7].mxu1  ;;  %v6832_v41 = vld [vmem:[#allocation7 + $0x124] ss:$16 sps:$4 sm:$0xff]   ;;  %3409 = vmatprep.subr.bf16.mxu0 %v6829_v38 }
 0x424   :  { %v2674_v44 = vadd.f32 %v6165_v40, %v5773_v43  ;;  %v6827_v40 = vld [vmem:[#allocation7 + $0x108] ss:$16 sps:$4 sm:$0xff]   ;;  %v6835_v42 = vld [vmem:[#allocation7 + $0x12c] ss:$16 sps:$4 sm:$0xff]   ;;  %v6830_v43 = vld [vmem:[#allocation7 + $0x120] ss:$16 sps:$4 sm:$0xff]  }
 0x425   :  { %3410 = vmatpush1.bf16.msra.mxu0 %v6827_v40  ;;  %v3458_v38 = vld [vmem:[#allocation8 + $0x80] sm:$0xff]  ;;  %v3459_v40 = vld [vmem:[#allocation8 + $0x88] sm:$0xff] }
 0x426   :  { %v2679_v52 = vmax.f32 %v2674_v44, 0.0  ;;  %v6833_v44 = vld [vmem:[#allocation7 + $0x128] ss:$16 sps:$4 sm:$0xff]   ;;  %3411 = vmatprep.subr.bf16.mxu0 %v6835_v42 }
 0x428   :  { %v2860_v56 = vmul.f32 %v2679_v52, %v2679_v52 }
 0x429   :  { %3412 = vmatpush1.bf16.msra.mxu0 %v6833_v44 }
 0x440   :  { %v6185_v45 = vpop.f32.mrb[8].mxu1 }
 0x441   :  { %v6186_v47 = vpop.f32.mrb[9].mxu1 }
 0x442   :  { %v6187_v49 = vadd.f32 %v6186_v47, %v6185_v45  ;;  %v6188_v50 = vpop.f32.mrb[10].mxu1  ;;  %v6838_v45 = vld [vmem:[#allocation7 + $0x144] ss:$16 sps:$4 sm:$0xff]   ;;  %v6836_v47 = vld [vmem:[#allocation7 + $0x140] ss:$16 sps:$4 sm:$0xff]  }
 0x443   :  { %v6189_v51 = vpop.f32.mrb[11].mxu1  ;;  %v6844_v50 = vld [vmem:[#allocation7 + $0x164] ss:$16 sps:$4 sm:$0xff]  }
 0x444   :  { %v2850_v53 = vadd.f32 %v6187_v49, %v5790_v46  ;;  %v6841_v46 = vld [vmem:[#allocation7 + $0x14c] ss:$16 sps:$4 sm:$0xff]   ;;  %v6839_v49 = vld [vmem:[#allocation7 + $0x148] ss:$16 sps:$4 sm:$0xff]  }
 0x445   :  { %3413 = vmatprep.subr.bf16.mxu0 %v6841_v46  ;;  %v6847_v51 = vld [vmem:[#allocation7 + $0x16c] ss:$16 sps:$4 sm:$0xff]   ;;  %v3466_v46 = vld [vmem:[#allocation8 + $0xc0] sm:$0xff] }
 0x446   :  { %v2855_v55 = vmax.f32 %v2850_v53, 0.0  ;;  %3414 = vmatpush1.bf16.msra.mxu0 %v6839_v49  ;;  %v6845_v53 = vld [vmem:[#allocation7 + $0x168] ss:$16 sps:$4 sm:$0xff]  }
 0x447   :  { %3415 = vmatprep.subr.bf16.mxu0 %v6847_v51  ;;  %v3467_v49 = vld [vmem:[#allocation8 + $0xc8] sm:$0xff] }
 0x448   :  { %v2857_v57 = vmul.f32 %v2856_v54, %v2855_v55  ;;  %v2859_v58 = vmul.f32 %v2855_v55, %v2855_v55  ;;  %v6850_v54 = vld [vmem:[#allocation7 + $0x184] ss:$16 sps:$4 sm:$0xff]   ;;  %v6853_v55 = vld [vmem:[#allocation7 + $0x18c] ss:$16 sps:$4 sm:$0xff]  }
 0x44a   :  { %v2858_v59 = vadd.f32 %v2857_v57, %v2679_v52  ;;  %v2862_v60 = vadd.f32 1e-08, %v2859_v58  ;;  %v2861_v61 = vadd.f32 %v2860_v56, %v2859_v58  ;;  %v6842_v52 = vld [vmem:[#allocation7 + $0x160] ss:$16 sps:$4 sm:$0xff]   ;;  %3416 = vmatpush1.bf16.msra.mxu0 %v6845_v53  ;;  %v6851_v57 = vld [vmem:[#allocation7 + $0x188] ss:$16 sps:$4 sm:$0xff]  }
 0x44b   :  { %v6848_v56 = vld [vmem:[#allocation7 + $0x180] ss:$16 sps:$4 sm:$0xff]   ;;  %v6856_v58 = vld [vmem:[#allocation7 + $0x1a4] ss:$16 sps:$4 sm:$0xff]   ;;  %3417 = vmatprep.subr.bf16.mxu0 %v6853_v55 }
 0x44c   :  { %v2873_v3 = vpack.c.bf16 %v2858_v59, %v2858_v59  ;;  %6872 = vlog2.f32 %v2862_v60  ;;  %v6859_v59 = vld [vmem:[#allocation7 + $0x1ac] ss:$16 sps:$4 sm:$0xff]   ;;  %v6854_v60 = vld [vmem:[#allocation7 + $0x1a0] ss:$16 sps:$4 sm:$0xff]  }
 0x44d   :  { %v3474_v55 = vld [vmem:[#allocation8 + $0x100] sm:$0xff] }
 0x44e   :  { %5810 = vmatmul.mubr.msk.bf16.vlgmr.msra.gmra.mrb[12].mxu1 %vm2867_vm0, %v2873_v3  ;;  %3418 = vmatpush1.bf16.msra.mxu0 %v6851_v57  ;;  %v6865_v3 = vld [vmem:[#allocation7 + $0x1cc] ss:$16 sps:$4 sm:$0xff]  }
 0x44f   :  { %3353 = vmatpush1.bf16.msra.mxu1 %v6776_v0  ;;  %3419 = vmatprep.subr.bf16.mxu0 %v6859_v59  ;;  %v6862_v0 = vld [vmem:[#allocation7 + $0x1c4] ss:$16 sps:$4 sm:$0xff]   ;;  %v3475_v57 = vld [vmem:[#allocation8 + $0x108] sm:$0xff] }
 0x450   :  { %3354 = vmatprep.subr.bf16.mxu1 %v6784_v10  ;;  %v3442_v10 = vld [vmem:[#allocation8] sm:$0xff] }
 0x451   :  { %v5876_v14 = vcombine.high %v3442_v10, %v3446_v11 }
 0x453   :  { %3355 = vmatpush1.bf16.msra.mxu1 %v6782_v9  ;;  %v6869_v9 = vld [vmem:[#allocation7 + $0x1e8] ss:$16 sps:$4 sm:$0xff]  }
 0x454   :  { %3356 = vmatprep.subr.bf16.mxu1 %v6790_v13  ;;  %v5875_v13 = vcombine.low %v3442_v10, %v3446_v11  ;;  %v3490_v11 = vld [vmem:[#allocation8 + $0x180] sm:$0xff] }
 0x456   :  { %v6873_v4 = vpop.eup %6872 }
 0x457   :  { %v2864_v5 = vmul.f32 0.6931472, %v6873_v4  ;;  %3357 = vmatpush1.bf16.msra.mxu1 %v6788_v15  ;;  %v6860_v4 = vld [vmem:[#allocation7 + $0x1c0] ss:$16 sps:$4 sm:$0xff]   ;;  %v3447_v15 = vld [vmem:[#allocation8 + $0x28] sm:$0xff] }
 0x458   :  { %3358 = vmatprep.subr.bf16.mxu1 %v6796_v17  ;;  %v5877_v16 = vcombine.low %v3443_v12, %v3447_v15  ;;  %v5878_v17 = vcombine.high %v3443_v12, %v3447_v15  ;;  %v3494_v12 = vld [vmem:[#allocation8 + $0x1a0] sm:$0xff] }
 0x459   :  { %v2865_v6 = vsub.f32 %v2861_v61, %v2864_v5  ;;  %v6857_v61 = vld [vmem:[#allocation7 + $0x1a8] ss:$16 sps:$4 sm:$0xff]  }
 0x45a   :  { %3420 = vmatpush1.bf16.msra.mxu0 %v6857_v61  ;;  %v6863_v5 = vld [vmem:[#allocation7 + $0x1c8] ss:$16 sps:$4 sm:$0xff]  }
 0x45b   :  { %v5807_v7 = vadd.f32 -1.0, %v2865_v6  ;;  %3359 = vmatpush1.bf16.msra.mxu1 %v6794_v19  ;;  %3421 = vmatprep.subr.bf16.mxu0 %v6865_v3  ;;  %v6868_v6 = vld [vmem:[#allocation7 + $0x1e4] ss:$16 sps:$4 sm:$0xff]   ;;  %v2876_v19 = vld [vmem:[%s7432_s10] sm:$0x3] }
 0x45c   :  { %3360 = vmatprep.subr.bf16.mxu1 %v6802_v21  ;;  %v2881_v20 = vrot.slane %v2876_v19, %v7244_v63  ;;  %v2885_v21 = vrot.slane %v2876_v19, %v7252_v1  ;;  %v3482_v3 = vld [vmem:[#allocation8 + $0x140] sm:$0xff] }
 0x45d   :  { %v2868_v8 = vsel %vm2867_vm0, %v5807_v7, 0.0  ;;  %v6871_v7 = vld [vmem:[#allocation7 + $0x1ec] ss:$16 sps:$4 sm:$0xff]   ;;  %v3498_v19 = vld [vmem:[#allocation8 + $0x1c0] sm:$0xff] }
 0x45e   :  { %2869 = vadd.xlane.f32.xlu0 %v2868_v8  ;;  %3422 = vmatpush1.bf16.msra.mxu0 %v6863_v5  ;;  %v6866_v8 = vld [vmem:[#allocation7 + $0x1e0] ss:$16 sps:$4 sm:$0xff]   ;;  %v3483_v5 = vld [vmem:[#allocation8 + $0x148] sm:$0xff] }
 0x45f   :  { %3361 = vmatpush1.bf16.msra.mxu1 %v6800_v23  ;;  %3423 = vmatprep.subr.bf16.mxu0 %v6871_v7 }
 0x460   :  { %3362 = vmatprep.subr.bf16.mxu1 %v6808_v25 }
 0x462   :  { %3424 = vmatpush1.bf16.msra.mxu0 %v6869_v9 }
 0x463   :  { %3363 = vmatpush1.bf16.msra.mxu1 %v6806_v27  ;;  %5102 = vmatprep.subr.bf16.mxu0 %v5878_v17  ;;  %v5924_v17 = vcombine.high %v3490_v11, %v3494_v12 }
 0x464   :  { %3364 = vmatprep.subr.bf16.mxu1 %v6814_v29  ;;  %v3450_v29 = vld [vmem:[#allocation8 + $0x40] sm:$0xff] }
 0x467   :  { %3365 = vmatpush1.bf16.msra.mxu1 %v6812_v31  ;;  %v3454_v31 = vld [vmem:[#allocation8 + $0x60] sm:$0xff] }
 0x468   :  { %3366 = vmatprep.subr.bf16.mxu1 %v6820_v33  ;;  %v3455_v33 = vld [vmem:[#allocation8 + $0x68] sm:$0xff]  ;;  %v5884_v36 = vcombine.high %v3450_v29, %v3454_v31  ;;  %v5883_v42 = vcombine.low %v3450_v29, %v3454_v31 }
 0x469   :  { %v3507_v29 = vld [vmem:[#allocation8 + $0x208] sm:$0xff] }
 0x46b   :  { %3367 = vmatpush1.bf16.msra.mxu1 %v6818_v35 }
 0x46c   :  { %3368 = vmatprep.subr.bf16.mxu1 %v6826_v37  ;;  %v5886_v37 = vcombine.high %v3451_v32, %v3455_v33 }
 0x46f   :  { %3369 = vmatpush1.bf16.msra.mxu1 %v6824_v39  ;;  %v3462_v39 = vld [vmem:[#allocation8 + $0xa0] sm:$0xff] }
 0x470   :  { %3370 = vmatprep.subr.bf16.mxu1 %v6832_v41  ;;  %v3463_v41 = vld [vmem:[#allocation8 + $0xa8] sm:$0xff]  ;;  %v5892_v44 = vcombine.high %v3458_v38, %v3462_v39  ;;  %v5891_v51 = vcombine.low %v3458_v38, %v3462_v39 }
 0x471   :  { %v3519_v38 = vld [vmem:[#allocation8 + $0x268] sm:$0xff] }
 0x473   :  { %3371 = vmatpush1.bf16.msra.mxu1 %v6830_v43  ;;  %v5885_v43 = vcombine.low %v3451_v32, %v3455_v33 }
 0x474   :  { %3372 = vmatprep.subr.bf16.mxu1 %v6838_v45  ;;  %v5894_v45 = vcombine.high %v3459_v40, %v3463_v41 }
 0x477   :  { %3373 = vmatpush1.bf16.msra.mxu1 %v6836_v47  ;;  %v3470_v47 = vld [vmem:[#allocation8 + $0xe0] sm:$0xff] }
 0x478   :  { %3374 = vmatprep.subr.bf16.mxu1 %v6844_v50  ;;  %v3471_v50 = vld [vmem:[#allocation8 + $0xe8] sm:$0xff]  ;;  %v5900_v53 = vcombine.high %v3466_v46, %v3470_v47  ;;  %v5899_v59 = vcombine.low %v3466_v46, %v3470_v47 }
 0x479   :  { %v3527_v46 = vld [vmem:[#allocation8 + $0x2a8] sm:$0xff] }
 0x47b   :  { %3375 = vmatpush1.bf16.msra.mxu1 %v6842_v52  ;;  %v5893_v52 = vcombine.low %v3459_v40, %v3463_v41 }
 0x47c   :  { %3376 = vmatprep.subr.bf16.mxu1 %v6850_v54  ;;  %v5902_v54 = vcombine.high %v3467_v49, %v3471_v50 }
 0x47f   :  { %3377 = vmatpush1.bf16.msra.mxu1 %v6848_v56  ;;  %v3478_v56 = vld [vmem:[#allocation8 + $0x120] sm:$0xff] }
 0x480   :  { %3378 = vmatprep.subr.bf16.mxu1 %v6856_v58  ;;  %v3479_v58 = vld [vmem:[#allocation8 + $0x128] sm:$0xff]  ;;  %v5908_v61 = vcombine.high %v3474_v55, %v3478_v56  ;;  %v5907_v7 = vcombine.low %v3474_v55, %v3478_v56 }
 0x481   :  { %v3535_v55 = vld [vmem:[#allocation8 + $0x2e8] sm:$0xff] }
 0x483   :  { %3379 = vmatpush1.bf16.msra.mxu1 %v6854_v60  ;;  %v5901_v60 = vcombine.low %v3467_v49, %v3471_v50 }
 0x484   :  { %3380 = vmatprep.subr.bf16.mxu1 %v6862_v0  ;;  %v5910_v0 = vcombine.high %v3475_v57, %v3479_v58 }
 0x487   :  { %3381 = vmatpush1.bf16.msra.mxu1 %v6860_v4  ;;  %v3486_v4 = vld [vmem:[#allocation8 + $0x160] sm:$0xff] }
 0x488   :  { %3382 = vmatprep.subr.bf16.mxu1 %v6868_v6  ;;  %v3487_v6 = vld [vmem:[#allocation8 + $0x168] sm:$0xff]  ;;  %v5916_v9 = vcombine.high %v3482_v3, %v3486_v4  ;;  %v5915_v15 = vcombine.low %v3482_v3, %v3486_v4 }
 0x489   :  { %v5918_v10 = vcombine.high %v3483_v5, %v3487_v6  ;;  %v3543_v3 = vld [vmem:[#allocation8 + $0x328] sm:$0xff] }
 0x48b   :  { %3383 = vmatpush1.bf16.msra.mxu1 %v6866_v8  ;;  %v5909_v8 = vcombine.low %v3475_v57, %v3479_v58 }
 0x48c   :  { %5020 = vmatprep.subr.bf16.mxu1 %v5876_v14  ;;  %v3495_v14 = vld [vmem:[#allocation8 + $0x1a8] sm:$0xff] }
 0x4eb   :  { %v2870_v18 = vpop.xlane.xlu0 %2869 }
 0x4ec   :  { %2872 = vst.msk [vmem:[%s7439_s17] sm:$0xff] %vm2871_vm1, %v2870_v18 }
 0x521   :  { %v2935_v22 = vpop.f32.mrb[12].mxu1 }
 0x522   :  { %v2936_v23 = vadd.f32 %v2935_v22, %v2881_v20  ;;  %v2937_v24 = vpop.f32.mrb[13].mxu1  ;;  %v3502_v20 = vld [vmem:[#allocation8 + $0x1e0] sm:$0xff]  ;;  %v3503_v22 = vld [vmem:[#allocation8 + $0x1e8] sm:$0xff] }
 0x523   :  { %v2938_v25 = vadd.f32 %v2937_v24, %v2885_v21  ;;  %v2939_v26 = vpop.f32.mrb[14].mxu1  ;;  %v3499_v21 = vld [vmem:[#allocation8 + $0x1c8] sm:$0xff]  ;;  %v5931_v31 = vcombine.low %v3498_v19, %v3502_v20 }
 0x524   :  { %v2942_v27 = vmax.f32 %v2936_v23, 0.0  ;;  %v2940_v28 = vpop.f32.mrb[15].mxu1  ;;  %v5923_v23 = vcombine.low %v3490_v11, %v3494_v12  ;;  %v5934_v26 = vcombine.high %v3499_v21, %v3503_v22  ;;  %v5933_v32 = vcombine.low %v3499_v21, %v3503_v22  ;;  %v3551_v11 = vld [vmem:[#allocation8 + $0x368] sm:$0xff] }
 0x525   :  { %v2943_v30 = vmax.f32 %v2938_v25, 0.0  ;;  %v5932_v25 = vcombine.high %v3498_v19, %v3502_v20  ;;  %v3510_v28 = vld [vmem:[#allocation8 + $0x220] sm:$0xff]  ;;  %v3555_v20 = vld [vmem:[#allocation8 + $0x388] sm:$0xff] }
 0x526   :  { %v2944_v35 = vpack.c.bf16 %v2942_v27, %v2942_v27  ;;  %v3506_v27 = vld [vmem:[#allocation8 + $0x200] sm:$0xff]  ;;  %v3559_v22 = vld [vmem:[#allocation8 + $0x3a8] sm:$0xff] }
 0x527   :  { %v2945_v34 = vpack.c.bf16 %v2943_v30, %v2943_v30  ;;  %v3511_v30 = vld [vmem:[#allocation8 + $0x228] sm:$0xff]  ;;  %v5940_v33 = vcombine.high %v3506_v27, %v3510_v28  ;;  %v5939_v39 = vcombine.low %v3506_v27, %v3510_v28  ;;  %v3558_v19 = vld [vmem:[#allocation8 + $0x3a0] sm:$0xff] }
 0x528   :  { %v5941_v40 = vcombine.low %v3507_v29, %v3511_v30  ;;  %v3566_v27 = vld [vmem:[#allocation8 + $0x3e0] sm:$0xff]  ;;  %v3563_v28 = vld [vmem:[#allocation8 + $0x3c8] sm:$0xff] }
 0x529   :  { %3384 = vmatprep.mubr.bf16.mxu1 %v2945_v34  ;;  %3425 = vmatprep.mubr.bf16.mxu0 %v2945_v34  ;;  %v5942_v34 = vcombine.high %v3507_v29, %v3511_v30  ;;  %v3567_v30 = vld [vmem:[#allocation8 + $0x3e8] sm:$0xff] }
 0x52a   :  { %3385 = vmatmul.mubr.bf16.vlgmr.msra.gmra.mrb[16].mxu1 %v2944_v35  ;;  %3426 = vmatmul.mubr.bf16.vlgmr.msra.gmra.mrb[8].mxu0 %v2944_v35  ;;  %v3514_v35 = vld [vmem:[#allocation8 + $0x240] sm:$0xff] }
 0x52b   :  { %5021 = vmatpush1.bf16.msra.mxu1 %v5875_v13  ;;  %5103 = vmatpush1.bf16.msra.mxu0 %v5877_v16  ;;  %v3491_v13 = vld [vmem:[#allocation8 + $0x188] sm:$0xff]  ;;  %v5917_v16 = vcombine.low %v3483_v5, %v3487_v6 }
 0x52c   :  { %5022 = vmatprep.subr.bf16.mxu1 %v5884_v36  ;;  %5104 = vmatprep.subr.bf16.mxu0 %v5886_v37  ;;  %v5926_v18 = vcombine.high %v3491_v13, %v3495_v14  ;;  %v5925_v24 = vcombine.low %v3491_v13, %v3495_v14  ;;  %v3518_v36 = vld [vmem:[#allocation8 + $0x260] sm:$0xff]  ;;  %v3515_v37 = vld [vmem:[#allocation8 + $0x248] sm:$0xff] }
 0x52d   :  { %v5948_v41 = vcombine.high %v3514_v35, %v3518_v36  ;;  %v5947_v47 = vcombine.low %v3514_v35, %v3518_v36  ;;  %v5949_v49 = vcombine.low %v3515_v37, %v3519_v38  ;;  %v3574_v35 = vld [vmem:[#allocation8 + $0x420] sm:$0xff]  ;;  %v3571_v36 = vld [vmem:[#allocation8 + $0x408] sm:$0xff] }
 0x52f   :  { %5023 = vmatpush1.bf16.msra.mxu1 %v5883_v42  ;;  %5105 = vmatpush1.bf16.msra.mxu0 %v5885_v43  ;;  %v5950_v42 = vcombine.high %v3515_v37, %v3519_v38  ;;  %v3522_v43 = vld [vmem:[#allocation8 + $0x280] sm:$0xff]  ;;  %v3575_v38 = vld [vmem:[#allocation8 + $0x428] sm:$0xff] }
 0x530   :  { %5024 = vmatprep.subr.bf16.mxu1 %v5892_v44  ;;  %5106 = vmatprep.subr.bf16.mxu0 %v5894_v45  ;;  %v3526_v44 = vld [vmem:[#allocation8 + $0x2a0] sm:$0xff]  ;;  %v3523_v45 = vld [vmem:[#allocation8 + $0x288] sm:$0xff] }
 0x531   :  { %v5956_v50 = vcombine.high %v3522_v43, %v3526_v44  ;;  %v5955_v56 = vcombine.low %v3522_v43, %v3526_v44  ;;  %v5957_v57 = vcombine.low %v3523_v45, %v3527_v46 }
 0x533   :  { %5025 = vmatpush1.bf16.msra.mxu1 %v5891_v51  ;;  %5107 = vmatpush1.bf16.msra.mxu0 %v5893_v52  ;;  %v5958_v51 = vcombine.high %v3523_v45, %v3527_v46  ;;  %v3530_v52 = vld [vmem:[#allocation8 + $0x2c0] sm:$0xff] }
 0x534   :  { %5026 = vmatprep.subr.bf16.mxu1 %v5900_v53  ;;  %5108 = vmatprep.subr.bf16.mxu0 %v5902_v54  ;;  %v3534_v53 = vld [vmem:[#allocation8 + $0x2e0] sm:$0xff]  ;;  %v3531_v54 = vld [vmem:[#allocation8 + $0x2c8] sm:$0xff] }
 0x535   :  { %v5964_v58 = vcombine.high %v3530_v52, %v3534_v53  ;;  %v5963_v4 = vcombine.low %v3530_v52, %v3534_v53  ;;  %v5965_v5 = vcombine.low %v3531_v54, %v3535_v55 }
 0x537   :  { %5027 = vmatpush1.bf16.msra.mxu1 %v5899_v59  ;;  %5109 = vmatpush1.bf16.msra.mxu0 %v5901_v60  ;;  %v5966_v59 = vcombine.high %v3531_v54, %v3535_v55  ;;  %v3538_v60 = vld [vmem:[#allocation8 + $0x300] sm:$0xff] }
 0x538   :  { %5028 = vmatprep.subr.bf16.mxu1 %v5908_v61  ;;  %5110 = vmatprep.subr.bf16.mxu0 %v5910_v0  ;;  %v3542_v61 = vld [vmem:[#allocation8 + $0x320] sm:$0xff]  ;;  %v3539_v0 = vld [vmem:[#allocation8 + $0x308] sm:$0xff] }
 0x539   :  { %v5972_v6 = vcombine.high %v3538_v60, %v3542_v61  ;;  %v5971_v12 = vcombine.low %v3538_v60, %v3542_v61  ;;  %v5973_v13 = vcombine.low %v3539_v0, %v3543_v3  ;;  %v3578_v60 = vld [vmem:[#allocation8 + $0x440] sm:$0xff] }
 0x53b   :  { %5029 = vmatpush1.bf16.msra.mxu1 %v5907_v7  ;;  %5111 = vmatpush1.bf16.msra.mxu0 %v5909_v8  ;;  %v5974_v7 = vcombine.high %v3539_v0, %v3543_v3  ;;  %v3546_v8 = vld [vmem:[#allocation8 + $0x340] sm:$0xff]  ;;  %v3579_v3 = vld [vmem:[#allocation8 + $0x448] sm:$0xff] }
 0x53c   :  { %5030 = vmatprep.subr.bf16.mxu1 %v5916_v9  ;;  %5112 = vmatprep.subr.bf16.mxu0 %v5918_v10  ;;  %v3550_v9 = vld [vmem:[#allocation8 + $0x360] sm:$0xff]  ;;  %v3547_v10 = vld [vmem:[#allocation8 + $0x348] sm:$0xff] }
 0x53d   :  { %v5980_v14 = vcombine.high %v3546_v8, %v3550_v9  ;;  %v3582_v0 = vld [vmem:[#allocation8 + $0x460] sm:$0xff] }
 0x53f   :  { %5031 = vmatpush1.bf16.msra.mxu1 %v5915_v15  ;;  %5113 = vmatpush1.bf16.msra.mxu0 %v5917_v16  ;;  %v5982_v15 = vcombine.high %v3547_v10, %v3551_v11  ;;  %v5979_v16 = vcombine.low %v3546_v8, %v3550_v9  ;;  %v6012_v8 = vcombine.high %v3578_v60, %v3582_v0 }
 0x540   :  { %5032 = vmatprep.subr.bf16.mxu1 %v5924_v17  ;;  %5114 = vmatprep.subr.bf16.mxu0 %v5926_v18  ;;  %v5981_v17 = vcombine.low %v3547_v10, %v3551_v11  ;;  %v3554_v18 = vld [vmem:[#allocation8 + $0x380] sm:$0xff]  ;;  %v3587_v11 = vld [vmem:[#allocation8 + $0x488] sm:$0xff] }
 0x541   :  { %v5988_v21 = vcombine.high %v3554_v18, %v3558_v19  ;;  %v3590_v10 = vld [vmem:[#allocation8 + $0x4a0] sm:$0xff] }
 0x543   :  { %5033 = vmatpush1.bf16.msra.mxu1 %v5923_v23  ;;  %5115 = vmatpush1.bf16.msra.mxu0 %v5925_v24  ;;  %v5987_v23 = vcombine.low %v3554_v18, %v3558_v19  ;;  %v5989_v24 = vcombine.low %v3555_v20, %v3559_v22  ;;  %v3594_v18 = vld [vmem:[#allocation8 + $0x4c0] sm:$0xff] }
 0x544   :  { %5034 = vmatprep.subr.bf16.mxu1 %v5932_v25  ;;  %5116 = vmatprep.subr.bf16.mxu0 %v5934_v26  ;;  %v5990_v25 = vcombine.high %v3555_v20, %v3559_v22  ;;  %v3562_v26 = vld [vmem:[#allocation8 + $0x3c0] sm:$0xff]  ;;  %v3595_v20 = vld [vmem:[#allocation8 + $0x4c8] sm:$0xff] }
 0x545   :  { %v5996_v29 = vcombine.high %v3562_v26, %v3566_v27  ;;  %v3598_v19 = vld [vmem:[#allocation8 + $0x4e0] sm:$0xff] }
 0x547   :  { %5035 = vmatpush1.bf16.msra.mxu1 %v5931_v31  ;;  %5117 = vmatpush1.bf16.msra.mxu0 %v5933_v32  ;;  %v5995_v31 = vcombine.low %v3562_v26, %v3566_v27  ;;  %v5997_v32 = vcombine.low %v3563_v28, %v3567_v30  ;;  %v3602_v26 = vld [vmem:[#allocation8 + $0x500] sm:$0xff] }
 0x548   :  { %5036 = vmatprep.subr.bf16.mxu1 %v5940_v33  ;;  %5118 = vmatprep.subr.bf16.mxu0 %v5942_v34  ;;  %v5998_v33 = vcombine.high %v3563_v28, %v3567_v30  ;;  %v3570_v34 = vld [vmem:[#allocation8 + $0x400] sm:$0xff]  ;;  %v3603_v28 = vld [vmem:[#allocation8 + $0x508] sm:$0xff]  ;;  %v6027_v30 = vcombine.low %v3594_v18, %v3598_v19 }
 0x549   :  { %v6004_v37 = vcombine.high %v3570_v34, %v3574_v35  ;;  %v3606_v27 = vld [vmem:[#allocation8 + $0x520] sm:$0xff] }
 0x54b   :  { %5037 = vmatpush1.bf16.msra.mxu1 %v5939_v39  ;;  %5119 = vmatpush1.bf16.msra.mxu0 %v5941_v40  ;;  %v6003_v39 = vcombine.low %v3570_v34, %v3574_v35  ;;  %v6005_v40 = vcombine.low %v3571_v36, %v3575_v38  ;;  %v3610_v34 = vld [vmem:[#allocation8 + $0x540] sm:$0xff] }
 0x54c   :  { %5038 = vmatprep.subr.bf16.mxu1 %v5948_v41  ;;  %5120 = vmatprep.subr.bf16.mxu0 %v5950_v42  ;;  %v6006_v41 = vcombine.high %v3571_v36, %v3575_v38  ;;  %v7362_v42 = vld [vmem:[%s7434_s12] sm:$0xf]  ;;  %v3611_v36 = vld [vmem:[#allocation8 + $0x548] sm:$0xff]  ;;  %v6035_v38 = vcombine.low %v3602_v26, %v3606_v27 }
 0x54d   :  { %v3015_v43 = vrot.slane %v7362_v42, %v7244_v63  ;;  %v3019_v44 = vrot.slane %v7362_v42, %v7252_v1  ;;  %v3027_v45 = vrot.slane %v7362_v42, %v7255_v2  ;;  %v3614_v35 = vld [vmem:[#allocation8 + $0x560] sm:$0xff] }
 0x54f   :  { %5039 = vmatpush1.bf16.msra.mxu1 %v5947_v47  ;;  %5121 = vmatpush1.bf16.msra.mxu0 %v5949_v49 }
 0x550   :  { %5040 = vmatprep.subr.bf16.mxu1 %v5956_v50  ;;  %5122 = vmatprep.subr.bf16.mxu0 %v5958_v51 }
 0x553   :  { %5041 = vmatpush1.bf16.msra.mxu1 %v5955_v56  ;;  %5123 = vmatpush1.bf16.msra.mxu0 %v5957_v57 }
 0x554   :  { %5042 = vmatprep.subr.bf16.mxu1 %v5964_v58  ;;  %5124 = vmatprep.subr.bf16.mxu0 %v5966_v59 }
 0x557   :  { %5043 = vmatpush1.bf16.msra.mxu1 %v5963_v4  ;;  %5125 = vmatpush1.bf16.msra.mxu0 %v5965_v5  ;;  %v3583_v4 = vld [vmem:[#allocation8 + $0x468] sm:$0xff] }
 0x558   :  { %5044 = vmatprep.subr.bf16.mxu1 %v5972_v6  ;;  %5126 = vmatprep.subr.bf16.mxu0 %v5974_v7  ;;  %v3586_v7 = vld [vmem:[#allocation8 + $0x480] sm:$0xff]  ;;  %v6014_v9 = vcombine.high %v3579_v3, %v3583_v4 }
 0x559   :  { %v6019_v22 = vcombine.low %v3586_v7, %v3590_v10 }
 0x55b   :  { %5045 = vmatpush1.bf16.msra.mxu1 %v5971_v12  ;;  %5127 = vmatpush1.bf16.msra.mxu0 %v5973_v13  ;;  %v3591_v12 = vld [vmem:[#allocation8 + $0x4a8] sm:$0xff] }
 0x55c   :  { %5046 = vmatprep.subr.bf16.mxu1 %v5980_v14  ;;  %5128 = vmatprep.subr.bf16.mxu0 %v5982_v15  ;;  %v6011_v14 = vcombine.low %v3578_v60, %v3582_v0  ;;  %v6013_v15 = vcombine.low %v3579_v3, %v3583_v4  ;;  %v3638_v0 = vld [vmem:[#allocation8 + $0x620] sm:$0xff]  ;;  %v3635_v3 = vld [vmem:[#allocation8 + $0x608] sm:$0xff] }
 0x55d   :  { %v3639_v4 = vld [vmem:[#allocation8 + $0x628] sm:$0xff] }
 0x55f   :  { %5047 = vmatpush1.bf16.msra.mxu1 %v5979_v16  ;;  %5129 = vmatpush1.bf16.msra.mxu0 %v5981_v17  ;;  %v6020_v16 = vcombine.high %v3586_v7, %v3590_v10  ;;  %v6022_v17 = vcombine.high %v3587_v11, %v3591_v12  ;;  %v6070_v10 = vcombine.high %v3635_v3, %v3639_v4 }
 0x560   :  { %5048 = vmatprep.subr.bf16.mxu1 %v5988_v21  ;;  %5130 = vmatprep.subr.bf16.mxu0 %v5990_v25  ;;  %v3599_v21 = vld [vmem:[#allocation8 + $0x4e8] sm:$0xff] }
 0x561   :  { %v6030_v25 = vcombine.high %v3595_v20, %v3599_v21 }
 0x563   :  { %5049 = vmatpush1.bf16.msra.mxu1 %v5987_v23  ;;  %5131 = vmatpush1.bf16.msra.mxu0 %v5989_v24  ;;  %v6021_v23 = vcombine.low %v3587_v11, %v3591_v12  ;;  %v6028_v24 = vcombine.high %v3594_v18, %v3598_v19  ;;  %v3642_v11 = vld [vmem:[#allocation8 + $0x640] sm:$0xff] }
 0x564   :  { %5050 = vmatprep.subr.bf16.mxu1 %v5996_v29  ;;  %5132 = vmatprep.subr.bf16.mxu0 %v5998_v33  ;;  %v3607_v29 = vld [vmem:[#allocation8 + $0x528] sm:$0xff]  ;;  %v3646_v12 = vld [vmem:[#allocation8 + $0x660] sm:$0xff] }
 0x565   :  { %v6038_v33 = vcombine.high %v3603_v28, %v3607_v29  ;;  %v6076_v18 = vcombine.high %v3642_v11, %v3646_v12 }
 0x567   :  { %5051 = vmatpush1.bf16.msra.mxu1 %v5995_v31  ;;  %5133 = vmatpush1.bf16.msra.mxu0 %v5997_v32  ;;  %v6029_v31 = vcombine.low %v3595_v20, %v3599_v21  ;;  %v6036_v32 = vcombine.high %v3602_v26, %v3606_v27  ;;  %v3650_v20 = vld [vmem:[#allocation8 + $0x680] sm:$0xff] }
 0x568   :  { %5061 = vmatprep.subr.bf16.mxu1 %v6004_v37  ;;  %5143 = vmatprep.subr.bf16.mxu0 %v6006_v41  ;;  %v3615_v37 = vld [vmem:[#allocation8 + $0x568] sm:$0xff]  ;;  %v3654_v21 = vld [vmem:[#allocation8 + $0x6a0] sm:$0xff] }
 0x569   :  { %v6046_v41 = vcombine.high %v3611_v36, %v3615_v37  ;;  %v6084_v26 = vcombine.high %v3650_v20, %v3654_v21 }
 0x5fd   :  { %v3386_v46 = vpop.f32.mrb[16].mxu1  ;;  %v7370_v47 = vpop.f32.mrb[8].mxu0 }
 0x5fe   :  { %v3387_v49 = vadd.f32 %v3386_v46, %v3015_v43  ;;  %v3388_v50 = vpop.f32.mrb[17].mxu1  ;;  %v3429_v51 = vpop.f32.mrb[9].mxu0  ;;  %v3618_v43 = vld [vmem:[#allocation8 + $0x580] sm:$0xff]  ;;  %v3623_v46 = vld [vmem:[#allocation8 + $0x5a8] sm:$0xff] }
 0x5ff   :  { %v3389_v52 = vadd.f32 %v3388_v50, %v3019_v44  ;;  %v3430_v53 = vadd.f32 %v3429_v51, %v3027_v45  ;;  %v3390_v54 = vpop.f32.mrb[18].mxu1  ;;  %v3431_v55 = vpop.f32.mrb[10].mxu0  ;;  %v3622_v44 = vld [vmem:[#allocation8 + $0x5a0] sm:$0xff]  ;;  %v3619_v45 = vld [vmem:[#allocation8 + $0x588] sm:$0xff]  ;;  %v6045_v50 = vcombine.low %v3611_v36, %v3615_v37 }
 0x600   :  { %v3434_v56 = vmax.f32 %v3387_v49, 0.0  ;;  %v3391_v57 = vpop.f32.mrb[19].mxu1  ;;  %v3432_v58 = vpop.f32.mrb[11].mxu0  ;;  %v6043_v49 = vcombine.low %v3610_v34, %v3614_v35  ;;  %v6052_v51 = vcombine.high %v3618_v43, %v3622_v44  ;;  %v3630_v54 = vld [vmem:[#allocation8 + $0x5e0] sm:$0xff]  ;;  %v3627_v55 = vld [vmem:[#allocation8 + $0x5c8] sm:$0xff] }
 0x601   :  { %v3435_v59 = vmax.f32 %v3389_v52, 0.0  ;;  %v3437_v61 = vmax.f32 %v3430_v53, 0.0  ;;  %v6054_v52 = vcombine.high %v3619_v45, %v3623_v46  ;;  %v3626_v53 = vld [vmem:[#allocation8 + $0x5c0] sm:$0xff]  ;;  %v6051_v57 = vcombine.low %v3618_v43, %v3622_v44 }
 0x602   :  { %v7374_v6 = vpack.c.bf16 %v3434_v56, %v3434_v56  ;;  %v3631_v56 = vld [vmem:[#allocation8 + $0x5e8] sm:$0xff]  ;;  %v6053_v58 = vcombine.low %v3619_v45, %v3623_v46  ;;  %v6059_v7 = vcombine.low %v3626_v53, %v3630_v54  ;;  %v3666_v36 = vld [vmem:[#allocation8 + $0x700] sm:$0xff] }
 0x603   :  { %v7372_v5 = vpack.c.bf16 %v3435_v59, %v3435_v59  ;;  %v7378_v13 = vpack.c.bf16 %v3437_v61, %v3437_v61  ;;  %v6060_v59 = vcombine.high %v3626_v53, %v3630_v54  ;;  %v6062_v60 = vcombine.high %v3627_v55, %v3631_v56  ;;  %v3634_v61 = vld [vmem:[#allocation8 + $0x600] sm:$0xff] }
 0x604   :  { %v3670_v37 = vld [vmem:[#allocation8 + $0x720] sm:$0xff] }
 0x605   :  { %5052 = vmatprep.mubr.bf16.mxu1 %v7372_v5  ;;  %5134 = vmatprep.mubr.bf16.mxu0 %v7372_v5  ;;  %v6100_v43 = vcombine.high %v3666_v36, %v3670_v37  ;;  %v3674_v45 = vld [vmem:[#allocation8 + $0x740] sm:$0xff] }
 0x606   :  { %5053 = vmatmul.mubr.bf16.vlgmr.msra.gmra.mrb[20].mxu1 %v7374_v6  ;;  %5135 = vmatmul.mubr.bf16.vlgmr.msra.gmra.mrb[12].mxu0 %v7374_v6  ;;  %v3678_v46 = vld [vmem:[#allocation8 + $0x760] sm:$0xff] }
 0x607   :  { %5062 = vmatpush1.bf16.msra.mxu1 %v6003_v39  ;;  %5144 = vmatpush1.bf16.msra.mxu0 %v6005_v40  ;;  %v6037_v39 = vcombine.low %v3603_v28, %v3607_v29  ;;  %v6044_v40 = vcombine.high %v3610_v34, %v3614_v35  ;;  %v3658_v28 = vld [vmem:[#allocation8 + $0x6c0] sm:$0xff]  ;;  %v6108_v53 = vcombine.high %v3674_v45, %v3678_v46 }
 0x608   :  { %5093 = vmatprep.mubr.bf16.mxu1 %v7378_v13  ;;  %5175 = vmatprep.mubr.bf16.mxu0 %v7378_v13  ;;  %v3662_v29 = vld [vmem:[#allocation8 + $0x6e0] sm:$0xff] }
 0x609   :  { %5063 = vmatprep.subr.bf16.mxu1 %v6012_v8  ;;  %5145 = vmatprep.subr.bf16.mxu0 %v6014_v9  ;;  %v6061_v8 = vcombine.low %v3627_v55, %v3631_v56  ;;  %v6068_v9 = vcombine.high %v3634_v61, %v3638_v0  ;;  %v6092_v34 = vcombine.high %v3658_v28, %v3662_v29  ;;  %v3682_v55 = vld [vmem:[#allocation8 + $0x780] sm:$0xff] }
 0x60a   :  { %v3686_v56 = vld [vmem:[#allocation8 + $0x7a0] sm:$0xff] }
 0x60b   :  { %5064 = vmatpush1.bf16.msra.mxu1 %v6011_v14  ;;  %5146 = vmatpush1.bf16.msra.mxu0 %v6013_v15  ;;  %v3643_v14 = vld [vmem:[#allocation8 + $0x648] sm:$0xff] }
 0x60c   :  { %5065 = vmatprep.subr.bf16.mxu1 %v6020_v16  ;;  %5147 = vmatprep.subr.bf16.mxu0 %v6022_v17  ;;  %v3647_v15 = vld [vmem:[#allocation8 + $0x668] sm:$0xff]  ;;  %v6067_v16 = vcombine.low %v3634_v61, %v3638_v0  ;;  %v6069_v17 = vcombine.low %v3635_v3, %v3639_v4  ;;  %v3023_v61 = vrot.slane %v7362_v42, %v7266_v48  ;;  %v3690_v4 = vld [vmem:[#allocation8 + $0x7c0] sm:$0xff]  ;;  %v3448_v42 = vld [vmem:[#allocation8 + $0x30] sm:$0xff] }
 0x60d   :  { %v6078_v19 = vcombine.high %v3643_v14, %v3647_v15  ;;  %v6116_v0 = vcombine.high %v3682_v55, %v3686_v56 }
 0x60f   :  { %5066 = vmatpush1.bf16.msra.mxu1 %v6019_v22  ;;  %5148 = vmatpush1.bf16.msra.mxu0 %v6021_v23  ;;  %v3651_v22 = vld [vmem:[#allocation8 + $0x688] sm:$0xff] }
 0x610   :  { %5067 = vmatprep.subr.bf16.mxu1 %v6028_v24  ;;  %5149 = vmatprep.subr.bf16.mxu0 %v6030_v25  ;;  %v3655_v23 = vld [vmem:[#allocation8 + $0x6a8] sm:$0xff]  ;;  %v6075_v24 = vcombine.low %v3642_v11, %v3646_v12  ;;  %v6077_v25 = vcombine.low %v3643_v14, %v3647_v15  ;;  %v3428_v12 = vadd.f32 %v7370_v47, %v3023_v61  ;;  %v3453_v47 = vld [vmem:[#allocation8 + $0x58] sm:$0xff] }
 0x611   :  { %v6086_v27 = vcombine.high %v3651_v22, %v3655_v23  ;;  %v3489_v61 = vld [vmem:[#allocation8 + $0x178] sm:$0xff] }
 0x613   :  { %5068 = vmatpush1.bf16.msra.mxu1 %v6027_v30  ;;  %5150 = vmatpush1.bf16.msra.mxu0 %v6029_v31  ;;  %v3659_v30 = vld [vmem:[#allocation8 + $0x6c8] sm:$0xff] }
 0x614   :  { %5069 = vmatprep.subr.bf16.mxu1 %v6036_v32  ;;  %5151 = vmatprep.subr.bf16.mxu0 %v6038_v33  ;;  %v3663_v31 = vld [vmem:[#allocation8 + $0x6e8] sm:$0xff]  ;;  %v6083_v32 = vcombine.low %v3650_v20, %v3654_v21  ;;  %v6085_v33 = vcombine.low %v3651_v22, %v3655_v23  ;;  %v3436_v21 = vmax.f32 %v3428_v12, 0.0 }
 0x615   :  { %v6094_v35 = vcombine.high %v3659_v30, %v3663_v31 }
 0x617   :  { %5070 = vmatpush1.bf16.msra.mxu1 %v6035_v38  ;;  %5152 = vmatpush1.bf16.msra.mxu0 %v6037_v39  ;;  %v3667_v38 = vld [vmem:[#allocation8 + $0x708] sm:$0xff] }
 0x618   :  { %5071 = vmatprep.subr.bf16.mxu1 %v6044_v40  ;;  %5153 = vmatprep.subr.bf16.mxu0 %v6046_v41  ;;  %v3671_v39 = vld [vmem:[#allocation8 + $0x728] sm:$0xff]  ;;  %v6091_v40 = vcombine.low %v3658_v28, %v3662_v29  ;;  %v6093_v41 = vcombine.low %v3659_v30, %v3663_v31  ;;  %v7387_v28 = vpack.c.bf16 %v3436_v21, %v3436_v21 }
 0x619   :  { %v6102_v44 = vcombine.high %v3667_v38, %v3671_v39 }
 0x61b   :  { %5072 = vmatpush1.bf16.msra.mxu1 %v6043_v49  ;;  %5154 = vmatpush1.bf16.msra.mxu0 %v6045_v50  ;;  %v3675_v49 = vld [vmem:[#allocation8 + $0x748] sm:$0xff] }
 0x61c   :  { %5073 = vmatprep.subr.bf16.mxu1 %v6052_v51  ;;  %5155 = vmatprep.subr.bf16.mxu0 %v6054_v52  ;;  %v3679_v50 = vld [vmem:[#allocation8 + $0x768] sm:$0xff]  ;;  %v6099_v51 = vcombine.low %v3666_v36, %v3670_v37  ;;  %v6101_v52 = vcombine.low %v3667_v38, %v3671_v39 }
 0x61d   :  { %v6110_v54 = vcombine.high %v3675_v49, %v3679_v50 }
 0x61f   :  { %5074 = vmatpush1.bf16.msra.mxu1 %v6051_v57  ;;  %5156 = vmatpush1.bf16.msra.mxu0 %v6053_v58  ;;  %v3683_v57 = vld [vmem:[#allocation8 + $0x788] sm:$0xff] }
 0x620   :  { %5075 = vmatprep.subr.bf16.mxu1 %v6060_v59  ;;  %5157 = vmatprep.subr.bf16.mxu0 %v6062_v60  ;;  %v3687_v58 = vld [vmem:[#allocation8 + $0x7a8] sm:$0xff]  ;;  %v6107_v59 = vcombine.low %v3674_v45, %v3678_v46  ;;  %v6109_v60 = vcombine.low %v3675_v49, %v3679_v50 }
 0x621   :  { %v6118_v3 = vcombine.high %v3683_v57, %v3687_v58  ;;  %v6117_v11 = vcombine.low %v3683_v57, %v3687_v58  ;;  %v3484_v58 = vld [vmem:[#allocation8 + $0x150] sm:$0xff] }
 0x623   :  { %5076 = vmatpush1.bf16.msra.mxu1 %v6059_v7  ;;  %5158 = vmatpush1.bf16.msra.mxu0 %v6061_v8  ;;  %v3694_v7 = vld [vmem:[#allocation8 + $0x7e0] sm:$0xff]  ;;  %v3691_v8 = vld [vmem:[#allocation8 + $0x7c8] sm:$0xff] }
 0x624   :  { %5077 = vmatprep.subr.bf16.mxu1 %v6068_v9  ;;  %5159 = vmatprep.subr.bf16.mxu0 %v6070_v10  ;;  %v3695_v9 = vld [vmem:[#allocation8 + $0x7e8] sm:$0xff]  ;;  %v6115_v10 = vcombine.low %v3682_v55, %v3686_v56  ;;  %v6124_v14 = vcombine.high %v3690_v4, %v3694_v7 }
 0x625   :  { %v6126_v15 = vcombine.high %v3691_v8, %v3695_v9  ;;  %v6125_v20 = vcombine.low %v3691_v8, %v3695_v9  ;;  %v3492_v8 = vld [vmem:[#allocation8 + $0x190] sm:$0xff] }
 0x626   :  { %v3496_v9 = vld [vmem:[#allocation8 + $0x1b0] sm:$0xff] }
 0x627   :  { %5078 = vmatpush1.bf16.msra.mxu1 %v6067_v16  ;;  %5160 = vmatpush1.bf16.msra.mxu0 %v6069_v17  ;;  %v3444_v16 = vld [vmem:[#allocation8 + $0x10] sm:$0xff]  ;;  %v3445_v17 = vld [vmem:[#allocation8 + $0x18] sm:$0xff] }
 0x628   :  { %5079 = vmatprep.subr.bf16.mxu1 %v6076_v18  ;;  %5161 = vmatprep.subr.bf16.mxu0 %v6078_v19  ;;  %v3449_v18 = vld [vmem:[#allocation8 + $0x38] sm:$0xff]  ;;  %v6123_v19 = vcombine.low %v3690_v4, %v3694_v7  ;;  %v5880_v22 = vcombine.high %v3444_v16, %v3448_v42 }
 0x629   :  { %v5882_v23 = vcombine.high %v3445_v17, %v3449_v18  ;;  %v5881_v29 = vcombine.low %v3445_v17, %v3449_v18  ;;  %v3504_v17 = vld [vmem:[#allocation8 + $0x1f0] sm:$0xff]  ;;  %v3501_v18 = vld [vmem:[#allocation8 + $0x1d8] sm:$0xff] }
 0x62b   :  { %5080 = vmatpush1.bf16.msra.mxu1 %v6075_v24  ;;  %5162 = vmatpush1.bf16.msra.mxu0 %v6077_v25  ;;  %v3452_v24 = vld [vmem:[#allocation8 + $0x50] sm:$0xff] }
 0x62c   :  { %5081 = vmatprep.subr.bf16.mxu1 %v6084_v26  ;;  %5163 = vmatprep.subr.bf16.mxu0 %v6086_v27  ;;  %v3456_v25 = vld [vmem:[#allocation8 + $0x70] sm:$0xff]  ;;  %v3457_v26 = vld [vmem:[#allocation8 + $0x78] sm:$0xff]  ;;  %v5879_v27 = vcombine.low %v3444_v16, %v3448_v42 }
 0x62d   :  { %v5888_v30 = vcombine.high %v3452_v24, %v3456_v25  ;;  %v5890_v31 = vcombine.high %v3453_v47, %v3457_v26  ;;  %v5887_v36 = vcombine.low %v3452_v24, %v3456_v25  ;;  %v5889_v37 = vcombine.low %v3453_v47, %v3457_v26  ;;  %v3500_v42 = vld [vmem:[#allocation8 + $0x1d0] sm:$0xff]  ;;  %v3509_v47 = vld [vmem:[#allocation8 + $0x218] sm:$0xff] }
 0x62e   :  { %v3508_v24 = vld [vmem:[#allocation8 + $0x210] sm:$0xff]  ;;  %v3513_v26 = vld [vmem:[#allocation8 + $0x238] sm:$0xff] }
 0x62f   :  { %5082 = vmatpush1.bf16.msra.mxu1 %v6083_v32  ;;  %5164 = vmatpush1.bf16.msra.mxu0 %v6085_v33  ;;  %v3460_v32 = vld [vmem:[#allocation8 + $0x90] sm:$0xff] }
 0x630   :  { %5083 = vmatprep.subr.bf16.mxu1 %v6092_v34  ;;  %5165 = vmatprep.subr.bf16.mxu0 %v6094_v35  ;;  %v3464_v33 = vld [vmem:[#allocation8 + $0xb0] sm:$0xff]  ;;  %v3461_v34 = vld [vmem:[#allocation8 + $0x98] sm:$0xff] }
 0x631   :  { %v3465_v35 = vld [vmem:[#allocation8 + $0xb8] sm:$0xff]  ;;  %v5896_v38 = vcombine.high %v3460_v32, %v3464_v33  ;;  %v5895_v45 = vcombine.low %v3460_v32, %v3464_v33  ;;  %v3512_v25 = vld [vmem:[#allocation8 + $0x230] sm:$0xff] }
 0x632   :  { %v5898_v39 = vcombine.high %v3461_v34, %v3465_v35  ;;  %v5897_v46 = vcombine.low %v3461_v34, %v3465_v35  ;;  %v3516_v32 = vld [vmem:[#allocation8 + $0x250] sm:$0xff]  ;;  %v3517_v34 = vld [vmem:[#allocation8 + $0x258] sm:$0xff] }
 0x633   :  { %5084 = vmatpush1.bf16.msra.mxu1 %v6091_v40  ;;  %5166 = vmatpush1.bf16.msra.mxu0 %v6093_v41  ;;  %v3468_v40 = vld [vmem:[#allocation8 + $0xd0] sm:$0xff]  ;;  %v3521_v35 = vld [vmem:[#allocation8 + $0x278] sm:$0xff] }
 0x634   :  { %5085 = vmatprep.subr.bf16.mxu1 %v6100_v43  ;;  %5167 = vmatprep.subr.bf16.mxu0 %v6102_v44  ;;  %v3472_v41 = vld [vmem:[#allocation8 + $0xf0] sm:$0xff]  ;;  %v3469_v43 = vld [vmem:[#allocation8 + $0xd8] sm:$0xff] }
 0x635   :  { %v3473_v44 = vld [vmem:[#allocation8 + $0xf8] sm:$0xff]  ;;  %v5904_v49 = vcombine.high %v3468_v40, %v3472_v41  ;;  %v3520_v33 = vld [vmem:[#allocation8 + $0x270] sm:$0xff] }
 0x636   :  { %v5906_v50 = vcombine.high %v3469_v43, %v3473_v44  ;;  %v5905_v55 = vcombine.low %v3469_v43, %v3473_v44  ;;  %v3525_v43 = vld [vmem:[#allocation8 + $0x298] sm:$0xff] }
 0x637   :  { %5086 = vmatpush1.bf16.msra.mxu1 %v6099_v51  ;;  %5168 = vmatpush1.bf16.msra.mxu0 %v6101_v52  ;;  %v3476_v51 = vld [vmem:[#allocation8 + $0x110] sm:$0xff]  ;;  %v3529_v44 = vld [vmem:[#allocation8 + $0x2b8] sm:$0xff] }
 0x638   :  { %5087 = vmatprep.subr.bf16.mxu1 %v6108_v53  ;;  %5169 = vmatprep.subr.bf16.mxu0 %v6110_v54  ;;  %v3480_v52 = vld [vmem:[#allocation8 + $0x130] sm:$0xff]  ;;  %v3481_v53 = vld [vmem:[#allocation8 + $0x138] sm:$0xff]  ;;  %v5903_v54 = vcombine.low %v3468_v40, %v3472_v41 }
 0x639   :  { %v5912_v56 = vcombine.high %v3476_v51, %v3480_v52  ;;  %v3524_v40 = vld [vmem:[#allocation8 + $0x290] sm:$0xff] }
 0x63a   :  { %v3528_v41 = vld [vmem:[#allocation8 + $0x2b0] sm:$0xff] }
 0x63b   :  { %5088 = vmatpush1.bf16.msra.mxu1 %v6107_v59  ;;  %5170 = vmatpush1.bf16.msra.mxu0 %v6109_v60  ;;  %v3488_v59 = vld [vmem:[#allocation8 + $0x170] sm:$0xff]  ;;  %v3485_v60 = vld [vmem:[#allocation8 + $0x158] sm:$0xff] }
 0x63c   :  { %5089 = vmatprep.subr.bf16.mxu1 %v6116_v0  ;;  %5171 = vmatprep.subr.bf16.mxu0 %v6118_v3  ;;  %v5911_v0 = vcombine.low %v3476_v51, %v3480_v52  ;;  %v5920_v4 = vcombine.high %v3484_v58, %v3488_v59  ;;  %v5922_v7 = vcombine.high %v3485_v60, %v3489_v61  ;;  %v3532_v51 = vld [vmem:[#allocation8 + $0x2d0] sm:$0xff] }
 0x63d   :  { %v5919_v12 = vcombine.low %v3484_v58, %v3488_v59  ;;  %v3536_v52 = vld [vmem:[#allocation8 + $0x2f0] sm:$0xff] }
 0x63e   :  { %v3540_v58 = vld [vmem:[#allocation8 + $0x310] sm:$0xff] }
 0x63f   :  { %5090 = vmatpush1.bf16.msra.mxu1 %v6115_v10  ;;  %5172 = vmatpush1.bf16.msra.mxu0 %v6117_v11  ;;  %v3493_v10 = vld [vmem:[#allocation8 + $0x198] sm:$0xff]  ;;  %v3544_v59 = vld [vmem:[#allocation8 + $0x330] sm:$0xff] }
 0x640   :  { %5091 = vmatprep.subr.bf16.mxu1 %v6124_v14  ;;  %5173 = vmatprep.subr.bf16.mxu0 %v6126_v15  ;;  %v3497_v11 = vld [vmem:[#allocation8 + $0x1b8] sm:$0xff]  ;;  %v5921_v14 = vcombine.low %v3485_v60, %v3489_v61  ;;  %v5928_v15 = vcombine.high %v3492_v8, %v3496_v9 }
 0x641   :  { %v5930_v16 = vcombine.high %v3493_v10, %v3497_v11  ;;  %v5929_v21 = vcombine.low %v3493_v10, %v3497_v11  ;;  %v3541_v60 = vld [vmem:[#allocation8 + $0x318] sm:$0xff] }
 0x642   :  { %v3545_v61 = vld [vmem:[#allocation8 + $0x338] sm:$0xff] }
 0x643   :  { %5092 = vmatpush1.bf16.msra.mxu1 %v6123_v19  ;;  %5174 = vmatpush1.bf16.msra.mxu0 %v6125_v20  ;;  %v3505_v19 = vld [vmem:[#allocation8 + $0x1f8] sm:$0xff]  ;;  %v5927_v20 = vcombine.low %v3492_v8, %v3496_v9  ;;  %v3548_v8 = vld [vmem:[#allocation8 + $0x350] sm:$0xff] }
 0x644   :  { %5184 = vmatprep.subr.bf16.mxu1 %v5880_v22  ;;  %5266 = vmatprep.subr.bf16.mxu0 %v5882_v23  ;;  %v5936_v22 = vcombine.high %v3500_v42, %v3504_v17  ;;  %v5938_v23 = vcombine.high %v3501_v18, %v3505_v19  ;;  %v3552_v9 = vld [vmem:[#allocation8 + $0x370] sm:$0xff]  ;;  %v3549_v10 = vld [vmem:[#allocation8 + $0x358] sm:$0xff] }
 0x645   :  { %v3553_v11 = vld [vmem:[#allocation8 + $0x378] sm:$0xff] }
 0x646   :  { %5094 = vmatmul.mubr.bf16.vlgmr.msra.gmra.mrb[20].mxu1 %v7387_v28  ;;  %5176 = vmatmul.mubr.bf16.vlgmr.msra.gmra.mrb[12].mxu0 %v7387_v28 }
 0x647   :  { %5185 = vmatpush1.bf16.msra.mxu1 %v5879_v27  ;;  %5216 = vmatprep.mubr.bf16.mxu1 %v7372_v5  ;;  %v5935_v27 = vcombine.low %v3500_v42, %v3504_v17  ;;  %v3556_v42 = vld [vmem:[#allocation8 + $0x390] sm:$0xff] }
 0x648   :  { %5267 = vmatpush1.bf16.msra.mxu0 %v5881_v29  ;;  %5298 = vmatprep.mubr.bf16.mxu0 %v7372_v5  ;;  %v3477_v5 = vld [vmem:[#allocation8 + $0x118] sm:$0xff]  ;;  %v5937_v29 = vcombine.low %v3501_v18, %v3505_v19  ;;  %v3560_v17 = vld [vmem:[#allocation8 + $0x3b0] sm:$0xff] }
 0x649   :  { %5186 = vmatprep.subr.bf16.mxu1 %v5888_v30  ;;  %5268 = vmatprep.subr.bf16.mxu0 %v5890_v31  ;;  %v5914_v57 = vcombine.high %v3477_v5, %v3481_v53  ;;  %v5913_v3 = vcombine.low %v3477_v5, %v3481_v53  ;;  %v5944_v30 = vcombine.high %v3508_v24, %v3512_v25  ;;  %v3533_v5 = vld [vmem:[#allocation8 + $0x2d8] sm:$0xff] }
 0x64a   :  { %v5946_v31 = vcombine.high %v3509_v47, %v3513_v26  ;;  %v3537_v53 = vld [vmem:[#allocation8 + $0x2f8] sm:$0xff] }
 0x64b   :  { %5187 = vmatpush1.bf16.msra.mxu1 %v5887_v36  ;;  %v5943_v36 = vcombine.low %v3508_v24, %v3512_v25  ;;  %v3557_v18 = vld [vmem:[#allocation8 + $0x398] sm:$0xff]  ;;  %v3564_v24 = vld [vmem:[#allocation8 + $0x3d0] sm:$0xff] }
 0x64c   :  { %5269 = vmatpush1.bf16.msra.mxu0 %v5889_v37  ;;  %5188 = vmatprep.subr.bf16.mxu1 %v5896_v38  ;;  %v5945_v37 = vcombine.low %v3509_v47, %v3513_v26  ;;  %v5952_v38 = vcombine.high %v3516_v32, %v3520_v33  ;;  %v3561_v19 = vld [vmem:[#allocation8 + $0x3b8] sm:$0xff]  ;;  %v3568_v25 = vld [vmem:[#allocation8 + $0x3f0] sm:$0xff] }
 0x64d   :  { %5270 = vmatprep.subr.bf16.mxu0 %v5898_v39  ;;  %v5954_v39 = vcombine.high %v3517_v34, %v3521_v35  ;;  %v3565_v47 = vld [vmem:[#allocation8 + $0x3d8] sm:$0xff] }
 0x64e   :  { %v3569_v26 = vld [vmem:[#allocation8 + $0x3f8] sm:$0xff] }
 0x64f   :  { %5189 = vmatpush1.bf16.msra.mxu1 %v5895_v45  ;;  %v5951_v45 = vcombine.low %v3516_v32, %v3520_v33  ;;  %v3572_v32 = vld [vmem:[#allocation8 + $0x410] sm:$0xff] }
 0x650   :  { %5271 = vmatpush1.bf16.msra.mxu0 %v5897_v46  ;;  %5190 = vmatprep.subr.bf16.mxu1 %v5904_v49  ;;  %v5953_v46 = vcombine.low %v3517_v34, %v3521_v35  ;;  %v5960_v49 = vcombine.high %v3524_v40, %v3528_v41  ;;  %v3576_v33 = vld [vmem:[#allocation8 + $0x430] sm:$0xff]  ;;  %v3573_v34 = vld [vmem:[#allocation8 + $0x418] sm:$0xff] }
 0x651   :  { %5272 = vmatprep.subr.bf16.mxu0 %v5906_v50  ;;  %v5962_v50 = vcombine.high %v3525_v43, %v3529_v44  ;;  %v3577_v35 = vld [vmem:[#allocation8 + $0x438] sm:$0xff] }
 0x653   :  { %5191 = vmatpush1.bf16.msra.mxu1 %v5903_v54  ;;  %v5959_v54 = vcombine.low %v3524_v40, %v3528_v41  ;;  %v3580_v40 = vld [vmem:[#allocation8 + $0x450] sm:$0xff] }
 0x654   :  { %5273 = vmatpush1.bf16.msra.mxu0 %v5905_v55  ;;  %5192 = vmatprep.subr.bf16.mxu1 %v5912_v56  ;;  %v5961_v55 = vcombine.low %v3525_v43, %v3529_v44  ;;  %v5968_v56 = vcombine.high %v3532_v51, %v3536_v52  ;;  %v3584_v41 = vld [vmem:[#allocation8 + $0x470] sm:$0xff]  ;;  %v6007_v43 = vcombine.low %v3572_v32, %v3576_v33  ;;  %v3581_v44 = vld [vmem:[#allocation8 + $0x458] sm:$0xff] }
 0x655   :  { %5274 = vmatprep.subr.bf16.mxu0 %v5914_v57  ;;  %v5970_v57 = vcombine.high %v3533_v5, %v3537_v53 }
 0x657   :  { %5193 = vmatpush1.bf16.msra.mxu1 %v5911_v0  ;;  %v5967_v0 = vcombine.low %v3532_v51, %v3536_v52  ;;  %v3592_v51 = vld [vmem:[#allocation8 + $0x4b0] sm:$0xff] }
 0x658   :  { %5275 = vmatpush1.bf16.msra.mxu0 %v5913_v3  ;;  %5194 = vmatprep.subr.bf16.mxu1 %v5920_v4  ;;  %v5969_v3 = vcombine.low %v3533_v5, %v3537_v53  ;;  %v5976_v4 = vcombine.high %v3540_v58, %v3544_v59  ;;  %v3589_v5 = vld [vmem:[#allocation8 + $0x498] sm:$0xff] }
 0x659   :  { %5276 = vmatprep.subr.bf16.mxu0 %v5922_v7  ;;  %v5978_v7 = vcombine.high %v3541_v60, %v3545_v61  ;;  %v3593_v53 = vld [vmem:[#allocation8 + $0x4b8] sm:$0xff] }
 0x65b   :  { %5195 = vmatpush1.bf16.msra.mxu1 %v5919_v12  ;;  %v5975_v12 = vcombine.low %v3540_v58, %v3544_v59  ;;  %v3596_v58 = vld [vmem:[#allocation8 + $0x4d0] sm:$0xff] }
 0x65c   :  { %5277 = vmatpush1.bf16.msra.mxu0 %v5921_v14  ;;  %5196 = vmatprep.subr.bf16.mxu1 %v5928_v15  ;;  %v5977_v14 = vcombine.low %v3541_v60, %v3545_v61  ;;  %v5984_v15 = vcombine.high %v3548_v8, %v3552_v9  ;;  %v3600_v59 = vld [vmem:[#allocation8 + $0x4f0] sm:$0xff]  ;;  %v3597_v60 = vld [vmem:[#allocation8 + $0x4d8] sm:$0xff] }
 0x65d   :  { %5278 = vmatprep.subr.bf16.mxu0 %v5930_v16  ;;  %v5986_v16 = vcombine.high %v3549_v10, %v3553_v11  ;;  %v3601_v61 = vld [vmem:[#allocation8 + $0x4f8] sm:$0xff] }
 0x65f   :  { %5197 = vmatpush1.bf16.msra.mxu1 %v5927_v20  ;;  %v5983_v20 = vcombine.low %v3548_v8, %v3552_v9  ;;  %v3608_v8 = vld [vmem:[#allocation8 + $0x530] sm:$0xff]  ;;  %v3605_v9 = vld [vmem:[#allocation8 + $0x518] sm:$0xff] }
 0x660   :  { %5279 = vmatpush1.bf16.msra.mxu0 %v5929_v21  ;;  %5198 = vmatprep.subr.bf16.mxu1 %v5936_v22  ;;  %v5985_v21 = vcombine.low %v3549_v10, %v3553_v11  ;;  %v5992_v22 = vcombine.high %v3556_v42, %v3560_v17  ;;  %v3609_v10 = vld [vmem:[#allocation8 + $0x538] sm:$0xff]  ;;  %v6033_v11 = vcombine.low %v3597_v60, %v3601_v61 }
 0x661   :  { %5280 = vmatprep.subr.bf16.mxu0 %v5938_v23  ;;  %v5994_v23 = vcombine.high %v3557_v18, %v3561_v19 }
 0x663   :  { %5199 = vmatpush1.bf16.msra.mxu1 %v5935_v27  ;;  %v5991_v27 = vcombine.low %v3556_v42, %v3560_v17  ;;  %v3613_v42 = vld [vmem:[#allocation8 + $0x558] sm:$0xff] }
 0x664   :  { %5281 = vmatpush1.bf16.msra.mxu0 %v5937_v29  ;;  %5200 = vmatprep.subr.bf16.mxu1 %v5944_v30  ;;  %v5993_v29 = vcombine.low %v3557_v18, %v3561_v19  ;;  %v6000_v30 = vcombine.high %v3564_v24, %v3568_v25  ;;  %v3617_v17 = vld [vmem:[#allocation8 + $0x578] sm:$0xff]  ;;  %v6041_v19 = vcombine.low %v3605_v9, %v3609_v10 }
 0x665   :  { %5282 = vmatprep.subr.bf16.mxu0 %v5946_v31  ;;  %v6002_v31 = vcombine.high %v3565_v47, %v3569_v26 }
 0x667   :  { %5201 = vmatpush1.bf16.msra.mxu1 %v5943_v36  ;;  %v5999_v36 = vcombine.low %v3564_v24, %v3568_v25  ;;  %v3621_v24 = vld [vmem:[#allocation8 + $0x598] sm:$0xff] }
 0x668   :  { %5283 = vmatpush1.bf16.msra.mxu0 %v5945_v37  ;;  %5202 = vmatprep.subr.bf16.mxu1 %v5952_v38  ;;  %v6001_v37 = vcombine.low %v3565_v47, %v3569_v26  ;;  %v6008_v38 = vcombine.high %v3572_v32, %v3576_v33  ;;  %v3625_v25 = vld [vmem:[#allocation8 + $0x5b8] sm:$0xff]  ;;  %v6049_v26 = vcombine.low %v3613_v42, %v3617_v17 }
 0x669   :  { %5284 = vmatprep.subr.bf16.mxu0 %v5954_v39  ;;  %v6010_v39 = vcombine.high %v3573_v34, %v3577_v35  ;;  %v3629_v32 = vld [vmem:[#allocation8 + $0x5d8] sm:$0xff] }
 0x66a   :  { %v3633_v33 = vld [vmem:[#allocation8 + $0x5f8] sm:$0xff] }
 0x66b   :  { %5203 = vmatpush1.bf16.msra.mxu1 %v5951_v45  ;;  %v3585_v45 = vld [vmem:[#allocation8 + $0x478] sm:$0xff] }
 0x66c   :  { %5285 = vmatpush1.bf16.msra.mxu0 %v5953_v46  ;;  %5204 = vmatprep.subr.bf16.mxu1 %v5960_v49  ;;  %v6009_v46 = vcombine.low %v3573_v34, %v3577_v35  ;;  %v6016_v49 = vcombine.high %v3580_v40, %v3584_v41  ;;  %v6018_v52 = vcombine.high %v3581_v44, %v3585_v45 }
 0x66d   :  { %5286 = vmatprep.subr.bf16.mxu0 %v5962_v50  ;;  %v3588_v50 = vld [vmem:[#allocation8 + $0x490] sm:$0xff]  ;;  %v6057_v35 = vcombine.low %v3621_v24, %v3625_v25 }
 0x66f   :  { %5205 = vmatpush1.bf16.msra.mxu1 %v5959_v54  ;;  %v6015_v54 = vcombine.low %v3580_v40, %v3584_v41  ;;  %v3637_v40 = vld [vmem:[#allocation8 + $0x618] sm:$0xff] }
 0x670   :  { %5287 = vmatpush1.bf16.msra.mxu0 %v5961_v55  ;;  %5206 = vmatprep.subr.bf16.mxu1 %v5968_v56  ;;  %v6017_v55 = vcombine.low %v3581_v44, %v3585_v45  ;;  %v6024_v56 = vcombine.high %v3588_v50, %v3592_v51  ;;  %v3641_v41 = vld [vmem:[#allocation8 + $0x638] sm:$0xff]  ;;  %v6065_v44 = vcombine.low %v3629_v32, %v3633_v33 }
 0x671   :  { %5288 = vmatprep.subr.bf16.mxu0 %v5970_v57  ;;  %v6026_v57 = vcombine.high %v3589_v5, %v3593_v53 }
 0x673   :  { %5207 = vmatpush1.bf16.msra.mxu1 %v5967_v0  ;;  %v6023_v0 = vcombine.low %v3588_v50, %v3592_v51  ;;  %v3648_v50 = vld [vmem:[#allocation8 + $0x670] sm:$0xff]  ;;  %v3645_v51 = vld [vmem:[#allocation8 + $0x658] sm:$0xff] }
 0x674   :  { %5289 = vmatpush1.bf16.msra.mxu0 %v5969_v3  ;;  %5208 = vmatprep.subr.bf16.mxu1 %v5976_v4  ;;  %v6032_v3 = vcombine.high %v3596_v58, %v3600_v59  ;;  %v6034_v4 = vcombine.high %v3597_v60, %v3601_v61 }
 0x675   :  { %5290 = vmatprep.subr.bf16.mxu0 %v5978_v7  ;;  %v3604_v7 = vld [vmem:[#allocation8 + $0x510] sm:$0xff] }
 0x676   :  { %v6039_v18 = vcombine.low %v3604_v7, %v3608_v8 }
 0x677   :  { %5209 = vmatpush1.bf16.msra.mxu1 %v5975_v12  ;;  %v6040_v12 = vcombine.high %v3604_v7, %v3608_v8  ;;  %v3661_v7 = vld [vmem:[#allocation8 + $0x6d8] sm:$0xff] }
 0x678   :  { %5291 = vmatpush1.bf16.msra.mxu0 %v5977_v14  ;;  %5210 = vmatprep.subr.bf16.mxu1 %v5984_v15  ;;  %v6042_v14 = vcombine.high %v3605_v9, %v3609_v10  ;;  %v3612_v15 = vld [vmem:[#allocation8 + $0x550] sm:$0xff]  ;;  %v3665_v8 = vld [vmem:[#allocation8 + $0x6f8] sm:$0xff] }
 0x679   :  { %5292 = vmatprep.subr.bf16.mxu0 %v5986_v16  ;;  %v3616_v16 = vld [vmem:[#allocation8 + $0x570] sm:$0xff] }
 0x67a   :  { %v6047_v47 = vcombine.low %v3612_v15, %v3616_v16 }
 0x67b   :  { %5211 = vmatpush1.bf16.msra.mxu1 %v5983_v20  ;;  %v6048_v20 = vcombine.high %v3612_v15, %v3616_v16  ;;  %v3669_v15 = vld [vmem:[#allocation8 + $0x718] sm:$0xff] }
 0x67c   :  { %5293 = vmatpush1.bf16.msra.mxu0 %v5985_v21  ;;  %5212 = vmatprep.subr.bf16.mxu1 %v5992_v22  ;;  %v6050_v21 = vcombine.high %v3613_v42, %v3617_v17  ;;  %v3620_v22 = vld [vmem:[#allocation8 + $0x590] sm:$0xff]  ;;  %v3673_v16 = vld [vmem:[#allocation8 + $0x738] sm:$0xff]  ;;  %v6097_v17 = vcombine.low %v3661_v7, %v3665_v8 }
 0x67d   :  { %5294 = vmatprep.subr.bf16.mxu0 %v5994_v23  ;;  %v3624_v23 = vld [vmem:[#allocation8 + $0x5b0] sm:$0xff] }
 0x67e   :  { %v6055_v34 = vcombine.low %v3620_v22, %v3624_v23 }
 0x67f   :  { %5213 = vmatpush1.bf16.msra.mxu1 %v5991_v27  ;;  %v6056_v27 = vcombine.high %v3620_v22, %v3624_v23  ;;  %v3677_v22 = vld [vmem:[#allocation8 + $0x758] sm:$0xff] }
 0x680   :  { %5295 = vmatpush1.bf16.msra.mxu0 %v5993_v29  ;;  %5214 = vmatprep.subr.bf16.mxu1 %v6000_v30  ;;  %v6058_v29 = vcombine.high %v3621_v24, %v3625_v25  ;;  %v3628_v30 = vld [vmem:[#allocation8 + $0x5d0] sm:$0xff]  ;;  %v3681_v23 = vld [vmem:[#allocation8 + $0x778] sm:$0xff]  ;;  %v6105_v25 = vcombine.low %v3669_v15, %v3673_v16 }
 0x681   :  { %5296 = vmatprep.subr.bf16.mxu0 %v6002_v31  ;;  %v3632_v31 = vld [vmem:[#allocation8 + $0x5f0] sm:$0xff] }
 0x683   :  { %5215 = vmatpush1.bf16.msra.mxu1 %v5999_v36  ;;  %v6064_v36 = vcombine.high %v3628_v30, %v3632_v31 }
 0x684   :  { %5297 = vmatpush1.bf16.msra.mxu0 %v6001_v37  ;;  %5225 = vmatprep.subr.bf16.mxu1 %v6008_v38  ;;  %v6066_v37 = vcombine.high %v3629_v32, %v3633_v33  ;;  %v3636_v38 = vld [vmem:[#allocation8 + $0x610] sm:$0xff]  ;;  %v6113_v33 = vcombine.low %v3677_v22, %v3681_v23 }
 0x685   :  { %5307 = vmatprep.subr.bf16.mxu0 %v6010_v39  ;;  %v3640_v39 = vld [vmem:[#allocation8 + $0x630] sm:$0xff] }
 0x686   :  { %5217 = vmatmul.mubr.bf16.vlgmr.msra.gmra.mrb[24].mxu1 %v7374_v6  ;;  %v6072_v45 = vcombine.high %v3636_v38, %v3640_v39 }
 0x687   :  { %5299 = vmatmul.mubr.bf16.vlgmr.msra.gmra.mrb[16].mxu0 %v7374_v6  ;;  %5226 = vmatpush1.bf16.msra.mxu1 %v6007_v43  ;;  %v6025_v6 = vcombine.low %v3589_v5, %v3593_v53  ;;  %v6063_v43 = vcombine.low %v3628_v30, %v3632_v31  ;;  %v6071_v5 = vcombine.low %v3636_v38, %v3640_v39  ;;  %v3685_v30 = vld [vmem:[#allocation8 + $0x798] sm:$0xff] }
 0x688   :  { %5257 = vmatprep.mubr.bf16.mxu1 %v7378_v13  ;;  %5308 = vmatpush1.bf16.msra.mxu0 %v6009_v46  ;;  %v6074_v46 = vcombine.high %v3637_v40, %v3641_v41  ;;  %v6073_v53 = vcombine.low %v3637_v40, %v3641_v41  ;;  %v3689_v31 = vld [vmem:[#allocation8 + $0x7b8] sm:$0xff] }
 0x689   :  { %5339 = vmatprep.mubr.bf16.mxu0 %v7378_v13  ;;  %5227 = vmatprep.subr.bf16.mxu1 %v6016_v49  ;;  %v6031_v13 = vcombine.low %v3596_v58, %v3600_v59  ;;  %v3644_v49 = vld [vmem:[#allocation8 + $0x650] sm:$0xff]  ;;  %v3653_v58 = vld [vmem:[#allocation8 + $0x698] sm:$0xff]  ;;  %v6121_v41 = vcombine.low %v3685_v30, %v3689_v31 }
 0x68a   :  { %5309 = vmatprep.subr.bf16.mxu0 %v6018_v52  ;;  %v3649_v52 = vld [vmem:[#allocation8 + $0x678] sm:$0xff]  ;;  %v6079_v60 = vcombine.low %v3644_v49, %v3648_v50 }
 0x68b   :  { %5228 = vmatpush1.bf16.msra.mxu1 %v6015_v54  ;;  %v6080_v54 = vcombine.high %v3644_v49, %v3648_v50  ;;  %v3657_v59 = vld [vmem:[#allocation8 + $0x6b8] sm:$0xff]  ;;  %v6081_v61 = vcombine.low %v3645_v51, %v3649_v52  ;;  %v3698_v49 = vld [vmem:[%s7436_s14] sm:$0xff]  ;;  %s7035_s14 = smov [#allocation10]  }
 0x68c   :  { %5310 = vmatpush1.bf16.msra.mxu0 %v6017_v55  ;;  %5229 = vmatprep.subr.bf16.mxu1 %v6024_v56  ;;  %v6082_v55 = vcombine.high %v3645_v51, %v3649_v52  ;;  %v3652_v56 = vld [vmem:[#allocation8 + $0x690] sm:$0xff]  ;;  %v6089_v10 = vcombine.low %v3653_v58, %v3657_v59  ;;  %v3693_v38 = vld [vmem:[#allocation8 + $0x7d8] sm:$0xff]  ;;  %v3703_v50 = vrot.slane %v3698_v49, %v7244_v63  ;;  %s5438_s16 = sshll.u32 %s7035_s14, 4  ;;  %s5439_s16 = int_to_ptr.vmem [resolvable:$true] %s5438_s16 }
 0x68d   :  { %5311 = vmatprep.subr.bf16.mxu0 %v6026_v57  ;;  %v3656_v57 = vld [vmem:[#allocation8 + $0x6b0] sm:$0xff]  ;;  %v3697_v39 = vld [vmem:[#allocation8 + $0x7f8] sm:$0xff]  ;;  %v3711_v51 = vrot.slane %v3698_v49, %v7266_v48  ;;  %v3707_v52 = vrot.slane %v3698_v49, %v7252_v1  ;;  %s6994_s0 = scalar_lea.vmem %s5439_s16, 512  ;;  %p6999_p5 = scmp.lt.s32.totalorder %s5439_s16, %s5439_s16 }
 0x68e   :  { %v6087_v9 = vcombine.low %v3652_v56, %v3656_v57  ;;  %p6995_p4 = scmp.ne.s32.totalorder %s5439_s16, %s6994_s0  ;;  %p7000_p6 = scmp.lt.s32.totalorder %s6994_s0, %s6994_s0 }
 0x68f   :  { %5230 = vmatpush1.bf16.msra.mxu1 %v6023_v0  ;;  %v6088_v0 = vcombine.high %v3652_v56, %v3656_v57 }
 0x690   :  { %5312 = vmatpush1.bf16.msra.mxu0 %v6025_v6  ;;  %5231 = vmatprep.subr.bf16.mxu1 %v6032_v3  ;;  %v6090_v6 = vcombine.high %v3653_v58, %v3657_v59  ;;  %v3660_v3 = vld [vmem:[#allocation8 + $0x6d0] sm:$0xff]  ;;  %p7001_p7 = por %p7000_p6, %p6999_p5 }
 0x691   :  { %5313 = vmatprep.subr.bf16.mxu0 %v6034_v4  ;;  %v3664_v4 = vld [vmem:[#allocation8 + $0x6f0] sm:$0xff] }
 0x692   :  { %v6095_v42 = vcombine.low %v3660_v3, %v3664_v4  ;;  %p7002_p8 = pnand %p7001_p7, %p6995_p4 }
 0x693   :  { %5232 = vmatpush1.bf16.msra.mxu1 %v6031_v13  ;;  %v6096_v13 = vcombine.high %v3660_v3, %v3664_v4 }
 0x694   :  { %5314 = vmatpush1.bf16.msra.mxu0 %v6033_v11  ;;  %5233 = vmatprep.subr.bf16.mxu1 %v6040_v12  ;;  %v6098_v11 = vcombine.high %v3661_v7, %v3665_v8  ;;  %v3668_v12 = vld [vmem:[#allocation8 + $0x710] sm:$0xff] }
 0x695   :  { %5315 = vmatprep.subr.bf16.mxu0 %v6042_v14  ;;  %v3672_v14 = vld [vmem:[#allocation8 + $0x730] sm:$0xff] }
 0x696   :  { %v6103_v24 = vcombine.low %v3668_v12, %v3672_v14 }
 0x697   :  { %5234 = vmatpush1.bf16.msra.mxu1 %v6039_v18  ;;  %v6104_v18 = vcombine.high %v3668_v12, %v3672_v14 }
 0x698   :  { %5316 = vmatpush1.bf16.msra.mxu0 %v6041_v19  ;;  %5235 = vmatprep.subr.bf16.mxu1 %v6048_v20  ;;  %v6106_v19 = vcombine.high %v3669_v15, %v3673_v16  ;;  %v3676_v20 = vld [vmem:[#allocation8 + $0x750] sm:$0xff] }
 0x699   :  { %5317 = vmatprep.subr.bf16.mxu0 %v6050_v21  ;;  %v3680_v21 = vld [vmem:[#allocation8 + $0x770] sm:$0xff] }
 0x69a   :  { %v6111_v32 = vcombine.low %v3676_v20, %v3680_v21 }
 0x69b   :  { %5236 = vmatpush1.bf16.msra.mxu1 %v6047_v47  ;;  %v6112_v47 = vcombine.high %v3676_v20, %v3680_v21  ;;  %v3722_v20 = vsub.s32 5, %v7241_v62  ;;  %v3730_v21 = vsub.s32 7, %v7241_v62 }
 0x69c   :  { %5318 = vmatpush1.bf16.msra.mxu0 %v6049_v26  ;;  %5237 = vmatprep.subr.bf16.mxu1 %v6056_v27  ;;  %v6114_v26 = vcombine.high %v3677_v22, %v3681_v23  ;;  %v3684_v27 = vld [vmem:[#allocation8 + $0x790] sm:$0xff] }
 0x69d   :  { %5319 = vmatprep.subr.bf16.mxu0 %v6058_v29  ;;  %v3688_v29 = vld [vmem:[#allocation8 + $0x7b0] sm:$0xff] }
 0x69e   :  { %v6119_v40 = vcombine.low %v3684_v27, %v3688_v29 }
 0x69f   :  { %5238 = vmatpush1.bf16.msra.mxu1 %v6055_v34  ;;  %v6120_v34 = vcombine.high %v3684_v27, %v3688_v29 }
 0x6a0   :  { %5320 = vmatpush1.bf16.msra.mxu0 %v6057_v35  ;;  %5239 = vmatprep.subr.bf16.mxu1 %v6064_v36  ;;  %v6122_v35 = vcombine.high %v3685_v30, %v3689_v31  ;;  %v3692_v36 = vld [vmem:[#allocation8 + $0x7d0] sm:$0xff] }
 0x6a1   :  { %5321 = vmatprep.subr.bf16.mxu0 %v6066_v37  ;;  %v3696_v37 = vld [vmem:[#allocation8 + $0x7f0] sm:$0xff] }
 0x6a3   :  { %5240 = vmatpush1.bf16.msra.mxu1 %v6063_v43  ;;  %v6128_v43 = vcombine.high %v3692_v36, %v3696_v37 }
 0x6a4   :  { %5322 = vmatpush1.bf16.msra.mxu0 %v6065_v44  ;;  %5241 = vmatprep.subr.bf16.mxu1 %v6072_v45  ;;  %v6130_v44 = vcombine.high %v3693_v38, %v3697_v39  ;;  %v6127_v45 = vcombine.low %v3692_v36, %v3696_v37 }
 0x6a5   :  { %5323 = vmatprep.subr.bf16.mxu0 %v6074_v46  ;;  %v6129_v46 = vcombine.low %v3693_v38, %v3697_v39 }
 0x6a7   :  { %5242 = vmatpush1.bf16.msra.mxu1 %v6071_v5  ;;  %v3715_v5 = vrot.slane %v3698_v49, %v7255_v2 }
 0x6a8   :  { %5324 = vmatpush1.bf16.msra.mxu0 %v6073_v53  ;;  %5243 = vmatprep.subr.bf16.mxu1 %v6080_v54 }
 0x6a9   :  { %5325 = vmatprep.subr.bf16.mxu0 %v6082_v55 }
 0x6ab   :  { %5244 = vmatpush1.bf16.msra.mxu1 %v6079_v60 }
 0x6ac   :  { %5326 = vmatpush1.bf16.msra.mxu0 %v6081_v61  ;;  %5245 = vmatprep.subr.bf16.mxu1 %v6088_v0 }
 0x6ad   :  { %5327 = vmatprep.subr.bf16.mxu0 %v6090_v6 }
 0x6af   :  { %5246 = vmatpush1.bf16.msra.mxu1 %v6087_v9 }
 0x6b0   :  { %5328 = vmatpush1.bf16.msra.mxu0 %v6089_v10  ;;  %5247 = vmatprep.subr.bf16.mxu1 %v6096_v13 }
 0x6b1   :  { %5329 = vmatprep.subr.bf16.mxu0 %v6098_v11 }
 0x6b3   :  { %5248 = vmatpush1.bf16.msra.mxu1 %v6095_v42 }
 0x6b4   :  { %5330 = vmatpush1.bf16.msra.mxu0 %v6097_v17  ;;  %5249 = vmatprep.subr.bf16.mxu1 %v6104_v18  ;;  %v3718_v18 = vsub.s32 4, %v7241_v62 }
 0x6b5   :  { %5331 = vmatprep.subr.bf16.mxu0 %v6106_v19  ;;  %v3726_v19 = vsub.s32 6, %v7241_v62 }
 0x6b6   :  { %v3719_v22 = vrot.slane %v3698_v49, %v3718_v18 }
 0x6b7   :  { %5250 = vmatpush1.bf16.msra.mxu1 %v6103_v24  ;;  %v3727_v23 = vrot.slane %v3698_v49, %v3726_v19  ;;  %v3723_v24 = vrot.slane %v3698_v49, %v3722_v20 }
 0x6b8   :  { %5332 = vmatpush1.bf16.msra.mxu0 %v6105_v25  ;;  %5251 = vmatprep.subr.bf16.mxu1 %v6112_v47  ;;  %v3731_v25 = vrot.slane %v3698_v49, %v3730_v21 }
 0x6b9   :  { %5333 = vmatprep.subr.bf16.mxu0 %v6114_v26 }
 0x6bb   :  { %5252 = vmatpush1.bf16.msra.mxu1 %v6111_v32 }
 0x6bc   :  { %5334 = vmatpush1.bf16.msra.mxu0 %v6113_v33  ;;  %5253 = vmatprep.subr.bf16.mxu1 %v6120_v34 }
 0x6bd   :  { %5335 = vmatprep.subr.bf16.mxu0 %v6122_v35 }
 0x6bf   :  { %5254 = vmatpush1.bf16.msra.mxu1 %v6119_v40 }
 0x6c0   :  { %5336 = vmatpush1.bf16.msra.mxu0 %v6121_v41  ;;  %5255 = vmatprep.subr.bf16.mxu1 %v6128_v43 }
 0x6c1   :  { %5337 = vmatprep.subr.bf16.mxu0 %v6130_v44 }
 0x6c3   :  { %5256 = vmatpush1.bf16.msra.mxu1 %v6127_v45 }
 0x6c4   :  { %5338 = vmatpush1.bf16.msra.mxu0 %v6129_v46 }
 0x6c6   :  { %5258 = vmatmul.mubr.bf16.vlgmr.msra.gmra.mrb[24].mxu1 %v7387_v28 }
 0x6c7   :  { %5340 = vmatmul.mubr.bf16.vlgmr.msra.gmra.mrb[16].mxu0 %v7387_v28 }
 0x719   :  { %v5095_v53 = vpop.f32.mrb[20].mxu1  ;;  %v5177_v54 = vpop.f32.mrb[12].mxu0 }
 0x71a   :  { %v6197_v55 = vadd.f32 %v5095_v53, %v3703_v50  ;;  %v6199_v56 = vadd.f32 %v5177_v54, %v3711_v51  ;;  %v5097_v57 = vpop.f32.mrb[21].mxu1  ;;  %v5179_v58 = vpop.f32.mrb[13].mxu0 }
 0x71b   :  { %v6198_v59 = vadd.f32 %v5097_v57, %v3707_v52  ;;  %v6200_v28 = vadd.f32 %v5179_v58, %v3715_v5  ;;  %v5099_v60 = vpop.f32.mrb[22].mxu1  ;;  %v5181_v61 = vpop.f32.mrb[14].mxu0 }
 0x71c   :  { %v6131_v0 = vmul.f32 -1.442695, %v6197_v55  ;;  %v6133_v6 = vmul.f32 -1.442695, %v6199_v56  ;;  %v5100_v3 = vpop.f32.mrb[23].mxu1  ;;  %v5182_v63 = vpop.f32.mrb[15].mxu0 }
 0x71d   :  { %v6132_v4 = vmul.f32 -1.442695, %v6198_v59  ;;  %v6134_v48 = vmul.f32 -1.442695, %v6200_v28 }
 0x71e   :  { %6874 = vpow2.f32 %v6131_v0 }
 0x71f   :  { %6876 = vpow2.f32 %v6133_v6 }
 0x720   :  { %6878 = vpow2.f32 %v6132_v4 }
 0x721   :  { %6880 = vpow2.f32 %v6134_v48 }
 0x728   :  { %v6875_v1 = vpop.eup %6874 }
 0x729   :  { %v6877_v2 = vpop.eup %6876  ;;  %v5372_v7 = vadd.f32 1.0, %v6875_v1 }
 0x72a   :  { %v6879_v8 = vpop.eup %6878  ;;  %v5374_v9 = vadd.f32 1.0, %v6877_v2 }
 0x72b   :  { %v6881_v10 = vpop.eup %6880  ;;  %6882 = vrcp.f32 %v5372_v7  ;;  %v5373_v13 = vadd.f32 1.0, %v6879_v8 }
 0x72c   :  { %6884 = vrcp.f32 %v5374_v9  ;;  %v5375_v11 = vadd.f32 1.0, %v6881_v10 }
 0x72d   :  { %6886 = vrcp.f32 %v5373_v13 }
 0x72e   :  { %6888 = vrcp.f32 %v5375_v11 }
 0x735   :  { %v6883_v12 = vpop.eup %6882 }
 0x736   :  { %v6885_v14 = vpop.eup %6884 }
 0x737   :  { %v6887_v15 = vpop.eup %6886 }
 0x738   :  { %v6889_v16 = vpop.eup %6888  ;;  %v6143_v42 = vpack.c.bf16 %v6887_v15, %v6883_v12 }
 0x739   :  { %v6144_v17 = vpack.c.bf16 %v6889_v16, %v6885_v14 }
 0x73a   :  { %5428 = vst [vmem:[#allocation10] sm:$0xff] %v6143_v42 }
 0x73b   :  { %5429 = vst [vmem:[#allocation10 + $0x8] sm:$0xff] %v6144_v17 }
 0x799   :  { %v5259_v47 = vpop.f32.mrb[24].mxu1 }
 0x79a   :  { %v6201_v26 = vadd.f32 %v5259_v47, %v3719_v22  ;;  %v5341_v27 = vpop.f32.mrb[16].mxu0  ;;  %v5261_v29 = vpop.f32.mrb[25].mxu1 }
 0x79b   :  { %v6203_v30 = vadd.f32 %v5341_v27, %v3727_v23  ;;  %v6202_v31 = vadd.f32 %v5261_v29, %v3723_v24  ;;  %v5343_v32 = vpop.f32.mrb[17].mxu0  ;;  %v5263_v33 = vpop.f32.mrb[26].mxu1 }
 0x79c   :  { %v6135_v34 = vmul.f32 -1.442695, %v6201_v26  ;;  %v6204_v35 = vadd.f32 %v5343_v32, %v3731_v25  ;;  %v5345_v36 = vpop.f32.mrb[18].mxu0  ;;  %v5264_v37 = vpop.f32.mrb[27].mxu1 }
 0x79d   :  { %v6137_v38 = vmul.f32 -1.442695, %v6203_v30  ;;  %v6136_v39 = vmul.f32 -1.442695, %v6202_v31  ;;  %v5346_v40 = vpop.f32.mrb[19].mxu0 }
 0x79e   :  { %6890 = vpow2.f32 %v6135_v34  ;;  %v6138_v62 = vmul.f32 -1.442695, %v6204_v35 }
 0x79f   :  { %6892 = vpow2.f32 %v6137_v38 }
 0x7a0   :  { %6894 = vpow2.f32 %v6136_v39 }
 0x7a1   :  { %6896 = vpow2.f32 %v6138_v62 }
 0x7a8   :  { %v6891_v41 = vpop.eup %6890 }
 0x7a9   :  { %v6893_v43 = vpop.eup %6892  ;;  %v5376_v44 = vadd.f32 1.0, %v6891_v41 }
 0x7aa   :  { %v6895_v45 = vpop.eup %6894  ;;  %v5378_v46 = vadd.f32 1.0, %v6893_v43 }
 0x7ab   :  { %v6897_v49 = vpop.eup %6896  ;;  %6898 = vrcp.f32 %v5376_v44  ;;  %v5377_v50 = vadd.f32 1.0, %v6895_v45 }
 0x7ac   :  { %6900 = vrcp.f32 %v5378_v46  ;;  %v5379_v51 = vadd.f32 1.0, %v6897_v49 }
 0x7ad   :  { %6902 = vrcp.f32 %v5377_v50 }
 0x7ae   :  { %6904 = vrcp.f32 %v5379_v51 }
 0x7b5   :  { %v6899_v52 = vpop.eup %6898 }
 0x7b6   :  { %v6901_v5 = vpop.eup %6900 }
 0x7b7   :  { %v6903_v53 = vpop.eup %6902 }
 0x7b8   :  { %v6905_v54 = vpop.eup %6904  ;;  %v6145_v55 = vpack.c.bf16 %v6903_v53, %v6899_v52 }
 0x7b9   :  { %v6146_v56 = vpack.c.bf16 %v6905_v54, %v6901_v5 }
 0x7ba   :  { %5430 = vst [vmem:[#allocation10 + $0x10] sm:$0xff] %v6145_v55 }
 0x7bb   :  { %5431 = vst [vmem:[#allocation10 + $0x18] sm:$0xff] %v6146_v56 }
 0x7bc   :  { %7005 = shalt.err (!%p7002_p8)
}
 0x7bd   :  { %s7448_s5 = sld [smem:[#allocation17_spill]] }
 0x7c3   :  { %s7006_s3 = scalar_lea.hbm %s7448_s5, 512 }
 0x7c4   :  { %p7007_p9 = scmp.ne.s32.totalorder %s7448_s5, %s7006_s3  ;;  %p7010_p10 = scmp.lt.u32.totalorder %s7006_s3, %s7448_s5 }
 0x7c6   :  { %p7012_p11 = pnand %p7010_p10, %p7007_p9 }
 0x7c8   :  { %7015 = shalt.err (!%p7012_p11)
}
 0x7c9   :  { %5441 = dma.vmem_to_hbm [thread:$0]  %s5439_s16, 512, %s7448_s5, [#allocation4]  }
 0x7ca   :  { %7022 = dma.done.wait [#allocation4], 512  }
 0x7cb   :  { %7023 = vsyncadd [#allocation4], 4294966784 }
 0x7cc   :  { %5449 = vsyncpa [#allocation3], 1 }
 0x7cd   :  { %5450 = vsyncpa [#allocation6], 1 }
 0x7ce   :  { %5451 = vsyncpa [#allocation9], 1 }
 0x7cf   :  { %5452 = vsyncpa [#allocation4], 1 }

</bundles_post_ra>
